<compile_context>
chip_gen: v7x
topology: tpu7x:2x2x1
jax: 0.10.0
libtpu: 0.0.40
codegen_flags: <defaults>
</compile_context>

<pallas_src>
import functools

import jax
import jax.numpy as jnp
from jax import lax
from jax.experimental import pallas as pl
from jax.experimental.pallas import tpu as pltpu


# ---------------------------------------------------------------------------
# Kernel 1: GroupNorm statistics (channel-wise sum / sum-of-squares over HW).
# ---------------------------------------------------------------------------
def _stats_kernel(x_ref, sum_ref, sq_ref):
    @pl.when(pl.program_id(1) == 0)
    def _():
        sum_ref[...] = jnp.zeros_like(sum_ref)
        sq_ref[...] = jnp.zeros_like(sq_ref)

    x = x_ref[0].astype(jnp.float32)                      # (TS, C)
    sum_ref[...] += jnp.sum(x, axis=0, keepdims=True)     # fp32 accumulation
    sq_ref[...] += jnp.sum(x * x, axis=0, keepdims=True)


# ---------------------------------------------------------------------------
# Kernel 2: GroupNorm apply (precomputed per-channel scale/shift) + q/k/v
# 1x1 convs as bf16 MXU matmuls (fp32 accumulation).  C**-0.5 folded into q.
# ---------------------------------------------------------------------------
def _qkv_kernel(x_ref, scale_ref, shift_ref,
                wq_ref, bq_ref, wk_ref, bk_ref, wv_ref, bv_ref,
                q_ref, k_ref, v_ref, *, attn_scale):
    x = x_ref[0].astype(jnp.float32)                      # (TS, C)
    h = x * scale_ref[0] + shift_ref[0]                   # GroupNorm apply, fp32
    hb = h.astype(jnp.bfloat16)                           # cast only at MXU input

    q = jnp.dot(hb, wq_ref[...], preferred_element_type=jnp.float32) + bq_ref[...]
    k = jnp.dot(hb, wk_ref[...], preferred_element_type=jnp.float32) + bk_ref[...]
    v = jnp.dot(hb, wv_ref[...], preferred_element_type=jnp.float32) + bv_ref[...]

    q_ref[0] = (q * attn_scale).astype(q_ref.dtype)       # fold 1/sqrt(C) into q
    k_ref[0] = k.astype(k_ref.dtype)
    v_ref[0] = v.astype(v_ref.dtype)


# ---------------------------------------------------------------------------
# Kernel 3: flash attention (online softmax) + output projection + residual.
# grid = (B, num_q_tiles, num_k_tiles); ki is the innermost ("arbitrary")
# reduction axis; (b, qi) are "parallel" so v7x megacore stays busy at B=1.
# ---------------------------------------------------------------------------
def _flash_attn_kernel(q_ref, k_ref, v_ref, xres_ref, wp_ref, bp_ref,
                       o_ref, m_sc, l_sc, acc_sc):
    ki = pl.program_id(2)

    @pl.when(ki == 0)
    def _():
        m_sc[...] = jnp.full_like(m_sc, -jnp.inf)
        l_sc[...] = jnp.zeros_like(l_sc)
        acc_sc[...] = jnp.zeros_like(acc_sc)

    q = q_ref[0]                                          # (TQ, C) bf16, pre-scaled
    k = k_ref[0]                                          # (TK, C) bf16
    # contract channel dims of both operands -> no explicit k.T / XLU transpose
    s = lax.dot_general(q, k, (((1,), (1,)), ((), ())),
                        preferred_element_type=jnp.float32)       # (TQ, TK) fp32

    m_prev = m_sc[...]                                    # (TQ, 1)
    m_new = jnp.maximum(m_prev, jnp.max(s, axis=-1, keepdims=True))
    alpha = jnp.exp(m_prev - m_new)
    p = jnp.exp(s - m_new)                                # unnormalized probs, fp32
    l_sc[...] = alpha * l_sc[...] + jnp.sum(p, axis=-1, keepdims=True)
    acc_sc[...] = alpha * acc_sc[...] + jnp.dot(
        p.astype(jnp.bfloat16), v_ref[0], preferred_element_type=jnp.float32)
    m_sc[...] = m_new

    @pl.when(ki == pl.num_programs(2) - 1)
    def _():
        # normalize with a reciprocal of the row-sums (EUP), not a (TQ,TK) divide
        inv_l = pl.reciprocal(l_sc[...], approx=True)     # (TQ, 1)
        attn = (acc_sc[...] * inv_l).astype(jnp.bfloat16)  # (TQ, C)
        # proj weight kept in torch (C_out, C_in) layout; contracting the channel
        # dims of both operands yields (C_out, TQ) -> NCHW output tile directly.
        proj = lax.dot_general(wp_ref[...], attn, (((1,), (1,)), ((), ())),
                               preferred_element_type=jnp.float32)  # (C, TQ)
        out = proj + bp_ref[...] + xres_ref[0].astype(jnp.float32)
        o_ref[0] = out.astype(o_ref.dtype)


# ---------------------------------------------------------------------------
# Wrapper
# ---------------------------------------------------------------------------
def _pick_tile(n, target, align):
    """Largest divisor of n that is <= target and a multiple of align, else n."""
    for t in range(min(target, n), align - 1, -1):
        if n % t == 0 and t % align == 0:
            return t
    return n


def _vmem_limit(bytes_est):
    """Scoped-VMEM request: headroom over the static tile footprint, v7x-capped."""
    return int(min(max(4 * bytes_est, 16 * 2**20), 64 * 2**20))


def _const_spec(shape):
    """Grid-invariant operand: constant index_map + single-buffered."""
    return pl.BlockSpec(shape, lambda *_: (0,) * len(shape),
                        pipeline_mode=pl.Buffered(buffer_count=1))


def attn_block_2d(x_nchw, params, *, tq=128, tk=128, ts=512):
    B, C, H, W = x_nchw.shape
    HW = H * W
    G = 32 if C > 32 else 1                 # matches normalize()
    gs = C // G
    eps = 1e-6
    f32, bf16 = jnp.float32, jnp.bfloat16

    x_nchw = x_nchw.astype(f32)
    x_flat = x_nchw.reshape(B, C, HW)                    # NCHW view (no copy)
    # single layout change on the input; the attention kernel writes NCHW
    # output tiles directly, so there is no output transpose round trip.
    x_seq = jnp.transpose(x_flat, (0, 2, 1))             # (B, HW, C)

    TQ = _pick_tile(HW, tq, 128)       # lane-dim of the NCHW residual/out blocks
    TK = _pick_tile(HW, tk, 8)
    TS = _pick_tile(HW, ts, 8)
    nq, nk, ns = HW // TQ, HW // TK, HW // TS

    # ---- pass 1: GroupNorm statistics over the full spatial extent ----------
    stats_vmem = _vmem_limit(2 * TS * C * 4 + 8 * C * 4)
    ch_sum, ch_sq = pl.pallas_call(
        _stats_kernel,
        out_shape=(jax.ShapeDtypeStruct((B, 1, C), f32),
                   jax.ShapeDtypeStruct((B, 1, C), f32)),
        grid=(B, ns),
        in_specs=[pl.BlockSpec((1, TS, C), lambda b, s: (b, s, 0))],
        out_specs=(pl.BlockSpec((1, 1, C), lambda b, s: (b, 0, 0)),
                   pl.BlockSpec((1, 1, C), lambda b, s: (b, 0, 0))),
        compiler_params=pltpu.CompilerParams(
            dimension_semantics=("parallel", "arbitrary"),
            vmem_limit_bytes=stats_vmem),
    )(x_seq)

    # tiny (B, C) epilogue: group mean / rstd -> per-channel scale & shift
    gamma = params["gamma"].reshape(C).astype(f32)
    beta = params["beta"].reshape(C).astype(f32)
    n_grp = float(HW * gs)
    grp_sum = ch_sum.reshape(B, G, gs).sum(axis=-1)
    grp_sq = ch_sq.reshape(B, G, gs).sum(axis=-1)
    mean_g = grp_sum / n_grp
    var_g = jnp.maximum(grp_sq / n_grp - mean_g * mean_g, 0.0)   # clamp >= 0
    rstd_g = lax.rsqrt(var_g + eps)
    mean_c = jnp.repeat(mean_g, gs, axis=-1)                     # (B, C)
    rstd_c = jnp.repeat(rstd_g, gs, axis=-1)
    scale_c = (rstd_c * gamma[None, :]).reshape(B, 1, C)
    shift_c = (beta[None, :] - mean_c * rstd_c * gamma[None, :]).reshape(B, 1, C)

    # ---- pass 2: GroupNorm apply + q/k/v 1x1 convs (bf16 MXU) ---------------
    def w_in_out(name):    # torch (C_out, C_in, 1, 1) -> (C_in, C_out), bf16
        return jnp.transpose(params[name + "_w"].reshape(C, C), (1, 0)).astype(bf16)

    def bias_row(name):
        return params[name + "_b"].reshape(1, C).astype(f32)

    wq, wk, wv = w_in_out("q"), w_in_out("k"), w_in_out("v")
    bq, bk, bv = bias_row("q"), bias_row("k"), bias_row("v")
    wp = params["proj_w"].reshape(C, C).astype(bf16)     # torch (C_out, C_in) kept
    bp = params["proj_b"].reshape(C, 1).astype(f32)

    qkv_vmem = _vmem_limit(2 * TS * C * 4 + 4 * C * 4
                           + 3 * C * C * 2 + 3 * C * 4
                           + 3 * 2 * TS * C * 2 + 4 * TS * C * 4)
    qkv_cost = pl.CostEstimate(
        flops=int(6 * B * HW * C * C),
        transcendentals=0,
        bytes_accessed=int(B * HW * C * (4 + 3 * 2) + 4 * C * C))
    q, k, v = pl.pallas_call(
        functools.partial(_qkv_kernel, attn_scale=float(C) ** -0.5),
        out_shape=tuple(jax.ShapeDtypeStruct((B, HW, C), bf16) for _ in range(3)),
        grid=(B, ns),
        in_specs=[pl.BlockSpec((1, TS, C), lambda b, s: (b, s, 0)),
                  pl.BlockSpec((1, 1, C), lambda b, s: (b, 0, 0)),   # scale
                  pl.BlockSpec((1, 1, C), lambda b, s: (b, 0, 0)),   # shift
                  _const_spec((C, C)), _const_spec((1, C)),
                  _const_spec((C, C)), _const_spec((1, C)),
                  _const_spec((C, C)), _const_spec((1, C))],
        out_specs=tuple(pl.BlockSpec((1, TS, C), lambda b, s: (b, s, 0))
                        for _ in range(3)),
        compiler_params=pltpu.CompilerParams(
            dimension_semantics=("parallel", "parallel"),
            vmem_limit_bytes=qkv_vmem),
        cost_estimate=qkv_cost,
    )(x_seq, scale_c, shift_c, wq, bq, wk, bk, wv, bv)

    # ---- pass 3: flash attention + output projection + residual -------------
    attn_vmem = _vmem_limit(2 * TQ * C * 2 + 4 * TK * C * 2       # q/k/v blocks
                            + 4 * C * TQ * 4                      # residual + out
                            + C * C * 2 + C * 4                   # wp, bp
                            + TQ * C * 4 + 2 * TQ * 4             # acc, m, l
                            + 4 * TQ * TK * 4)                    # logit/prob temps
    attn_cost = pl.CostEstimate(
        flops=int(4 * B * HW * HW * C + 2 * B * HW * C * C),
        transcendentals=int(B * HW * HW),
        bytes_accessed=int(B * HW * C * 2 * (1 + 2 * nq) + 2 * B * C * HW * 4))
    out_flat = pl.pallas_call(
        _flash_attn_kernel,
        out_shape=jax.ShapeDtypeStruct((B, C, HW), f32),
        grid=(B, nq, nk),
        in_specs=[pl.BlockSpec((1, TQ, C), lambda b, qi, ki: (b, qi, 0)),
                  pl.BlockSpec((1, TK, C), lambda b, qi, ki: (b, ki, 0)),
                  pl.BlockSpec((1, TK, C), lambda b, qi, ki: (b, ki, 0)),
                  pl.BlockSpec((1, C, TQ), lambda b, qi, ki: (b, 0, qi)),
                  _const_spec((C, C)), _const_spec((C, 1))],
        out_specs=pl.BlockSpec((1, C, TQ), lambda b, qi, ki: (b, 0, qi)),
        scratch_shapes=[pltpu.VMEM((TQ, 1), f32),     # m
                        pltpu.VMEM((TQ, 1), f32),     # l
                        pltpu.VMEM((TQ, C), f32)],    # acc
        compiler_params=pltpu.CompilerParams(
            dimension_semantics=("parallel", "parallel", "arbitrary"),
            vmem_limit_bytes=attn_vmem),
        cost_estimate=attn_cost,
    )(q, k, v, x_flat, wp, bp)

    return out_flat.reshape(B, C, H, W)


# ---------------------------------------------------------------------------
# Pure-JAX reference mirroring the PyTorch forward pass exactly.
# ---------------------------------------------------------------------------
def attn_block_2d_reference(x, params):
    B, C, H, W = x.shape
    G = 32 if C > 32 else 1
    xg = x.reshape(B, G, C // G, H, W)
    mean = xg.mean(axis=(2, 3, 4), keepdims=True)
    var = xg.var(axis=(2, 3, 4), keepdims=True)
    h = ((xg - mean) / jnp.sqrt(var + 1e-6)).reshape(B, C, H, W)
    h = h * params["gamma"][None, :, None, None] + params["beta"][None, :, None, None]

    def conv(nm, t):
        w = params[nm + "_w"].reshape(C, C)
        return jnp.einsum("oc,bchw->bohw", w, t) + params[nm + "_b"][None, :, None, None]

    q, k, v = conv("q", h), conv("k", h), conv("v", h)
    q = q.reshape(B, C, H * W).transpose(0, 2, 1)
    k = k.reshape(B, C, H * W)
    w_ = jnp.einsum("bqc,bck->bqk", q, k) * (int(C) ** -0.5)
    w_ = jax.nn.softmax(w_, axis=2)
    v = v.reshape(B, C, H * W)
    hh = jnp.einsum("bck,bqk->bcq", v, w_).reshape(B, C, H, W)
    hh = conv("proj", hh)
    return x + hh


def init_params(key, C):
    ks = jax.random.split(key, 10)
    p = {
        "gamma": 1.0 + 0.1 * jax.random.normal(ks[0], (C,), jnp.float32),
        "beta": 0.1 * jax.random.normal(ks[1], (C,), jnp.float32),
    }
    for i, nm in enumerate(("q", "k", "v", "proj")):
        p[nm + "_w"] = 0.2 * jax.random.normal(ks[2 + 2 * i], (C, C, 1, 1), jnp.float32)
        p[nm + "_b"] = 0.1 * jax.random.normal(ks[3 + 2 * i], (C,), jnp.float32)
    return p


if __name__ == "__main__":
    key = jax.random.PRNGKey(0)
    kx, kp = jax.random.split(key)

    B, C, H, W = 2, 4, 16, 16
    x = jax.random.normal(kx, (B, C, H, W), jnp.float32)
    params = init_params(kp, C)

    out = jax.block_until_ready(jax.jit(attn_block_2d)(x, params))
    ref = attn_block_2d_reference(x, params)

    assert out.shape == (B, C, H, W)
    max_err = float(jnp.max(jnp.abs(out - ref)))
    # bf16 MXU operands (fp32 accumulation) => loosened tolerance vs fp32 reference
    assert jnp.allclose(out, ref, rtol=5e-2, atol=5e-2), (
        f"mismatch vs reference (max abs err {max_err:.3e})")
    print("KERNEL_OK")
</pallas_src>

<mosaic_0001>
module attributes {stable_mosaic.version = 11 : i64} {
  func.func @_stats_kernel(%arg0: i32, %arg1: i32, %arg2: memref<1x256x4xf32, #tpu.memory_space<vmem>>, %arg3: memref<1x1x4xf32, #tpu.memory_space<vmem>>, %arg4: memref<1x1x4xf32, #tpu.memory_space<vmem>>) attributes {dimension_semantics = [#tpu.dimension_semantics<parallel>, #tpu.dimension_semantics<arbitrary>], iteration_bounds = array<i64: 2, 1>, scalar_prefetch = 0 : i64, scratch_operands = 0 : i64, tpu.core_type = #tpu.core_type<tc>, window_params = [{transform_indices = @transform_0, window_bounds = array<i64: 1, 256, 4>}, {transform_indices = @transform_1, window_bounds = array<i64: 1, 1, 4>}, {transform_indices = @transform_2, window_bounds = array<i64: 1, 1, 4>}]} {
    %c0_i32 = arith.constant 0 : i32
    %0 = arith.cmpi eq, %arg1, %c0_i32 : i32
    %1 = arith.extui %0 : i1 to i32
    %c0_i32_0 = arith.constant 0 : i32
    %2 = arith.cmpi ne, %1, %c0_i32_0 : i32
    scf.if %2 {
      %cst_16 = arith.constant 0.000000e+00 : f32
      %18 = vector.broadcast %cst_16 : f32 to vector<1x1x4xf32>
      %c0_17 = arith.constant 0 : index
      %c0_18 = arith.constant 0 : index
      %c0_19 = arith.constant 0 : index
      %19 = vector.load %arg3[%c0_17, %c0_18, %c0_19] : memref<1x1x4xf32, #tpu.memory_space<vmem>>, vector<1x1x4xf32>
      tpu.vector_store %arg3[%c0_17, %c0_18, %c0_19], %18 {strides = array<i32>} : memref<1x1x4xf32, #tpu.memory_space<vmem>>, vector<1x1x4xf32>,
      %cst_20 = arith.constant 0.000000e+00 : f32
      %20 = vector.broadcast %cst_20 : f32 to vector<1x1x4xf32>
      %c0_21 = arith.constant 0 : index
      %c0_22 = arith.constant 0 : index
      %c0_23 = arith.constant 0 : index
      %21 = vector.load %arg4[%c0_21, %c0_22, %c0_23] : memref<1x1x4xf32, #tpu.memory_space<vmem>>, vector<1x1x4xf32>
      tpu.vector_store %arg4[%c0_21, %c0_22, %c0_23], %20 {strides = array<i32>} : memref<1x1x4xf32, #tpu.memory_space<vmem>>, vector<1x1x4xf32>,
    } else {
    }
    %c0 = arith.constant 0 : index
    %c0_1 = arith.constant 0 : index
    %c0_2 = arith.constant 0 : index
    %3 = vector.load %arg2[%c0, %c0_1, %c0_2] : memref<1x256x4xf32, #tpu.memory_space<vmem>>, vector<1x256x4xf32>
    %4 = vector.shape_cast %3 : vector<1x256x4xf32> to vector<256x4xf32>
    %c0_3 = arith.constant 0 : index
    %c0_4 = arith.constant 0 : index
    %c0_5 = arith.constant 0 : index
    %5 = vector.load %arg3[%c0_3, %c0_4, %c0_5] : memref<1x1x4xf32, #tpu.memory_space<vmem>>, vector<1x1x4xf32>
    %cst = arith.constant dense<0.000000e+00> : vector<4xf32>
    %6 = vector.multi_reduction <add>, %4, %cst [0] : vector<256x4xf32> to vector<4xf32>
    %7 = vector.shape_cast %6 : vector<4xf32> to vector<1x4xf32>
    %8 = vector.shape_cast %7 : vector<1x4xf32> to vector<1x1x4xf32>
    %9 = arith.addf %5, %8 : vector<1x1x4xf32>
    %c0_6 = arith.constant 0 : index
    %c0_7 = arith.constant 0 : index
    %c0_8 = arith.constant 0 : index
    %10 = vector.load %arg3[%c0_6, %c0_7, %c0_8] : memref<1x1x4xf32, #tpu.memory_space<vmem>>, vector<1x1x4xf32>
    tpu.vector_store %arg3[%c0_6, %c0_7, %c0_8], %9 {strides = array<i32>} : memref<1x1x4xf32, #tpu.memory_space<vmem>>, vector<1x1x4xf32>,
    %c0_9 = arith.constant 0 : index
    %c0_10 = arith.constant 0 : index
    %c0_11 = arith.constant 0 : index
    %11 = vector.load %arg4[%c0_9, %c0_10, %c0_11] : memref<1x1x4xf32, #tpu.memory_space<vmem>>, vector<1x1x4xf32>
    %12 = arith.mulf %4, %4 : vector<256x4xf32>
    %cst_12 = arith.constant dense<0.000000e+00> : vector<4xf32>
    %13 = vector.multi_reduction <add>, %12, %cst_12 [0] : vector<256x4xf32> to vector<4xf32>
    %14 = vector.shape_cast %13 : vector<4xf32> to vector<1x4xf32>
    %15 = vector.shape_cast %14 : vector<1x4xf32> to vector<1x1x4xf32>
    %16 = arith.addf %11, %15 : vector<1x1x4xf32>
    %c0_13 = arith.constant 0 : index
    %c0_14 = arith.constant 0 : index
    %c0_15 = arith.constant 0 : index
    %17 = vector.load %arg4[%c0_13, %c0_14, %c0_15] : memref<1x1x4xf32, #tpu.memory_space<vmem>>, vector<1x1x4xf32>
    tpu.vector_store %arg4[%c0_13, %c0_14, %c0_15], %16 {strides = array<i32>} : memref<1x1x4xf32, #tpu.memory_space<vmem>>, vector<1x1x4xf32>,
    return
  }
  func.func @transform_0(%arg0: i32, %arg1: i32) -> (i32, i32, i32) {
    %c0_i32 = arith.constant 0 : i32
    %c0_i32_0 = arith.constant 0 : i32
    return %arg0, %arg1, %c0_i32 : i32, i32, i32
  }
  func.func @transform_1(%arg0: i32, %arg1: i32) -> (i32, i32, i32) {
    %c0_i32 = arith.constant 0 : i32
    %c0_i32_0 = arith.constant 0 : i32
    %c0_i32_1 = arith.constant 0 : i32
    return %arg0, %c0_i32, %c0_i32_0 : i32, i32, i32
  }
  func.func @transform_2(%arg0: i32, %arg1: i32) -> (i32, i32, i32) {
    %c0_i32 = arith.constant 0 : i32
    %c0_i32_0 = arith.constant 0 : i32
    %c0_i32_1 = arith.constant 0 : i32
    return %arg0, %c0_i32, %c0_i32_0 : i32, i32, i32
  }
}

module attributes {stable_mosaic.version = 11 : i64} {
  func.func @_qkv_kernel(%arg0: i32, %arg1: i32, %arg2: memref<1x256x4xf32, #tpu.memory_space<vmem>>, %arg3: memref<1x1x4xf32, #tpu.memory_space<vmem>>, %arg4: memref<1x1x4xf32, #tpu.memory_space<vmem>>, %arg5: memref<4x4xbf16, #tpu.memory_space<vmem>>, %arg6: memref<1x4xf32, #tpu.memory_space<vmem>>, %arg7: memref<4x4xbf16, #tpu.memory_space<vmem>>, %arg8: memref<1x4xf32, #tpu.memory_space<vmem>>, %arg9: memref<4x4xbf16, #tpu.memory_space<vmem>>, %arg10: memref<1x4xf32, #tpu.memory_space<vmem>>, %arg11: memref<1x256x4xbf16, #tpu.memory_space<vmem>>, %arg12: memref<1x256x4xbf16, #tpu.memory_space<vmem>>, %arg13: memref<1x256x4xbf16, #tpu.memory_space<vmem>>) attributes {dimension_semantics = [#tpu.dimension_semantics<parallel>, #tpu.dimension_semantics<parallel>], iteration_bounds = array<i64: 2, 1>, scalar_prefetch = 0 : i64, scratch_operands = 0 : i64, tpu.core_type = #tpu.core_type<tc>, window_params = [{transform_indices = @transform_0, window_bounds = array<i64: 1, 256, 4>}, {transform_indices = @transform_1, window_bounds = array<i64: 1, 1, 4>}, {transform_indices = @transform_2, window_bounds = array<i64: 1, 1, 4>}, {pipeline_mode = #tpu.pipeline_mode<synchronous>, transform_indices = @transform_3, window_bounds = array<i64: 4, 4>}, {pipeline_mode = #tpu.pipeline_mode<synchronous>, transform_indices = @transform_4, window_bounds = array<i64: 1, 4>}, {pipeline_mode = #tpu.pipeline_mode<synchronous>, transform_indices = @transform_5, window_bounds = array<i64: 4, 4>}, {pipeline_mode = #tpu.pipeline_mode<synchronous>, transform_indices = @transform_6, window_bounds = array<i64: 1, 4>}, {pipeline_mode = #tpu.pipeline_mode<synchronous>, transform_indices = @transform_7, window_bounds = array<i64: 4, 4>}, {pipeline_mode = #tpu.pipeline_mode<synchronous>, transform_indices = @transform_8, window_bounds = array<i64: 1, 4>}, {transform_indices = @transform_9, window_bounds = array<i64: 1, 256, 4>}, {transform_indices = @transform_10, window_bounds = array<i64: 1, 256, 4>}, {transform_indices = @transform_11, window_bounds = array<i64: 1, 256, 4>}]} {
    %c0 = arith.constant 0 : index
    %c0_0 = arith.constant 0 : index
    %c0_1 = arith.constant 0 : index
    %0 = vector.load %arg2[%c0, %c0_0, %c0_1] : memref<1x256x4xf32, #tpu.memory_space<vmem>>, vector<1x256x4xf32>
    %1 = vector.shape_cast %0 : vector<1x256x4xf32> to vector<256x4xf32>
    %c0_2 = arith.constant 0 : index
    %c0_3 = arith.constant 0 : index
    %c0_4 = arith.constant 0 : index
    %2 = vector.load %arg3[%c0_2, %c0_3, %c0_4] : memref<1x1x4xf32, #tpu.memory_space<vmem>>, vector<1x1x4xf32>
    %3 = vector.shape_cast %2 : vector<1x1x4xf32> to vector<1x4xf32>
    %4 = vector.broadcast %3 : vector<1x4xf32> to vector<256x4xf32>
    %5 = arith.mulf %1, %4 : vector<256x4xf32>
    %c0_5 = arith.constant 0 : index
    %c0_6 = arith.constant 0 : index
    %c0_7 = arith.constant 0 : index
    %6 = vector.load %arg4[%c0_5, %c0_6, %c0_7] : memref<1x1x4xf32, #tpu.memory_space<vmem>>, vector<1x1x4xf32>
    %7 = vector.shape_cast %6 : vector<1x1x4xf32> to vector<1x4xf32>
    %8 = vector.broadcast %7 : vector<1x4xf32> to vector<256x4xf32>
    %9 = arith.addf %5, %8 : vector<256x4xf32>
    %10 = arith.truncf %9 : vector<256x4xf32> to vector<256x4xbf16>
    %c0_8 = arith.constant 0 : index
    %c0_9 = arith.constant 0 : index
    %11 = vector.load %arg5[%c0_8, %c0_9] : memref<4x4xbf16, #tpu.memory_space<vmem>>, vector<4x4xbf16>
    %cst = arith.constant dense<0.000000e+00> : vector<256x4xf32>
    %12 = tpu.matmul %10, %11, %cst {dimension_numbers = #tpu.dot_dimension_numbers<[1], [0], [0], [1], [0, 0, 1, 1], [], []>} : vector<256x4xbf16>, vector<4x4xbf16>, vector<256x4xf32> -> vector<256x4xf32>
    %c0_10 = arith.constant 0 : index
    %c0_11 = arith.constant 0 : index
    %13 = vector.load %arg6[%c0_10, %c0_11] : memref<1x4xf32, #tpu.memory_space<vmem>>, vector<1x4xf32>
    %14 = vector.broadcast %13 : vector<1x4xf32> to vector<256x4xf32>
    %15 = arith.addf %12, %14 : vector<256x4xf32>
    %c0_12 = arith.constant 0 : index
    %c0_13 = arith.constant 0 : index
    %16 = vector.load %arg7[%c0_12, %c0_13] : memref<4x4xbf16, #tpu.memory_space<vmem>>, vector<4x4xbf16>
    %cst_14 = arith.constant dense<0.000000e+00> : vector<256x4xf32>
    %17 = tpu.matmul %10, %16, %cst_14 {dimension_numbers = #tpu.dot_dimension_numbers<[1], [0], [0], [1], [0, 0, 1, 1], [], []>} : vector<256x4xbf16>, vector<4x4xbf16>, vector<256x4xf32> -> vector<256x4xf32>
    %c0_15 = arith.constant 0 : index
    %c0_16 = arith.constant 0 : index
    %18 = vector.load %arg8[%c0_15, %c0_16] : memref<1x4xf32, #tpu.memory_space<vmem>>, vector<1x4xf32>
    %19 = vector.broadcast %18 : vector<1x4xf32> to vector<256x4xf32>
    %20 = arith.addf %17, %19 : vector<256x4xf32>
    %c0_17 = arith.constant 0 : index
    %c0_18 = arith.constant 0 : index
    %21 = vector.load %arg9[%c0_17, %c0_18] : memref<4x4xbf16, #tpu.memory_space<vmem>>, vector<4x4xbf16>
    %cst_19 = arith.constant dense<0.000000e+00> : vector<256x4xf32>
    %22 = tpu.matmul %10, %21, %cst_19 {dimension_numbers = #tpu.dot_dimension_numbers<[1], [0], [0], [1], [0, 0, 1, 1], [], []>} : vector<256x4xbf16>, vector<4x4xbf16>, vector<256x4xf32> -> vector<256x4xf32>
    %c0_20 = arith.constant 0 : index
    %c0_21 = arith.constant 0 : index
    %23 = vector.load %arg10[%c0_20, %c0_21] : memref<1x4xf32, #tpu.memory_space<vmem>>, vector<1x4xf32>
    %24 = vector.broadcast %23 : vector<1x4xf32> to vector<256x4xf32>
    %25 = arith.addf %22, %24 : vector<256x4xf32>
    %cst_22 = arith.constant 5.000000e-01 : f32
    %26 = vector.broadcast %cst_22 : f32 to vector<256x4xf32>
    %27 = arith.mulf %15, %26 : vector<256x4xf32>
    %28 = arith.truncf %27 : vector<256x4xf32> to vector<256x4xbf16>
    %c0_23 = arith.constant 0 : index
    %c0_24 = arith.constant 0 : index
    %c0_25 = arith.constant 0 : index
    %29 = vector.load %arg11[%c0_23, %c0_24, %c0_25] : memref<1x256x4xbf16, #tpu.memory_space<vmem>>, vector<1x256x4xbf16>
    %30 = vector.shape_cast %29 : vector<1x256x4xbf16> to vector<256x4xbf16>
    %31 = vector.shape_cast %28 : vector<256x4xbf16> to vector<1x256x4xbf16>
    tpu.vector_store %arg11[%c0_23, %c0_24, %c0_25], %31 {strides = array<i32>} : memref<1x256x4xbf16, #tpu.memory_space<vmem>>, vector<1x256x4xbf16>,
    %32 = arith.truncf %20 : vector<256x4xf32> to vector<256x4xbf16>
    %c0_26 = arith.constant 0 : index
    %c0_27 = arith.constant 0 : index
    %c0_28 = arith.constant 0 : index
    %33 = vector.load %arg12[%c0_26, %c0_27, %c0_28] : memref<1x256x4xbf16, #tpu.memory_space<vmem>>, vector<1x256x4xbf16>
    %34 = vector.shape_cast %33 : vector<1x256x4xbf16> to vector<256x4xbf16>
    %35 = vector.shape_cast %32 : vector<256x4xbf16> to vector<1x256x4xbf16>
    tpu.vector_store %arg12[%c0_26, %c0_27, %c0_28], %35 {strides = array<i32>} : memref<1x256x4xbf16, #tpu.memory_space<vmem>>, vector<1x256x4xbf16>,
    %36 = arith.truncf %25 : vector<256x4xf32> to vector<256x4xbf16>
    %c0_29 = arith.constant 0 : index
    %c0_30 = arith.constant 0 : index
    %c0_31 = arith.constant 0 : index
    %37 = vector.load %arg13[%c0_29, %c0_30, %c0_31] : memref<1x256x4xbf16, #tpu.memory_space<vmem>>, vector<1x256x4xbf16>
    %38 = vector.shape_cast %37 : vector<1x256x4xbf16> to vector<256x4xbf16>
    %39 = vector.shape_cast %36 : vector<256x4xbf16> to vector<1x256x4xbf16>
    tpu.vector_store %arg13[%c0_29, %c0_30, %c0_31], %39 {strides = array<i32>} : memref<1x256x4xbf16, #tpu.memory_space<vmem>>, vector<1x256x4xbf16>,
    return
  }
  func.func @transform_0(%arg0: i32, %arg1: i32) -> (i32, i32, i32) {
    %c0_i32 = arith.constant 0 : i32
    %c0_i32_0 = arith.constant 0 : i32
    return %arg0, %arg1, %c0_i32 : i32, i32, i32
  }
  func.func @transform_1(%arg0: i32, %arg1: i32) -> (i32, i32, i32) {
    %c0_i32 = arith.constant 0 : i32
    %c0_i32_0 = arith.constant 0 : i32
    %c0_i32_1 = arith.constant 0 : i32
    return %arg0, %c0_i32, %c0_i32_0 : i32, i32, i32
  }
  func.func @transform_2(%arg0: i32, %arg1: i32) -> (i32, i32, i32) {
    %c0_i32 = arith.constant 0 : i32
    %c0_i32_0 = arith.constant 0 : i32
    %c0_i32_1 = arith.constant 0 : i32
    return %arg0, %c0_i32, %c0_i32_0 : i32, i32, i32
  }
  func.func @transform_3(%arg0: i32, %arg1: i32) -> (i32, i32) {
    %c0_i32 = arith.constant 0 : i32
    %c0_i32_0 = arith.constant 0 : i32
    %c0_i32_1 = arith.constant 0 : i32
    return %c0_i32, %c0_i32_0 : i32, i32
  }
  func.func @transform_4(%arg0: i32, %arg1: i32) -> (i32, i32) {
    %c0_i32 = arith.constant 0 : i32
    %c0_i32_0 = arith.constant 0 : i32
    %c0_i32_1 = arith.constant 0 : i32
    return %c0_i32, %c0_i32_0 : i32, i32
  }
  func.func @transform_5(%arg0: i32, %arg1: i32) -> (i32, i32) {
    %c0_i32 = arith.constant 0 : i32
    %c0_i32_0 = arith.constant 0 : i32
    %c0_i32_1 = arith.constant 0 : i32
    return %c0_i32, %c0_i32_0 : i32, i32
  }
  func.func @transform_6(%arg0: i32, %arg1: i32) -> (i32, i32) {
    %c0_i32 = arith.constant 0 : i32
    %c0_i32_0 = arith.constant 0 : i32
    %c0_i32_1 = arith.constant 0 : i32
    return %c0_i32, %c0_i32_0 : i32, i32
  }
  func.func @transform_7(%arg0: i32, %arg1: i32) -> (i32, i32) {
    %c0_i32 = arith.constant 0 : i32
    %c0_i32_0 = arith.constant 0 : i32
    %c0_i32_1 = arith.constant 0 : i32
    return %c0_i32, %c0_i32_0 : i32, i32
  }
  func.func @transform_8(%arg0: i32, %arg1: i32) -> (i32, i32) {
    %c0_i32 = arith.constant 0 : i32
    %c0_i32_0 = arith.constant 0 : i32
    %c0_i32_1 = arith.constant 0 : i32
    return %c0_i32, %c0_i32_0 : i32, i32
  }
  func.func @transform_9(%arg0: i32, %arg1: i32) -> (i32, i32, i32) {
    %c0_i32 = arith.constant 0 : i32
    %c0_i32_0 = arith.constant 0 : i32
    return %arg0, %arg1, %c0_i32 : i32, i32, i32
  }
  func.func @transform_10(%arg0: i32, %arg1: i32) -> (i32, i32, i32) {
    %c0_i32 = arith.constant 0 : i32
    %c0_i32_0 = arith.constant 0 : i32
    return %arg0, %arg1, %c0_i32 : i32, i32, i32
  }
  func.func @transform_11(%arg0: i32, %arg1: i32) -> (i32, i32, i32) {
    %c0_i32 = arith.constant 0 : i32
    %c0_i32_0 = arith.constant 0 : i32
    return %arg0, %arg1, %c0_i32 : i32, i32, i32
  }
}

module attributes {stable_mosaic.version = 11 : i64} {
  func.func @_flash_attn_kernel(%arg0: i32, %arg1: i32, %arg2: i32, %arg3: memref<1x128x4xbf16, #tpu.memory_space<vmem>>, %arg4: memref<1x128x4xbf16, #tpu.memory_space<vmem>>, %arg5: memref<1x128x4xbf16, #tpu.memory_space<vmem>>, %arg6: memref<1x4x128xf32, #tpu.memory_space<vmem>>, %arg7: memref<4x4xbf16, #tpu.memory_space<vmem>>, %arg8: memref<4x1xf32, #tpu.memory_space<vmem>>, %arg9: memref<1x4x128xf32, #tpu.memory_space<vmem>>, %arg10: memref<128x1xf32, #tpu.memory_space<vmem>>, %arg11: memref<128x1xf32, #tpu.memory_space<vmem>>, %arg12: memref<128x4xf32, #tpu.memory_space<vmem>>) attributes {dimension_semantics = [#tpu.dimension_semantics<parallel>, #tpu.dimension_semantics<parallel>, #tpu.dimension_semantics<arbitrary>], iteration_bounds = array<i64: 2, 2, 2>, scalar_prefetch = 0 : i64, scratch_operands = 3 : i64, tpu.core_type = #tpu.core_type<tc>, window_params = [{transform_indices = @transform_0, window_bounds = array<i64: 1, 128, 4>}, {transform_indices = @transform_1, window_bounds = array<i64: 1, 128, 4>}, {transform_indices = @transform_2, window_bounds = array<i64: 1, 128, 4>}, {transform_indices = @transform_3, window_bounds = array<i64: 1, 4, 128>}, {pipeline_mode = #tpu.pipeline_mode<synchronous>, transform_indices = @transform_4, window_bounds = array<i64: 4, 4>}, {pipeline_mode = #tpu.pipeline_mode<synchronous>, transform_indices = @transform_5, window_bounds = array<i64: 4, 1>}, {transform_indices = @transform_6, window_bounds = array<i64: 1, 4, 128>}]} {
    %c0_i32 = arith.constant 0 : i32
    %0 = arith.cmpi eq, %arg2, %c0_i32 : i32
    %1 = arith.extui %0 : i1 to i32
    %c0_i32_0 = arith.constant 0 : i32
    %2 = arith.cmpi ne, %1, %c0_i32_0 : i32
    scf.if %2 {
      %cst_25 = arith.constant 0xFF800000 : f32
      %36 = vector.broadcast %cst_25 : f32 to vector<128x1xf32>
      %c0_26 = arith.constant 0 : index
      %c0_27 = arith.constant 0 : index
      %37 = vector.load %arg10[%c0_26, %c0_27] : memref<128x1xf32, #tpu.memory_space<vmem>>, vector<128x1xf32>
      tpu.vector_store %arg10[%c0_26, %c0_27], %36 {strides = array<i32>} : memref<128x1xf32, #tpu.memory_space<vmem>>, vector<128x1xf32>,
      %cst_28 = arith.constant 0.000000e+00 : f32
      %38 = vector.broadcast %cst_28 : f32 to vector<128x1xf32>
      %c0_29 = arith.constant 0 : index
      %c0_30 = arith.constant 0 : index
      %39 = vector.load %arg11[%c0_29, %c0_30] : memref<128x1xf32, #tpu.memory_space<vmem>>, vector<128x1xf32>
      tpu.vector_store %arg11[%c0_29, %c0_30], %38 {strides = array<i32>} : memref<128x1xf32, #tpu.memory_space<vmem>>, vector<128x1xf32>,
      %cst_31 = arith.constant 0.000000e+00 : f32
      %40 = vector.broadcast %cst_31 : f32 to vector<128x4xf32>
      %c0_32 = arith.constant 0 : index
      %c0_33 = arith.constant 0 : index
      %41 = vector.load %arg12[%c0_32, %c0_33] : memref<128x4xf32, #tpu.memory_space<vmem>>, vector<128x4xf32>
      tpu.vector_store %arg12[%c0_32, %c0_33], %40 {strides = array<i32>} : memref<128x4xf32, #tpu.memory_space<vmem>>, vector<128x4xf32>,
    } else {
    }
    %c0 = arith.constant 0 : index
    %c0_1 = arith.constant 0 : index
    %c0_2 = arith.constant 0 : index
    %3 = vector.load %arg3[%c0, %c0_1, %c0_2] : memref<1x128x4xbf16, #tpu.memory_space<vmem>>, vector<1x128x4xbf16>
    %4 = vector.shape_cast %3 : vector<1x128x4xbf16> to vector<128x4xbf16>
    %c0_3 = arith.constant 0 : index
    %c0_4 = arith.constant 0 : index
    %c0_5 = arith.constant 0 : index
    %5 = vector.load %arg4[%c0_3, %c0_4, %c0_5] : memref<1x128x4xbf16, #tpu.memory_space<vmem>>, vector<1x128x4xbf16>
    %6 = vector.shape_cast %5 : vector<1x128x4xbf16> to vector<128x4xbf16>
    %cst = arith.constant dense<0.000000e+00> : vector<128x128xf32>
    %7 = tpu.matmul %4, %6, %cst {dimension_numbers = #tpu.dot_dimension_numbers<[1], [1], [0], [0], [0, 0, 1, 0], [], []>} : vector<128x4xbf16>, vector<128x4xbf16>, vector<128x128xf32> -> vector<128x128xf32>
    %c0_6 = arith.constant 0 : index
    %c0_7 = arith.constant 0 : index
    %8 = vector.load %arg10[%c0_6, %c0_7] : memref<128x1xf32, #tpu.memory_space<vmem>>, vector<128x1xf32>
    %cst_8 = arith.constant dense<0xFF800000> : vector<128xf32>
    %9 = vector.multi_reduction <maximumf>, %7, %cst_8 [1] : vector<128x128xf32> to vector<128xf32>
    %10 = vector.shape_cast %9 : vector<128xf32> to vector<128x1xf32>
    %11 = arith.maximumf %8, %10 : vector<128x1xf32>
    %12 = arith.subf %8, %11 : vector<128x1xf32>
    %13 = math.exp %12 : vector<128x1xf32>
    %14 = vector.broadcast %11 : vector<128x1xf32> to vector<128x128xf32>
    %15 = arith.subf %7, %14 : vector<128x128xf32>
    %16 = math.exp %15 : vector<128x128xf32>
    %c0_9 = arith.constant 0 : index
    %c0_10 = arith.constant 0 : index
    %17 = vector.load %arg11[%c0_9, %c0_10] : memref<128x1xf32, #tpu.memory_space<vmem>>, vector<128x1xf32>
    %18 = arith.mulf %13, %17 : vector<128x1xf32>
    %cst_11 = arith.constant dense<0.000000e+00> : vector<128xf32>
    %19 = vector.multi_reduction <add>, %16, %cst_11 [1] : vector<128x128xf32> to vector<128xf32>
    %20 = vector.shape_cast %19 : vector<128xf32> to vector<128x1xf32>
    %21 = arith.addf %18, %20 : vector<128x1xf32>
    %c0_12 = arith.constant 0 : index
    %c0_13 = arith.constant 0 : index
    %22 = vector.load %arg11[%c0_12, %c0_13] : memref<128x1xf32, #tpu.memory_space<vmem>>, vector<128x1xf32>
    tpu.vector_store %arg11[%c0_12, %c0_13], %21 {strides = array<i32>} : memref<128x1xf32, #tpu.memory_space<vmem>>, vector<128x1xf32>,
    %c0_14 = arith.constant 0 : index
    %c0_15 = arith.constant 0 : index
    %23 = vector.load %arg12[%c0_14, %c0_15] : memref<128x4xf32, #tpu.memory_space<vmem>>, vector<128x4xf32>
    %24 = vector.broadcast %13 : vector<128x1xf32> to vector<128x4xf32>
    %25 = arith.mulf %24, %23 : vector<128x4xf32>
    %26 = arith.truncf %16 : vector<128x128xf32> to vector<128x128xbf16>
    %c0_16 = arith.constant 0 : index
    %c0_17 = arith.constant 0 : index
    %c0_18 = arith.constant 0 : index
    %27 = vector.load %arg5[%c0_16, %c0_17, %c0_18] : memref<1x128x4xbf16, #tpu.memory_space<vmem>>, vector<1x128x4xbf16>
    %28 = vector.shape_cast %27 : vector<1x128x4xbf16> to vector<128x4xbf16>
    %cst_19 = arith.constant dense<0.000000e+00> : vector<128x4xf32>
    %29 = tpu.matmul %26, %28, %cst_19 {dimension_numbers = #tpu.dot_dimension_numbers<[1], [0], [0], [1], [0, 0, 1, 1], [], []>} : vector<128x128xbf16>, vector<128x4xbf16>, vector<128x4xf32> -> vector<128x4xf32>
    %30 = arith.addf %25, %29 : vector<128x4xf32>
    %c0_20 = arith.constant 0 : index
    %c0_21 = arith.constant 0 : index
    %31 = vector.load %arg12[%c0_20, %c0_21] : memref<128x4xf32, #tpu.memory_space<vmem>>, vector<128x4xf32>
    tpu.vector_store %arg12[%c0_20, %c0_21], %30 {strides = array<i32>} : memref<128x4xf32, #tpu.memory_space<vmem>>, vector<128x4xf32>,
    %c0_22 = arith.constant 0 : index
    %c0_23 = arith.constant 0 : index
    %32 = vector.load %arg10[%c0_22, %c0_23] : memref<128x1xf32, #tpu.memory_space<vmem>>, vector<128x1xf32>
    tpu.vector_store %arg10[%c0_22, %c0_23], %11 {strides = array<i32>} : memref<128x1xf32, #tpu.memory_space<vmem>>, vector<128x1xf32>,
    %c1_i32 = arith.constant 1 : i32
    %33 = arith.cmpi eq, %arg2, %c1_i32 : i32
    %34 = arith.extui %33 : i1 to i32
    %c0_i32_24 = arith.constant 0 : i32
    %35 = arith.cmpi ne, %34, %c0_i32_24 : i32
    scf.if %35 {
      %c0_25 = arith.constant 0 : index
      %c0_26 = arith.constant 0 : index
      %36 = vector.load %arg11[%c0_25, %c0_26] : memref<128x1xf32, #tpu.memory_space<vmem>>, vector<128x1xf32>
      %37 = tpu.reciprocal %36 {approx = true} : vector<128x1xf32> -> vector<128x1xf32>
      %c0_27 = arith.constant 0 : index
      %c0_28 = arith.constant 0 : index
      %38 = vector.load %arg12[%c0_27, %c0_28] : memref<128x4xf32, #tpu.memory_space<vmem>>, vector<128x4xf32>
      %39 = vector.broadcast %37 : vector<128x1xf32> to vector<128x4xf32>
      %40 = arith.mulf %38, %39 : vector<128x4xf32>
      %41 = arith.truncf %40 : vector<128x4xf32> to vector<128x4xbf16>
      %c0_29 = arith.constant 0 : index
      %c0_30 = arith.constant 0 : index
      %42 = vector.load %arg7[%c0_29, %c0_30] : memref<4x4xbf16, #tpu.memory_space<vmem>>, vector<4x4xbf16>
      %cst_31 = arith.constant dense<0.000000e+00> : vector<4x128xf32>
      %43 = tpu.matmul %42, %41, %cst_31 {dimension_numbers = #tpu.dot_dimension_numbers<[1], [1], [0], [0], [0, 0, 1, 0], [], []>} : vector<4x4xbf16>, vector<128x4xbf16>, vector<4x128xf32> -> vector<4x128xf32>
      %c0_32 = arith.constant 0 : index
      %c0_33 = arith.constant 0 : index
      %44 = vector.load %arg8[%c0_32, %c0_33] : memref<4x1xf32, #tpu.memory_space<vmem>>, vector<4x1xf32>
      %45 = vector.broadcast %44 : vector<4x1xf32> to vector<4x128xf32>
      %46 = arith.addf %43, %45 : vector<4x128xf32>
      %c0_34 = arith.constant 0 : index
      %c0_35 = arith.constant 0 : index
      %c0_36 = arith.constant 0 : index
      %47 = vector.load %arg6[%c0_34, %c0_35, %c0_36] : memref<1x4x128xf32, #tpu.memory_space<vmem>>, vector<1x4x128xf32>
      %48 = vector.shape_cast %47 : vector<1x4x128xf32> to vector<4x128xf32>
      %49 = arith.addf %46, %48 : vector<4x128xf32>
      %c0_37 = arith.constant 0 : index
      %c0_38 = arith.constant 0 : index
      %c0_39 = arith.constant 0 : index
      %50 = vector.load %arg9[%c0_37, %c0_38, %c0_39] : memref<1x4x128xf32, #tpu.memory_space<vmem>>, vector<1x4x128xf32>
      %51 = vector.shape_cast %50 : vector<1x4x128xf32> to vector<4x128xf32>
      %52 = vector.shape_cast %49 : vector<4x128xf32> to vector<1x4x128xf32>
      tpu.vector_store %arg9[%c0_37, %c0_38, %c0_39], %52 {strides = array<i32>} : memref<1x4x128xf32, #tpu.memory_space<vmem>>, vector<1x4x128xf32>,
    } else {
    }
    return
  }
  func.func @transform_0(%arg0: i32, %arg1: i32, %arg2: i32) -> (i32, i32, i32) {
    %c0_i32 = arith.constant 0 : i32
    %c0_i32_0 = arith.constant 0 : i32
    return %arg0, %arg1, %c0_i32 : i32, i32, i32
  }
  func.func @transform_1(%arg0: i32, %arg1: i32, %arg2: i32) -> (i32, i32, i32) {
    %c0_i32 = arith.constant 0 : i32
    %c0_i32_0 = arith.constant 0 : i32
    return %arg0, %arg2, %c0_i32 : i32, i32, i32
  }
  func.func @transform_2(%arg0: i32, %arg1: i32, %arg2: i32) -> (i32, i32, i32) {
    %c0_i32 = arith.constant 0 : i32
    %c0_i32_0 = arith.constant 0 : i32
    return %arg0, %arg2, %c0_i32 : i32, i32, i32
  }
  func.func @transform_3(%arg0: i32, %arg1: i32, %arg2: i32) -> (i32, i32, i32) {
    %c0_i32 = arith.constant 0 : i32
    %c0_i32_0 = arith.constant 0 : i32
    return %arg0, %c0_i32, %arg1 : i32, i32, i32
  }
  func.func @transform_4(%arg0: i32, %arg1: i32, %arg2: i32) -> (i32, i32) {
    %c0_i32 = arith.constant 0 : i32
    %c0_i32_0 = arith.constant 0 : i32
    %c0_i32_1 = arith.constant 0 : i32
    return %c0_i32, %c0_i32_0 : i32, i32
  }
  func.func @transform_5(%arg0: i32, %arg1: i32, %arg2: i32) -> (i32, i32) {
    %c0_i32 = arith.constant 0 : i32
    %c0_i32_0 = arith.constant 0 : i32
    %c0_i32_1 = arith.constant 0 : i32
    return %c0_i32, %c0_i32_0 : i32, i32
  }
  func.func @transform_6(%arg0: i32, %arg1: i32, %arg2: i32) -> (i32, i32, i32) {
    %c0_i32 = arith.constant 0 : i32
    %c0_i32_0 = arith.constant 0 : i32
    return %arg0, %c0_i32, %arg1 : i32, i32, i32
  }
}

</mosaic_0001>

<bundles_post_ra>
// kernel: attn_block_2d.3
= control target key start
LH: loop header
LB: loop body
LE: loop exit
PB: predicated region body
PF: predicated region fallthrough
CT: control target
= control target key end

     0   :  { %s555_s9 = smov 0   ;;  %s557_s10 = smov 0   ;;  %s703_s0 = inlined_call_operand.vmem [shape: f32[2,256,4], index: 0, kind: input, shape index: {}]   ;;  %s704_s1 = inlined_call_operand.vmem [shape: f32[2,1,4], index: 1, kind: output, shape index: {0}]   ;;  %s705_s2 = inlined_call_operand.vmem [shape: f32[2,1,4], index: 2, kind: output, shape index: {1}]  }
   0x1   :  { %s559_s11 = smov 0  }
   0x2 LB: > { %s25_s12 = sadd.s32 1, %s533_s10  ;;  %p484_p0 = scmp.ge.s32.totalorder %s537_s11, 1  ;;  %s537_s11 = sphi %s559_s11, %s13_s11   ;;  %s533_s10 = sphi %s557_s10, %s707_s10   ;;  %s529_s9 = sphi %s555_s9, %s706_s9  }
   0x3   : > { %p27_p1 = scmp.ge.s32.totalorder %s25_s12, 2  ;;  %p134_p2 = scmp.lt.s32.totalorder %s537_s11, 3 }
   0x5   : > { %s709_s12 = smov (%p27_p1, %s25_s12), 0  ;;  %p135_p3 = pnand %p484_p0, %p134_p2 }
   0x6   : > { %p162_p4 = scmp.lt.s32.totalorder (!%p135_p3), %s529_s9, 1  ;;  %vm181_vm0 = vcmask (!%p135_p3), 24576   ;;  %vm217_vm1 = vcmask (!%p135_p3), 31744   ;;  %v539_v0 = vmov (!%p135_p3), 0.0  }
   0x7   : > { %138 = sbr.rel (%p135_p3) target bundleno = 101 (0x65), region = 24 }
   0xe   : > { %s711_s9 = smov (!%p162_p4, %s529_s9), 1 }
   0xf   : > { %s489_s13 = sshll.u32 %s711_s9, 8  ;;  %s576_s16 = scalar_lea.vmem %s704_s1, %s711_s9 }
  0x10   : > { %s581_s19 = scalar_lea.vmem %s703_s0, %s489_s13  ;;  %182 = vst.msk [vmem:[%s576_s16] sm:$0x1] %vm181_vm0, %v539_v0  ;;  %s588_s22 = scalar_lea.vmem %s705_s2, %s711_s9 }
  0x11   : > { %v184_v1 = vld [vmem:[%s581_s19] sm:$0xff]  ;;  %v185_v2 = vld [vmem:[%s581_s19 + $0x8] sm:$0xff]  ;;  %v186_v3 = vld [vmem:[%s581_s19 + $0x10] sm:$0xff]  ;;  %183 = vst.msk [vmem:[%s588_s22] sm:$0x1] %vm181_vm0, %v539_v0 }
  0x12   : > { %v218_v4 = vsel %vm217_vm1, %v184_v1, 0.0  ;;  %v219_v5 = vsel %vm217_vm1, %v185_v2, 0.0  ;;  %v221_v6 = vsel %vm217_vm1, %v186_v3, 0.0  ;;  %v187_v7 = vld [vmem:[%s581_s19 + $0x18] sm:$0xff]  ;;  %v188_v10 = vld [vmem:[%s581_s19 + $0x20] sm:$0xff]  ;;  %v189_v13 = vld [vmem:[%s581_s19 + $0x28] sm:$0xff]  ;;  %v291_v28 = vmul.f32 %v184_v1, %v184_v1 }
  0x13   : > { %v220_v8 = vadd.f32 %v219_v5, %v218_v4  ;;  %v223_v9 = vsel %vm217_vm1, %v187_v7, 0.0  ;;  %v225_v12 = vsel %vm217_vm1, %v188_v10, 0.0  ;;  %v227_v15 = vsel %vm217_vm1, %v189_v13, 0.0  ;;  %v190_v16 = vld [vmem:[%s581_s19 + $0x30] sm:$0xff]  ;;  %v191_v19 = vld [vmem:[%s581_s19 + $0x38] sm:$0xff]  ;;  %v192_v22 = vld [vmem:[%s581_s19 + $0x40] sm:$0xff] }
  0x14   : > { %v229_v18 = vsel %vm217_vm1, %v190_v16, 0.0  ;;  %v231_v21 = vsel %vm217_vm1, %v191_v19, 0.0  ;;  %v233_v24 = vsel %vm217_vm1, %v192_v22, 0.0  ;;  %v193_v25 = vld [vmem:[%s581_s19 + $0x48] sm:$0xff]  ;;  %v292_v29 = vmul.f32 %v185_v2, %v185_v2  ;;  %v194_v31 = vld [vmem:[%s581_s19 + $0x50] sm:$0xff]  ;;  %v195_v33 = vld [vmem:[%s581_s19 + $0x58] sm:$0xff] }
  0x15   : > { %v222_v11 = vadd.f32 %v221_v6, %v220_v8  ;;  %v235_v27 = vsel %vm217_vm1, %v193_v25, 0.0  ;;  %v293_v30 = vmul.f32 %v186_v3, %v186_v3  ;;  %v237_v34 = vsel %vm217_vm1, %v194_v31, 0.0  ;;  %v196_v42 = vld [vmem:[%s581_s19 + $0x60] sm:$0xff]  ;;  %v197_v48 = vld [vmem:[%s581_s19 + $0x68] sm:$0xff]  ;;  %v198_v54 = vld [vmem:[%s581_s19 + $0x70] sm:$0xff] }
  0x16   : > { %v294_v35 = vmul.f32 %v187_v7, %v187_v7  ;;  %v239_v37 = vsel %vm217_vm1, %v195_v33, 0.0  ;;  %v295_v38 = vmul.f32 %v188_v10, %v188_v10  ;;  %v323_v39 = vsel %vm217_vm1, %v291_v28, 0.0  ;;  %v199_v60 = vld [vmem:[%s581_s19 + $0x78] sm:$0xff]  ;;  %v200_v2 = vld [vmem:[%s581_s19 + $0x80] sm:$0xff]  ;;  %v201_v8 = vld [vmem:[%s581_s19 + $0x88] sm:$0xff] }
  0x17   : > { %v224_v14 = vadd.f32 %v223_v9, %v222_v11  ;;  %v324_v40 = vsel %vm217_vm1, %v292_v29, 0.0  ;;  %v326_v41 = vsel %vm217_vm1, %v293_v30, 0.0  ;;  %v241_v45 = vsel %vm217_vm1, %v196_v42, 0.0 }
  0x18   : > { %v325_v44 = vadd.f32 %v324_v40, %v323_v39  ;;  %v296_v46 = vmul.f32 %v189_v13, %v189_v13  ;;  %v328_v47 = vsel %vm217_vm1, %v294_v35, 0.0  ;;  %v243_v51 = vsel %vm217_vm1, %v197_v48, 0.0 }
  0x19   : > { %v226_v17 = vadd.f32 %v225_v12, %v224_v14  ;;  %v297_v52 = vmul.f32 %v190_v16, %v190_v16  ;;  %v330_v53 = vsel %vm217_vm1, %v295_v38, 0.0  ;;  %v245_v57 = vsel %vm217_vm1, %v198_v54, 0.0  ;;  %v202_v14 = vld [vmem:[%s581_s19 + $0x90] sm:$0xff] }
  0x1a   : > { %v327_v50 = vadd.f32 %v326_v41, %v325_v44  ;;  %v298_v58 = vmul.f32 %v191_v19, %v191_v19  ;;  %v332_v59 = vsel %vm217_vm1, %v296_v46, 0.0  ;;  %v247_v63 = vsel %vm217_vm1, %v199_v60, 0.0  ;;  %v206_v38 = vld [vmem:[%s581_s19 + $0xb0] sm:$0xff]  ;;  %v207_v44 = vld [vmem:[%s581_s19 + $0xb8] sm:$0xff] }
  0x1b   : > { %v228_v20 = vadd.f32 %v227_v15, %v226_v17  ;;  %v299_v0 = vmul.f32 %v192_v22, %v192_v22  ;;  %v334_v1 = vsel %vm217_vm1, %v297_v52, 0.0  ;;  %v249_v5 = vsel %vm217_vm1, %v200_v2, 0.0 }
  0x1c   : > { %v329_v56 = vadd.f32 %v328_v47, %v327_v50  ;;  %v300_v6 = vmul.f32 %v193_v25, %v193_v25  ;;  %v336_v7 = vsel %vm217_vm1, %v298_v58, 0.0  ;;  %v251_v11 = vsel %vm217_vm1, %v201_v8, 0.0  ;;  %v208_v50 = vld [vmem:[%s581_s19 + $0xc0] sm:$0xff] }
  0x1d   : > { %v230_v23 = vadd.f32 %v229_v18, %v228_v20  ;;  %v301_v12 = vmul.f32 %v194_v31, %v194_v31  ;;  %v338_v13 = vsel %vm217_vm1, %v299_v0, 0.0  ;;  %v253_v17 = vsel %vm217_vm1, %v202_v14, 0.0  ;;  %v203_v20 = vld [vmem:[%s581_s19 + $0x98] sm:$0xff] }
  0x1e   : > { %v331_v62 = vadd.f32 %v330_v53, %v329_v56  ;;  %v302_v18 = vmul.f32 %v195_v33, %v195_v33  ;;  %v340_v19 = vsel %vm217_vm1, %v300_v6, 0.0  ;;  %v304_v30 = vmul.f32 %v197_v48, %v197_v48  ;;  %v209_v56 = vld [vmem:[%s581_s19 + $0xc8] sm:$0xff] }
  0x1f   : > { %v232_v26 = vadd.f32 %v231_v21, %v230_v23  ;;  %v255_v23 = vsel %vm217_vm1, %v203_v20, 0.0  ;;  %v342_v25 = vsel %vm217_vm1, %v301_v12, 0.0  ;;  %v261_v41 = vsel %vm217_vm1, %v206_v38, 0.0 }
  0x20   : > { %v333_v4 = vadd.f32 %v332_v59, %v331_v62  ;;  %v344_v31 = vsel %vm217_vm1, %v302_v18, 0.0  ;;  %v263_v47 = vsel %vm217_vm1, %v207_v44, 0.0  ;;  %v307_v48 = vmul.f32 %v200_v2, %v200_v2  ;;  %v210_v62 = vld [vmem:[%s581_s19 + $0xd0] sm:$0xff] }
  0x21   : > { %v234_v32 = vadd.f32 %v233_v24, %v232_v26  ;;  %v303_v24 = vmul.f32 %v196_v42, %v196_v42  ;;  %v204_v26 = vld [vmem:[%s581_s19 + $0xa0] sm:$0xff]  ;;  %v306_v42 = vmul.f32 %v199_v60, %v199_v60  ;;  %v265_v53 = vsel %vm217_vm1, %v208_v50, 0.0 }
  0x22   : > { %v335_v10 = vadd.f32 %v334_v1, %v333_v4  ;;  %v257_v29 = vsel %vm217_vm1, %v204_v26, 0.0  ;;  %v267_v59 = vsel %vm217_vm1, %v209_v56, 0.0  ;;  %v309_v60 = vmul.f32 %v202_v14, %v202_v14  ;;  %v211_v4 = vld [vmem:[%s581_s19 + $0xd8] sm:$0xff] }
  0x23   : > { %v236_v36 = vadd.f32 %v235_v27, %v234_v32  ;;  %v205_v32 = vld [vmem:[%s581_s19 + $0xa8] sm:$0xff]  ;;  %v269_v1 = vsel %vm217_vm1, %v210_v62, 0.0  ;;  %v310_v2 = vmul.f32 %v203_v20, %v203_v20  ;;  %v313_v20 = vmul.f32 %v206_v38, %v206_v38 }
  0x24   : > { %v337_v16 = vadd.f32 %v336_v7, %v335_v10  ;;  %v259_v35 = vsel %vm217_vm1, %v205_v32, 0.0  ;;  %v271_v7 = vsel %vm217_vm1, %v211_v4, 0.0  ;;  %v212_v10 = vld [vmem:[%s581_s19 + $0xe0] sm:$0xff]  ;;  %v312_v14 = vmul.f32 %v205_v32, %v205_v32 }
  0x25   : > { %v238_v43 = vadd.f32 %v237_v34, %v236_v36  ;;  %v305_v36 = vmul.f32 %v198_v54, %v198_v54  ;;  %v308_v54 = vmul.f32 %v201_v8, %v201_v8  ;;  %v311_v8 = vmul.f32 %v204_v26, %v204_v26 }
  0x26   : > { %v339_v22 = vadd.f32 %v338_v13, %v337_v16  ;;  %v273_v13 = vsel %vm217_vm1, %v212_v10, 0.0  ;;  %v213_v16 = vld [vmem:[%s581_s19 + $0xe8] sm:$0xff]  ;;  %v314_v26 = vmul.f32 %v207_v44, %v207_v44  ;;  %v315_v32 = vmul.f32 %v208_v50, %v208_v50 }
  0x27   : > { %v240_v49 = vadd.f32 %v239_v37, %v238_v43  ;;  %v346_v37 = vsel %vm217_vm1, %v303_v24, 0.0  ;;  %v348_v43 = vsel %vm217_vm1, %v304_v30, 0.0  ;;  %v318_v44 = vmul.f32 %v211_v4, %v211_v4 }
  0x28   : > { %v341_v28 = vadd.f32 %v340_v19, %v339_v22  ;;  %v275_v19 = vsel %vm217_vm1, %v213_v16, 0.0  ;;  %v214_v22 = vld [vmem:[%s581_s19 + $0xf0] sm:$0xff] }
  0x29   : > { %v242_v55 = vadd.f32 %v241_v45, %v240_v49  ;;  %v350_v49 = vsel %vm217_vm1, %v305_v36, 0.0  ;;  %v316_v36 = vmul.f32 %v209_v56, %v209_v56  ;;  %v321_v56 = vmul.f32 %v214_v22, %v214_v22 }
  0x2a   : > { %v343_v34 = vadd.f32 %v342_v25, %v341_v28  ;;  %v277_v25 = vsel %vm217_vm1, %v214_v22, 0.0  ;;  %v215_v28 = vld [vmem:[%s581_s19 + $0xf8] sm:$0xff] }
  0x2b   : > { %v244_v61 = vadd.f32 %v243_v51, %v242_v55  ;;  %v352_v55 = vsel %vm217_vm1, %v306_v42, 0.0 }
  0x2c   : > { %v345_v40 = vadd.f32 %v344_v31, %v343_v34  ;;  %v279_v31 = vsel %vm217_vm1, %v215_v28, 0.0 }
  0x2d   : > { %v246_v3 = vadd.f32 %v245_v57, %v244_v61  ;;  %v354_v61 = vsel %vm217_vm1, %v307_v48, 0.0  ;;  %v319_v48 = vmul.f32 %v212_v10, %v212_v10 }
  0x2e   : > { %v347_v46 = vadd.f32 %v346_v37, %v345_v40  ;;  %v368_v37 = vsel %vm217_vm1, %v314_v26, 0.0  ;;  %v317_v40 = vmul.f32 %v210_v62, %v210_v62 }
  0x2f   : > { %v248_v9 = vadd.f32 %v247_v63, %v246_v3  ;;  %v356_v3 = vsel %vm217_vm1, %v308_v54, 0.0 }
  0x30   : > { %v349_v52 = vadd.f32 %v348_v43, %v347_v46 }
  0x31   : > { %v250_v15 = vadd.f32 %v249_v5, %v248_v9  ;;  %v358_v9 = vsel %vm217_vm1, %v309_v60, 0.0  ;;  %v216_v60 = vld [vmem:[%s576_s16] sm:$0x1] }
  0x32   : > { %v351_v58 = vadd.f32 %v350_v49, %v349_v52  ;;  %v374_v49 = vsel %vm217_vm1, %v317_v40, 0.0  ;;  %v320_v52 = vmul.f32 %v213_v16, %v213_v16 }
  0x33   : > { %v252_v21 = vadd.f32 %v251_v11, %v250_v15  ;;  %v360_v15 = vsel %vm217_vm1, %v310_v2, 0.0 }
  0x34   : > { %v353_v0 = vadd.f32 %v352_v55, %v351_v58  ;;  %v380_v62 = vsel %vm217_vm1, %v320_v52, 0.0 }
  0x35   : > { %v254_v27 = vadd.f32 %v253_v17, %v252_v21  ;;  %v362_v21 = vsel %vm217_vm1, %v311_v8, 0.0 }
  0x36   : > { %v355_v6 = vadd.f32 %v354_v61, %v353_v0  ;;  %v322_v61 = vmul.f32 %v215_v28, %v215_v28 }
  0x37   : > { %v256_v33 = vadd.f32 %v255_v23, %v254_v27  ;;  %v364_v27 = vsel %vm217_vm1, %v312_v14, 0.0 }
  0x38   : > { %v357_v12 = vadd.f32 %v356_v3, %v355_v6  ;;  %v384_v4 = vsel %vm217_vm1, %v322_v61, 0.0 }
  0x39   : > { %v258_v39 = vadd.f32 %v257_v29, %v256_v33  ;;  %v366_v33 = vsel %vm217_vm1, %v313_v20, 0.0 }
  0x3a   : > { %v359_v18 = vadd.f32 %v358_v9, %v357_v12  ;;  %v290_v12 = vld [vmem:[%s588_s22] sm:$0x1] }
  0x3b   : > { %v260_v45 = vadd.f32 %v259_v35, %v258_v39 }
  0x3c   : > { %v361_v24 = vadd.f32 %v360_v15, %v359_v18 }
  0x3d   : > { %v262_v51 = vadd.f32 %v261_v41, %v260_v45  ;;  %v370_v41 = vsel %vm217_vm1, %v315_v32, 0.0  ;;  %v372_v45 = vsel %vm217_vm1, %v316_v36, 0.0 }
  0x3e   : > { %v363_v30 = vadd.f32 %v362_v21, %v361_v24 }
  0x3f   : > { %v264_v57 = vadd.f32 %v263_v47, %v262_v51 }
  0x40   : > { %v365_v35 = vadd.f32 %v364_v27, %v363_v30 }
  0x41   : > { %v266_v63 = vadd.f32 %v265_v53, %v264_v57  ;;  %v376_v53 = vsel %vm217_vm1, %v318_v44, 0.0  ;;  %v378_v57 = vsel %vm217_vm1, %v319_v48, 0.0 }
  0x42   : > { %v367_v39 = vadd.f32 %v366_v33, %v365_v35 }
  0x43   : > { %v268_v5 = vadd.f32 %v267_v59, %v266_v63 }
  0x44   : > { %v369_v43 = vadd.f32 %v368_v37, %v367_v39 }
  0x45   : > { %v270_v11 = vadd.f32 %v269_v1, %v268_v5  ;;  %v382_v1 = vsel %vm217_vm1, %v321_v56, 0.0 }
  0x46   : > { %v371_v47 = vadd.f32 %v370_v41, %v369_v43 }
  0x47   : > { %v272_v17 = vadd.f32 %v271_v7, %v270_v11 }
  0x48   : > { %v373_v51 = vadd.f32 %v372_v45, %v371_v47 }
  0x49   : > { %v274_v23 = vadd.f32 %v273_v13, %v272_v17 }
  0x4a   : > { %v375_v55 = vadd.f32 %v374_v49, %v373_v51 }
  0x4b   : > { %v276_v29 = vadd.f32 %v275_v19, %v274_v23 }
  0x4c   : > { %v377_v59 = vadd.f32 %v376_v53, %v375_v55 }
  0x4d   : > { %v278_v34 = vadd.f32 %v277_v25, %v276_v29 }
  0x4e   : > { %v379_v0 = vadd.f32 %v378_v57, %v377_v59 }
  0x4f   : > { %v280_v38 = vadd.f32 %v279_v31, %v278_v34 }
  0x50   : > { %v381_v3 = vadd.f32 %v380_v62, %v379_v0 }
  0x51   : > { %v281_v42 = vrot.slane %v280_v38, 4 }
  0x52   : > { %v383_v5 = vadd.f32 %v382_v1, %v381_v3 }
  0x53   : > { %v282_v46 = vadd.f32 %v281_v42, %v280_v38 }
  0x54   : > { %v385_v6 = vadd.f32 %v384_v4, %v383_v5 }
  0x55   : > { %v283_v50 = vrot.slane %v282_v46, 2 }
  0x56   : > { %v386_v7 = vrot.slane %v385_v6, 4 }
  0x57   : > { %v284_v54 = vadd.f32 %v283_v50, %v282_v46 }
  0x58   : > { %v387_v8 = vadd.f32 %v386_v7, %v385_v6 }
  0x59   : > { %v285_v58 = vrot.slane %v284_v54, 1 }
  0x5a   : > { %v388_v9 = vrot.slane %v387_v8, 2 }
  0x5b   : > { %v286_v63 = vadd.f32 %v285_v58, %v284_v54 }
  0x5c   : > { %v389_v10 = vadd.f32 %v388_v9, %v387_v8 }
  0x5d   : > { %v287_v2 = vadd.f32 %v286_v63, %v216_v60 }
  0x5e   : > { %v390_v11 = vrot.slane %v389_v10, 1 }
  0x5f   : > { %289 = vst.msk [vmem:[%s576_s16] sm:$0x1] %vm181_vm0, %v287_v2 }
  0x60   : > { %v391_v13 = vadd.f32 %v390_v11, %v389_v10 }
  0x62   : > { %v392_v14 = vadd.f32 %v391_v13, %v290_v12 }
  0x64   : > { %393 = vst.msk [vmem:[%s588_s22] sm:$0x1] %vm181_vm0, %v392_v14 }
  0x65 PF: > { %s13_s11 = sadd.s32 1, %s537_s11   ;;  %s706_s9 = smov %s533_s10 }
  0x66   : > { %p10_p5 = scmp.ge.s32.totalorder %s13_s11, 4   ;;  %s707_s10 = smov %s709_s12 }
  0x68   :  { %12 = sbr.rel (!%p10_p5) target bundleno = 2 (0x2), region = 70 }

// kernel: attn_block_2d.4
= control target key start
LH: loop header
LB: loop body
LE: loop exit
PB: predicated region body
PF: predicated region fallthrough
CT: control target
= control target key end

     0   :  { %s2443_s17 = smov 0   ;;  %s2445_s18 = smov 0   ;;  %s3019_s0 = inlined_call_operand.vmem [shape: f32[2,256,4], index: 0, kind: input, shape index: {}]   ;;  %s3020_s1 = inlined_call_operand.vmem [shape: f32[2,1,4], index: 1, kind: input, shape index: {}]   ;;  %s3021_s2 = inlined_call_operand.vmem [shape: f32[2,1,4], index: 2, kind: input, shape index: {}]   ;;  %s3022_s3 = inlined_call_operand.vmem [shape: bf16[4,4], index: 3, kind: input, shape index: {}]   ;;  %s3023_s4 = inlined_call_operand.vmem [shape: f32[1,4], index: 4, kind: input, shape index: {}]   ;;  %s3024_s5 = inlined_call_operand.vmem [shape: bf16[4,4], index: 5, kind: input, shape index: {}]   ;;  %s3025_s6 = inlined_call_operand.vmem [shape: f32[1,4], index: 6, kind: input, shape index: {}]   ;;  %s3026_s7 = inlined_call_operand.vmem [shape: bf16[4,4], index: 7, kind: input, shape index: {}]   ;;  %s3027_s8 = inlined_call_operand.vmem [shape: f32[1,4], index: 8, kind: input, shape index: {}]   ;;  %s3028_s9 = inlined_call_operand.vmem [shape: bf16[2,256,4], index: 9, kind: output, shape index: {0}]   ;;  %s3029_s10 = inlined_call_operand.vmem [shape: bf16[2,256,4], index: 10, kind: output, shape index: {1}]   ;;  %s3030_s11 = inlined_call_operand.vmem [shape: bf16[2,256,4], index: 11, kind: output, shape index: {2}]  }
   0x1   :  { %s2447_s19 = smov 0  }
   0x2 LB: > { %s34_s20 = sadd.s32 1, %s2377_s18  ;;  %p1916_p0 = scmp.ge.s32.totalorder %s2381_s19, 1  ;;  %s2381_s19 = sphi %s2447_s19, %s22_s19   ;;  %s2377_s18 = sphi %s2445_s18, %s3032_s18   ;;  %s2373_s17 = sphi %s2443_s17, %s3031_s17  }
   0x3   : > { %p36_p1 = scmp.ge.s32.totalorder %s34_s20, 2  ;;  %p383_p2 = scmp.lt.s32.totalorder %s2381_s19, 3 }
   0x5   : > { %s3034_s20 = smov (%p36_p1, %s34_s20), 0  ;;  %p384_p3 = pnand %p1916_p0, %p383_p2 }
   0x6   : > { %v628_v0 = vld [vmem:[%s3022_s3] sm:$0x3] (!%p384_p3)  ;;  %vm685_vm0 = vcmask (!%p384_p3), 1041408   ;;  %p456_p4 = scmp.lt.s32.totalorder (!%p384_p3), %s2373_s17, 1  ;;  %vm636_vm1 = vcmask (!%p384_p3), 31744   ;;  %vm1354_vm2 = vcmask (!%p384_p3), 27648  }
   0x7   : > { %387 = sbr.rel (%p384_p3) target bundleno = 335 (0x14f), region = 56  ;;  %2331 = vmatprep.subr.msk.bf16.mxu0 (!%p384_p3), %vm685_vm0, %v628_v0  ;;  %2332 = vmatprep.subr.msk.bf16.mxu1 (!%p384_p3), %vm685_vm0, %v628_v0  ;;  %v687_v1 = vsel (!%p384_p3), %vm685_vm0, %v628_v0, 0  ;;  %v850_v2 = vld [vmem:[%s3024_s5] sm:$0x3] (!%p384_p3) }
   0x8   : > { %v1022_v3 = vld [vmem:[%s3026_s7] sm:$0x3] (!%p384_p3)  ;;  %2228 = vmatpush3.bf16.msra.mxu0 (!%p384_p3), %v687_v1  ;;  %2330 = vmatpush3.bf16.msra.mxu1 (!%p384_p3), %v687_v1  ;;  %v859_v13 = vsel (!%p384_p3), %vm685_vm0, %v850_v2, 0 }
   0x9   : > { %2333 = vmatprep.subr.msk.bf16.mxu1 (!%p384_p3), %vm685_vm0, %v850_v2  ;;  %2334 = vmatprep.subr.msk.bf16.mxu0 (!%p384_p3), %vm685_vm0, %v1022_v3  ;;  %v1031_v20 = vsel (!%p384_p3), %vm685_vm0, %v1022_v3, 0 }
   0xe   : > { %s3036_s17 = smov (!%p456_p4, %s2373_s17), 1 }
   0xf   : > { %s2076_s27 = sshll.u32 %s3036_s17, 8  ;;  %s467_s30 = scalar_lea.vmem %s3020_s1, %s3036_s17 }
  0x10   : > { %s2485_s14 = scalar_lea.vmem %s3019_s0, %s2076_s27  ;;  %s470_s21 = scalar_lea.vmem %s3021_s2, %s3036_s17  ;;  %v2491_v4 = vld [vmem:[%s467_s30] ss:$0 sm:$0xff] }
  0x11   : > { %v502_v5 = vld [vmem:[%s2485_s14] sm:$0xff]  ;;  %v503_v6 = vld [vmem:[%s2485_s14 + $0x8] sm:$0xff]  ;;  %v504_v12 = vld [vmem:[%s2485_s14 + $0x10] sm:$0xff]  ;;  %s2692_s24 = sshll.u32 %s3036_s17, 7 }
  0x12   : > { %v2495_v7 = vld [vmem:[%s470_s21] ss:$0 sm:$0xff]  ;;  %v541_v8 = vmul.f32 %v2491_v4, %v502_v5  ;;  %v542_v9 = vmul.f32 %v2491_v4, %v503_v6  ;;  %v519_v11 = vld [vmem:[%s2485_s14 + $0x88] sm:$0xff]  ;;  %v505_v16 = vld [vmem:[%s2485_s14 + $0x18] sm:$0xff]  ;;  %v543_v17 = vmul.f32 %v2491_v4, %v504_v12  ;;  %s2703_s26 = scalar_lea.vmem %s3028_s9, %s2692_s24  ;;  %s2819_s21 = scalar_lea.vmem %s3029_s10, %s2692_s24 }
  0x13   : > { %v518_v10 = vld [vmem:[%s2485_s14 + $0x80] sm:$0xff]  ;;  %v558_v15 = vmul.f32 %v2491_v4, %v519_v11  ;;  %v520_v18 = vld [vmem:[%s2485_s14 + $0x90] sm:$0xff]  ;;  %v521_v19 = vld [vmem:[%s2485_s14 + $0x98] sm:$0xff]  ;;  %v544_v23 = vmul.f32 %v2491_v4, %v505_v16 }
  0x14   : > { %v557_v14 = vmul.f32 %v2491_v4, %v518_v10  ;;  %v580_v21 = vadd.f32 %v2495_v7, %v541_v8  ;;  %v581_v22 = vadd.f32 %v2495_v7, %v542_v9  ;;  %v559_v24 = vmul.f32 %v2491_v4, %v520_v18  ;;  %v506_v25 = vld [vmem:[%s2485_s14 + $0x20] sm:$0xff]  ;;  %v507_v26 = vld [vmem:[%s2485_s14 + $0x28] sm:$0xff]  ;;  %v508_v33 = vld [vmem:[%s2485_s14 + $0x30] sm:$0xff] }
  0x15   : > { %v522_v27 = vld [vmem:[%s2485_s14 + $0xa0] sm:$0xff]  ;;  %v597_v29 = vadd.f32 %v2495_v7, %v558_v15  ;;  %v582_v30 = vadd.f32 %v2495_v7, %v543_v17  ;;  %v560_v31 = vmul.f32 %v2491_v4, %v521_v19  ;;  %v523_v32 = vld [vmem:[%s2485_s14 + $0xa8] sm:$0xff]  ;;  %v583_v35 = vadd.f32 %v2495_v7, %v544_v23  ;;  %v509_v38 = vld [vmem:[%s2485_s14 + $0x38] sm:$0xff] }
  0x16   : > { %v596_v28 = vadd.f32 %v2495_v7, %v557_v14  ;;  %v2523_v34 = vpack.c.bf16 %v581_v22, %v580_v21  ;;  %v598_v36 = vadd.f32 %v2495_v7, %v559_v24  ;;  %v545_v37 = vmul.f32 %v2491_v4, %v506_v25  ;;  %v524_v43 = vld [vmem:[%s2485_s14 + $0xb0] sm:$0xff]  ;;  %v525_v44 = vld [vmem:[%s2485_s14 + $0xb8] sm:$0xff]  ;;  %v510_v49 = vld [vmem:[%s2485_s14 + $0x40] sm:$0xff] }
  0x17   : > { %v599_v40 = vadd.f32 %v2495_v7, %v560_v31  ;;  %v546_v41 = vmul.f32 %v2491_v4, %v507_v26  ;;  %v561_v42 = vmul.f32 %v2491_v4, %v522_v27  ;;  %v2538_v45 = vpack.c.bf16 %v583_v35, %v582_v30  ;;  %v511_v54 = vld [vmem:[%s2485_s14 + $0x48] sm:$0xff]  ;;  %v526_v59 = vld [vmem:[%s2485_s14 + $0xc0] sm:$0xff]  ;;  %v512_v0 = vld [vmem:[%s2485_s14 + $0x50] sm:$0xff] }
  0x18   : > { %v2529_v39 = vpack.c.bf16 %v597_v29, %v596_v28  ;;  %2229 = vmatprep.mubr.msk.bf16.mxu0 %vm636_vm1, %v2523_v34  ;;  %v584_v46 = vadd.f32 %v2495_v7, %v545_v37  ;;  %v562_v47 = vmul.f32 %v2491_v4, %v523_v32  ;;  %v547_v48 = vmul.f32 %v2491_v4, %v508_v33  ;;  %v527_v60 = vld [vmem:[%s2485_s14 + $0xc8] sm:$0xff]  ;;  %v513_v1 = vld [vmem:[%s2485_s14 + $0x58] sm:$0xff]  ;;  %v528_v8 = vld [vmem:[%s2485_s14 + $0xd0] sm:$0xff] }
  0x19   : > { %v2546_v50 = vpack.c.bf16 %v599_v40, %v598_v36  ;;  %v585_v51 = vadd.f32 %v2495_v7, %v546_v41  ;;  %v600_v52 = vadd.f32 %v2495_v7, %v561_v42  ;;  %v548_v53 = vmul.f32 %v2491_v4, %v509_v38  ;;  %2230 = vmatmul.mubr.msk.bf16.vlgmr.msra.gmra.mrb[0].mxu0 %vm636_vm1, %v2538_v45  ;;  %v529_v9 = vld [vmem:[%s2485_s14 + $0xd8] sm:$0xff]  ;;  %v514_v14 = vld [vmem:[%s2485_s14 + $0x60] sm:$0xff]  ;;  %v515_v19 = vld [vmem:[%s2485_s14 + $0x68] sm:$0xff] }
  0x1a   : > { %2245 = vmatprep.mubr.msk.bf16.mxu1 %vm636_vm1, %v2529_v39  ;;  %v601_v55 = vadd.f32 %v2495_v7, %v562_v47  ;;  %v586_v56 = vadd.f32 %v2495_v7, %v547_v48  ;;  %v563_v57 = vmul.f32 %v2491_v4, %v524_v43  ;;  %v564_v58 = vmul.f32 %v2491_v4, %v525_v44  ;;  %v530_v24 = vld [vmem:[%s2485_s14 + $0xe0] sm:$0xff]  ;;  %v531_v25 = vld [vmem:[%s2485_s14 + $0xe8] sm:$0xff]  ;;  %v516_v40 = vld [vmem:[%s2485_s14 + $0x70] sm:$0xff] }
  0x1b   : > { %2246 = vmatmul.mubr.msk.bf16.vlgmr.msra.gmra.mrb[0].mxu1 %vm636_vm1, %v2546_v50  ;;  %2296 = vmatpush3.bf16.msra.mxu0 %v1031_v20  ;;  %v2562_v61 = vpack.c.bf16 %v585_v51, %v584_v46  ;;  %v587_v62 = vadd.f32 %v2495_v7, %v548_v53  ;;  %v549_v63 = vmul.f32 %v2491_v4, %v510_v49  ;;  %v517_v41 = vld [vmem:[%s2485_s14 + $0x78] sm:$0xff]  ;;  %v532_v44 = vld [vmem:[%s2485_s14 + $0xf0] sm:$0xff] }
  0x1c   : > { %2262 = vmatpush3.bf16.msra.mxu1 %v859_v13  ;;  %v2568_v2 = vpack.c.bf16 %v601_v55, %v600_v52  ;;  %v602_v3 = vadd.f32 %v2495_v7, %v563_v57  ;;  %v603_v5 = vadd.f32 %v2495_v7, %v564_v58  ;;  %v550_v6 = vmul.f32 %v2491_v4, %v511_v54  ;;  %v533_v46 = vld [vmem:[%s2485_s14 + $0xf8] sm:$0xff]  ;;  %s2810_s14 = scalar_lea.vmem %s3030_s11, %s2692_s24 }
  0x1d   : > { %2233 = vmatprep.mubr.msk.bf16.mxu0 %vm636_vm1, %v2562_v61  ;;  %v2577_v10 = vpack.c.bf16 %v587_v62, %v586_v56  ;;  %v588_v11 = vadd.f32 %v2495_v7, %v549_v63  ;;  %v565_v12 = vmul.f32 %v2491_v4, %v526_v59  ;;  %v566_v13 = vmul.f32 %v2491_v4, %v527_v60 }
  0x1e   : > { %2249 = vmatprep.mubr.msk.bf16.mxu1 %vm636_vm1, %v2568_v2  ;;  %v2585_v15 = vpack.c.bf16 %v603_v5, %v602_v3  ;;  %v589_v16 = vadd.f32 %v2495_v7, %v550_v6  ;;  %v551_v17 = vmul.f32 %v2491_v4, %v512_v0  ;;  %v552_v18 = vmul.f32 %v2491_v4, %v513_v1 }
  0x1f   : > { %v604_v20 = vadd.f32 %v2495_v7, %v565_v12  ;;  %v605_v21 = vadd.f32 %v2495_v7, %v566_v13  ;;  %v567_v22 = vmul.f32 %v2491_v4, %v528_v8  ;;  %v568_v23 = vmul.f32 %v2491_v4, %v529_v9 }
  0x20   : > { %v616_v26 = vpack.c.bf16 %v589_v16, %v588_v11  ;;  %v553_v27 = vmul.f32 %v2491_v4, %v514_v14  ;;  %v590_v29 = vadd.f32 %v2495_v7, %v551_v17  ;;  %v554_v30 = vmul.f32 %v2491_v4, %v515_v19 }
  0x21   : > { %v2598_v28 = vpack.c.bf16 %v605_v21, %v604_v20  ;;  %2234 = vmatmul.mubr.msk.bf16.gmra.mrb[4].mxu0 %vm636_vm1, %v2577_v10  ;;  %v591_v31 = vadd.f32 %v2495_v7, %v552_v18  ;;  %v606_v32 = vadd.f32 %v2495_v7, %v567_v22  ;;  %v569_v33 = vmul.f32 %v2491_v4, %v530_v24 }
  0x22   : > { %v570_v35 = vmul.f32 %v2491_v4, %v531_v25  ;;  %2237 = vmatprep.mubr.msk.bf16.mxu0 %vm636_vm1, %v616_v26  ;;  %v607_v36 = vadd.f32 %v2495_v7, %v568_v23  ;;  %v592_v37 = vadd.f32 %v2495_v7, %v553_v27  ;;  %v593_v38 = vadd.f32 %v2495_v7, %v554_v30 }
  0x23   : > { %2250 = vmatmul.mubr.msk.bf16.gmra.mrb[4].mxu1 %vm636_vm1, %v2585_v15  ;;  %v608_v42 = vadd.f32 %v2495_v7, %v569_v33  ;;  %v617_v47 = vpack.c.bf16 %v591_v31, %v590_v29  ;;  %v555_v48 = vmul.f32 %v2491_v4, %v516_v40  ;;  %v556_v49 = vmul.f32 %v2491_v4, %v517_v41 }
  0x24   : > { %2253 = vmatprep.mubr.msk.bf16.mxu1 %vm636_vm1, %v2598_v28  ;;  %v609_v43 = vadd.f32 %v2495_v7, %v570_v35  ;;  %v625_v51 = vpack.c.bf16 %v607_v36, %v606_v32  ;;  %v618_v52 = vpack.c.bf16 %v593_v38, %v592_v37  ;;  %v571_v53 = vmul.f32 %v2491_v4, %v532_v44 }
  0x25   : > { %v572_v54 = vmul.f32 %v2491_v4, %v533_v46  ;;  %v594_v56 = vadd.f32 %v2495_v7, %v555_v48  ;;  %v595_v57 = vadd.f32 %v2495_v7, %v556_v49  ;;  %v2689_v4 = vld [vmem:[%s3023_s4] ss:$0 sm:$0xff] }
  0x26   : > { %v626_v55 = vpack.c.bf16 %v609_v43, %v608_v42  ;;  %v610_v58 = vadd.f32 %v2495_v7, %v571_v53 }
  0x27   : > { %v611_v59 = vadd.f32 %v2495_v7, %v572_v54  ;;  %v619_v60 = vpack.c.bf16 %v595_v57, %v594_v56 }
  0x29   : > { %2238 = vmatmul.mubr.msk.bf16.gmra.mrb[8].mxu0 %vm636_vm1, %v617_v47  ;;  %v627_v62 = vpack.c.bf16 %v611_v59, %v610_v58 }
  0x2a   : > { %2241 = vmatprep.mubr.msk.bf16.mxu0 %vm636_vm1, %v618_v52 }
  0x2b   : > { %2254 = vmatmul.mubr.msk.bf16.gmra.mrb[8].mxu1 %vm636_vm1, %v625_v51 }
  0x2c   : > { %2257 = vmatprep.mubr.msk.bf16.mxu1 %vm636_vm1, %v626_v55 }
  0x31   : > { %2242 = vmatmul.mubr.msk.bf16.gmra.mrb[12].mxu0 %vm636_vm1, %v619_v60 }
  0x32   : > { %2297 = vmatprep.mubr.msk.bf16.mxu0 %vm636_vm1, %v2523_v34 }
  0x33   : > { %2258 = vmatmul.mubr.msk.bf16.gmra.mrb[12].mxu1 %vm636_vm1, %v627_v62 }
  0x34   : > { %2263 = vmatprep.mubr.msk.bf16.mxu1 %vm636_vm1, %v2523_v34 }
  0x39   : > { %2298 = vmatmul.mubr.msk.bf16.vlgmr.msra.gmra.mrb[16].mxu0 %vm636_vm1, %v2538_v45 }
  0x3a   : > { %2301 = vmatprep.mubr.msk.bf16.mxu0 %vm636_vm1, %v2562_v61 }
  0x3b   : > { %2264 = vmatmul.mubr.msk.bf16.vlgmr.msra.gmra.mrb[16].mxu1 %vm636_vm1, %v2538_v45 }
  0x3c   : > { %2267 = vmatprep.mubr.msk.bf16.mxu1 %vm636_vm1, %v2562_v61 }
  0x41   : > { %2302 = vmatmul.mubr.msk.bf16.gmra.mrb[20].mxu0 %vm636_vm1, %v2577_v10 }
  0x42   : > { %2305 = vmatprep.mubr.msk.bf16.mxu0 %vm636_vm1, %v616_v26 }
  0x43   : > { %2268 = vmatmul.mubr.msk.bf16.gmra.mrb[20].mxu1 %vm636_vm1, %v2577_v10 }
  0x44   : > { %2271 = vmatprep.mubr.msk.bf16.mxu1 %vm636_vm1, %v616_v26 }
  0x49   : > { %2306 = vmatmul.mubr.msk.bf16.gmra.mrb[24].mxu0 %vm636_vm1, %v617_v47 }
  0x4a   : > { %2309 = vmatprep.mubr.msk.bf16.mxu0 %vm636_vm1, %v618_v52 }
  0x4b   : > { %2272 = vmatmul.mubr.msk.bf16.gmra.mrb[24].mxu1 %vm636_vm1, %v617_v47 }
  0x4c   : > { %2275 = vmatprep.mubr.msk.bf16.mxu1 %vm636_vm1, %v618_v52 }
  0x51   : > { %2310 = vmatmul.mubr.msk.bf16.gmra.mrb[28].mxu0 %vm636_vm1, %v619_v60 }
  0x52   : > { %2313 = vmatprep.mubr.msk.bf16.mxu0 %vm636_vm1, %v2529_v39 }
  0x53   : > { %2276 = vmatmul.mubr.msk.bf16.gmra.mrb[28].mxu1 %vm636_vm1, %v619_v60 }
  0x54   : > { %2279 = vmatprep.mubr.msk.bf16.mxu1 %vm636_vm1, %v2529_v39 }
  0x59   : > { %2314 = vmatmul.mubr.msk.bf16.gmra.mrb[32].mxu0 %vm636_vm1, %v2546_v50 }
  0x5a   : > { %2317 = vmatprep.mubr.msk.bf16.mxu0 %vm636_vm1, %v2568_v2 }
  0x5b   : > { %2280 = vmatmul.mubr.msk.bf16.gmra.mrb[32].mxu1 %vm636_vm1, %v2546_v50 }
  0x5c   : > { %2283 = vmatprep.mubr.msk.bf16.mxu1 %vm636_vm1, %v2568_v2 }
  0x61   : > { %2318 = vmatmul.mubr.msk.bf16.gmra.mrb[36].mxu0 %vm636_vm1, %v2585_v15 }
  0x62   : > { %2321 = vmatprep.mubr.msk.bf16.mxu0 %vm636_vm1, %v2598_v28 }
  0x63   : > { %2284 = vmatmul.mubr.msk.bf16.gmra.mrb[36].mxu1 %vm636_vm1, %v2585_v15 }
  0x64   : > { %2287 = vmatprep.mubr.msk.bf16.mxu1 %vm636_vm1, %v2598_v28 }
  0x69   : > { %2322 = vmatmul.mubr.msk.bf16.gmra.mrb[40].mxu0 %vm636_vm1, %v625_v51 }
  0x6a   : > { %2325 = vmatprep.mubr.msk.bf16.mxu0 %vm636_vm1, %v626_v55 }
  0x6b   : > { %2288 = vmatmul.mubr.msk.bf16.gmra.mrb[40].mxu1 %vm636_vm1, %v625_v51 }
  0x6c   : > { %2291 = vmatprep.mubr.msk.bf16.mxu1 %vm636_vm1, %v626_v55 }
  0x71   : > { %2326 = vmatmul.mubr.msk.bf16.gmra.mrb[44].mxu0 %vm636_vm1, %v627_v62 }
  0x73   : > { %2292 = vmatmul.mubr.msk.bf16.gmra.mrb[44].mxu1 %vm636_vm1, %v627_v62 }
  0xec   : > { %v2231_v7 = vpop.f32.mrb[0].mxu0 }
  0xed   : > { %v732_v34 = vadd.f32 %v2231_v7, %v2689_v4  ;;  %v723_v45 = vpop.f32.mrb[1].mxu0 }
  0xee   : > { %v2247_v39 = vpop.f32.mrb[0].mxu1  ;;  %v724_v61 = vadd.f32 %v2689_v4, %v723_v45  ;;  %v2232_v0 = vpop.f32.mrb[2].mxu0 }
  0xef   : > { %v796_v50 = vadd.f32 %v2247_v39, %v2689_v4  ;;  %v787_v63 = vpop.f32.mrb[1].mxu1  ;;  %v1196_v1 = vmul.f32 0.5, %v732_v34  ;;  %v735_v3 = vadd.f32 %v2232_v0, %v2689_v4  ;;  %v726_v6 = vpop.f32.mrb[3].mxu0 }
  0xf0   : > { %v788_v2 = vadd.f32 %v2689_v4, %v787_v63  ;;  %v2248_v5 = vpop.f32.mrb[2].mxu1  ;;  %v1194_v9 = vmul.f32 0.5, %v724_v61  ;;  %v727_v11 = vadd.f32 %v2689_v4, %v726_v6 }
  0xf1   : > { %v1212_v8 = vmul.f32 0.5, %v796_v50  ;;  %v799_v10 = vadd.f32 %v2248_v5, %v2689_v4  ;;  %v790_v12 = vpop.f32.mrb[3].mxu1  ;;  %v2082_v13 = vpack.c.bf16 %v1196_v1, %v1196_v1  ;;  %v1197_v15 = vmul.f32 0.5, %v735_v3 }
  0xf2   : > { %v1210_v14 = vmul.f32 0.5, %v788_v2  ;;  %v791_v16 = vadd.f32 %v2689_v4, %v790_v12  ;;  %v2080_v18 = vpack.c.bf16 %v1194_v9, %v1194_v9  ;;  %v1195_v20 = vmul.f32 0.5, %v727_v11 }
  0xf3   : > { %v2098_v17 = vpack.c.bf16 %v1212_v8, %v1212_v8  ;;  %v1213_v19 = vmul.f32 0.5, %v799_v10  ;;  %1357 = vst.msk [vmem:[%s2703_s26 + $0x8] sm:$0xf] %vm1354_vm2, %v2082_v13  ;;  %v2083_v22 = vpack.c.bf16 %v1197_v15, %v1197_v15 }
  0xf4   : > { %v2096_v21 = vpack.c.bf16 %v1210_v14, %v1210_v14  ;;  %v1211_v23 = vmul.f32 0.5, %v791_v16  ;;  %1355 = vst.msk [vmem:[%s2703_s26] sm:$0xf] %vm1354_vm2, %v2080_v18  ;;  %v2081_v25 = vpack.c.bf16 %v1195_v20, %v1195_v20  ;;  %v2235_v26 = vpop.f32.mrb[4].mxu0 }
  0xf5   : > { %1373 = vst.msk [vmem:[%s2703_s26 + $0x48] sm:$0xf] %vm1354_vm2, %v2098_v17  ;;  %v2099_v24 = vpack.c.bf16 %v1213_v19, %v1213_v19  ;;  %1358 = vst.msk [vmem:[%s2703_s26 + $0xc] sm:$0xf] %vm1354_vm2, %v2083_v22  ;;  %v748_v28 = vadd.f32 %v2235_v26, %v2689_v4  ;;  %v739_v30 = vpop.f32.mrb[5].mxu0 }
  0xf6   : > { %1371 = vst.msk [vmem:[%s2703_s26 + $0x40] sm:$0xf] %vm1354_vm2, %v2096_v21  ;;  %v2097_v27 = vpack.c.bf16 %v1211_v23, %v1211_v23  ;;  %v2251_v29 = vpop.f32.mrb[4].mxu1  ;;  %1356 = vst.msk [vmem:[%s2703_s26 + $0x4] sm:$0xf] %vm1354_vm2, %v2081_v25  ;;  %v740_v32 = vadd.f32 %v2689_v4, %v739_v30  ;;  %v2236_v35 = vpop.f32.mrb[6].mxu0 }
  0xf7   : > { %1374 = vst.msk [vmem:[%s2703_s26 + $0x4c] sm:$0xf] %vm1354_vm2, %v2099_v24  ;;  %v812_v31 = vadd.f32 %v2251_v29, %v2689_v4  ;;  %v803_v33 = vpop.f32.mrb[5].mxu1  ;;  %v1200_v36 = vmul.f32 0.5, %v748_v28  ;;  %v751_v38 = vadd.f32 %v2236_v35, %v2689_v4  ;;  %v742_v41 = vpop.f32.mrb[7].mxu0 }
  0xf8   : > { %1372 = vst.msk [vmem:[%s2703_s26 + $0x44] sm:$0xf] %vm1354_vm2, %v2097_v27  ;;  %v804_v37 = vadd.f32 %v2689_v4, %v803_v33  ;;  %v2252_v40 = vpop.f32.mrb[6].mxu1  ;;  %v1198_v43 = vmul.f32 0.5, %v740_v32  ;;  %v743_v46 = vadd.f32 %v2689_v4, %v742_v41 }
  0xf9   : > { %v1216_v42 = vmul.f32 0.5, %v812_v31  ;;  %v815_v44 = vadd.f32 %v2252_v40, %v2689_v4  ;;  %v806_v47 = vpop.f32.mrb[7].mxu1  ;;  %v2086_v48 = vpack.c.bf16 %v1200_v36, %v1200_v36  ;;  %v1201_v51 = vmul.f32 0.5, %v751_v38 }
  0xfa   : > { %v1214_v49 = vmul.f32 0.5, %v804_v37  ;;  %v807_v52 = vadd.f32 %v2689_v4, %v806_v47  ;;  %v2084_v54 = vpack.c.bf16 %v1198_v43, %v1198_v43  ;;  %v1199_v56 = vmul.f32 0.5, %v743_v46 }
  0xfb   : > { %v2102_v53 = vpack.c.bf16 %v1216_v42, %v1216_v42  ;;  %v1217_v55 = vmul.f32 0.5, %v815_v44  ;;  %1361 = vst.msk [vmem:[%s2703_s26 + $0x18] sm:$0xf] %vm1354_vm2, %v2086_v48  ;;  %v2087_v58 = vpack.c.bf16 %v1201_v51, %v1201_v51 }
  0xfc   : > { %v2100_v57 = vpack.c.bf16 %v1214_v49, %v1214_v49  ;;  %v1215_v59 = vmul.f32 0.5, %v807_v52  ;;  %1359 = vst.msk [vmem:[%s2703_s26 + $0x10] sm:$0xf] %vm1354_vm2, %v2084_v54  ;;  %v2085_v62 = vpack.c.bf16 %v1199_v56, %v1199_v56  ;;  %v2239_v7 = vpop.f32.mrb[8].mxu0 }
  0xfd   : > { %1377 = vst.msk [vmem:[%s2703_s26 + $0x58] sm:$0xf] %vm1354_vm2, %v2102_v53  ;;  %v2103_v60 = vpack.c.bf16 %v1217_v55, %v1217_v55  ;;  %1362 = vst.msk [vmem:[%s2703_s26 + $0x1c] sm:$0xf] %vm1354_vm2, %v2087_v58  ;;  %v764_v39 = vadd.f32 %v2239_v7, %v2689_v4  ;;  %v755_v50 = vpop.f32.mrb[9].mxu0 }
  0xfe   : > { %1375 = vst.msk [vmem:[%s2703_s26 + $0x50] sm:$0xf] %vm1354_vm2, %v2100_v57  ;;  %v2101_v34 = vpack.c.bf16 %v1215_v59, %v1215_v59  ;;  %v2255_v45 = vpop.f32.mrb[8].mxu1  ;;  %1360 = vst.msk [vmem:[%s2703_s26 + $0x14] sm:$0xf] %vm1354_vm2, %v2085_v62  ;;  %v756_v63 = vadd.f32 %v2689_v4, %v755_v50  ;;  %v2240_v1 = vpop.f32.mrb[10].mxu0 }
  0xff   : > { %1378 = vst.msk [vmem:[%s2703_s26 + $0x5c] sm:$0xf] %vm1354_vm2, %v2103_v60  ;;  %v828_v61 = vadd.f32 %v2255_v45, %v2689_v4  ;;  %v819_v0 = vpop.f32.mrb[9].mxu1  ;;  %v1204_v2 = vmul.f32 0.5, %v764_v39  ;;  %v767_v5 = vadd.f32 %v2240_v1, %v2689_v4  ;;  %v758_v8 = vpop.f32.mrb[11].mxu0 }
 0x100   : > { %1376 = vst.msk [vmem:[%s2703_s26 + $0x54] sm:$0xf] %vm1354_vm2, %v2101_v34  ;;  %v820_v3 = vadd.f32 %v2689_v4, %v819_v0  ;;  %v2256_v6 = vpop.f32.mrb[10].mxu1  ;;  %v1202_v10 = vmul.f32 0.5, %v756_v63  ;;  %v759_v12 = vadd.f32 %v2689_v4, %v758_v8  ;;  %v2783_v58 = vld [vmem:[%s3027_s8] ss:$0 sm:$0xff] }
 0x101   : > { %v1220_v9 = vmul.f32 0.5, %v828_v61  ;;  %v831_v11 = vadd.f32 %v2256_v6, %v2689_v4  ;;  %v822_v13 = vpop.f32.mrb[11].mxu1  ;;  %v2090_v14 = vpack.c.bf16 %v1204_v2, %v1204_v2  ;;  %v1205_v16 = vmul.f32 0.5, %v767_v5 }
 0x102   : > { %v1218_v15 = vmul.f32 0.5, %v820_v3  ;;  %v823_v17 = vadd.f32 %v2689_v4, %v822_v13  ;;  %v2088_v19 = vpack.c.bf16 %v1202_v10, %v1202_v10  ;;  %v1203_v21 = vmul.f32 0.5, %v759_v12 }
 0x103   : > { %v2106_v18 = vpack.c.bf16 %v1220_v9, %v1220_v9  ;;  %v1221_v20 = vmul.f32 0.5, %v831_v11  ;;  %1365 = vst.msk [vmem:[%s2703_s26 + $0x28] sm:$0xf] %vm1354_vm2, %v2090_v14  ;;  %v2091_v23 = vpack.c.bf16 %v1205_v16, %v1205_v16 }
 0x104   : > { %v2104_v22 = vpack.c.bf16 %v1218_v15, %v1218_v15  ;;  %v1219_v24 = vmul.f32 0.5, %v823_v17  ;;  %1363 = vst.msk [vmem:[%s2703_s26 + $0x20] sm:$0xf] %vm1354_vm2, %v2088_v19  ;;  %v2089_v26 = vpack.c.bf16 %v1203_v21, %v1203_v21  ;;  %v2243_v27 = vpop.f32.mrb[12].mxu0 }
 0x105   : > { %1381 = vst.msk [vmem:[%s2703_s26 + $0x68] sm:$0xf] %vm1354_vm2, %v2106_v18  ;;  %v2107_v25 = vpack.c.bf16 %v1221_v20, %v1221_v20  ;;  %1366 = vst.msk [vmem:[%s2703_s26 + $0x2c] sm:$0xf] %vm1354_vm2, %v2091_v23  ;;  %v780_v29 = vadd.f32 %v2243_v27, %v2689_v4  ;;  %v771_v31 = vpop.f32.mrb[13].mxu0 }
 0x106   : > { %1379 = vst.msk [vmem:[%s2703_s26 + $0x60] sm:$0xf] %vm1354_vm2, %v2104_v22  ;;  %v2105_v28 = vpack.c.bf16 %v1219_v24, %v1219_v24  ;;  %v2259_v30 = vpop.f32.mrb[12].mxu1  ;;  %1364 = vst.msk [vmem:[%s2703_s26 + $0x24] sm:$0xf] %vm1354_vm2, %v2089_v26  ;;  %v772_v33 = vadd.f32 %v2689_v4, %v771_v31  ;;  %v2244_v36 = vpop.f32.mrb[14].mxu0 }
 0x107   : > { %1382 = vst.msk [vmem:[%s2703_s26 + $0x6c] sm:$0xf] %vm1354_vm2, %v2107_v25  ;;  %v844_v32 = vadd.f32 %v2259_v30, %v2689_v4  ;;  %v835_v35 = vpop.f32.mrb[13].mxu1  ;;  %v1208_v37 = vmul.f32 0.5, %v780_v29  ;;  %v783_v40 = vadd.f32 %v2244_v36, %v2689_v4  ;;  %v774_v42 = vpop.f32.mrb[15].mxu0 }
 0x108   : > { %1380 = vst.msk [vmem:[%s2703_s26 + $0x64] sm:$0xf] %vm1354_vm2, %v2105_v28  ;;  %v836_v38 = vadd.f32 %v2689_v4, %v835_v35  ;;  %v2260_v41 = vpop.f32.mrb[14].mxu1  ;;  %v1206_v44 = vmul.f32 0.5, %v772_v33  ;;  %v775_v47 = vadd.f32 %v2689_v4, %v774_v42 }
 0x109   : > { %v1224_v43 = vmul.f32 0.5, %v844_v32  ;;  %v847_v46 = vadd.f32 %v2260_v41, %v2689_v4  ;;  %v838_v48 = vpop.f32.mrb[15].mxu1  ;;  %v2094_v49 = vpack.c.bf16 %v1208_v37, %v1208_v37  ;;  %v1209_v52 = vmul.f32 0.5, %v783_v40 }
 0x10a   : > { %v1222_v51 = vmul.f32 0.5, %v836_v38  ;;  %v839_v53 = vadd.f32 %v2689_v4, %v838_v48  ;;  %v2092_v55 = vpack.c.bf16 %v1206_v44, %v1206_v44  ;;  %v1207_v57 = vmul.f32 0.5, %v775_v47  ;;  %v2790_v4 = vld [vmem:[%s3025_s6] ss:$0 sm:$0xff] }
 0x10b   : > { %v2110_v54 = vpack.c.bf16 %v1224_v43, %v1224_v43  ;;  %v1225_v56 = vmul.f32 0.5, %v847_v46  ;;  %1369 = vst.msk [vmem:[%s2703_s26 + $0x38] sm:$0xf] %vm1354_vm2, %v2094_v49  ;;  %v2095_v60 = vpack.c.bf16 %v1209_v52, %v1209_v52 }
 0x10c   : > { %v2108_v59 = vpack.c.bf16 %v1222_v51, %v1222_v51  ;;  %v1223_v62 = vmul.f32 0.5, %v839_v53  ;;  %1367 = vst.msk [vmem:[%s2703_s26 + $0x30] sm:$0xf] %vm1354_vm2, %v2092_v55  ;;  %v2093_v34 = vpack.c.bf16 %v1207_v57, %v1207_v57  ;;  %v2299_v39 = vpop.f32.mrb[16].mxu0 }
 0x10d   : > { %1385 = vst.msk [vmem:[%s2703_s26 + $0x78] sm:$0xf] %vm1354_vm2, %v2110_v54  ;;  %v2111_v7 = vpack.c.bf16 %v1225_v56, %v1225_v56  ;;  %1370 = vst.msk [vmem:[%s2703_s26 + $0x3c] sm:$0xf] %vm1354_vm2, %v2095_v60  ;;  %v1076_v61 = vadd.f32 %v2299_v39, %v2783_v58  ;;  %v1067_v63 = vpop.f32.mrb[17].mxu0 }
 0x10e   : > { %1383 = vst.msk [vmem:[%s2703_s26 + $0x70] sm:$0xf] %vm1354_vm2, %v2108_v59  ;;  %v2109_v45 = vpack.c.bf16 %v1223_v62, %v1223_v62  ;;  %v2265_v50 = vpop.f32.mrb[16].mxu1  ;;  %1368 = vst.msk [vmem:[%s2703_s26 + $0x34] sm:$0xf] %vm1354_vm2, %v2093_v34  ;;  %v1068_v2 = vadd.f32 %v2783_v58, %v1067_v63  ;;  %v2300_v3 = vpop.f32.mrb[18].mxu0 }
 0x10f   : > { %1386 = vst.msk [vmem:[%s2703_s26 + $0x7c] sm:$0xf] %vm1354_vm2, %v2111_v7  ;;  %v904_v0 = vadd.f32 %v2265_v50, %v2790_v4  ;;  %v895_v1 = vpop.f32.mrb[17].mxu1  ;;  %v2146_v5 = vpack.c.bf16 %v1076_v61, %v1076_v61  ;;  %v1079_v9 = vadd.f32 %v2300_v3, %v2783_v58  ;;  %v1070_v10 = vpop.f32.mrb[19].mxu0 }
 0x110   : > { %1384 = vst.msk [vmem:[%s2703_s26 + $0x74] sm:$0xf] %vm1354_vm2, %v2109_v45  ;;  %v896_v6 = vadd.f32 %v2790_v4, %v895_v1  ;;  %v2266_v8 = vpop.f32.mrb[18].mxu1  ;;  %v2144_v12 = vpack.c.bf16 %v1068_v2, %v1068_v2  ;;  %v1071_v15 = vadd.f32 %v2783_v58, %v1070_v10 }
 0x111   : > { %v2114_v11 = vpack.c.bf16 %v904_v0, %v904_v0  ;;  %v907_v13 = vadd.f32 %v2266_v8, %v2790_v4  ;;  %v898_v14 = vpop.f32.mrb[19].mxu1  ;;  %1677 = vst.msk [vmem:[%s2810_s14 + $0x8] sm:$0xf] %vm1354_vm2, %v2146_v5  ;;  %v2147_v17 = vpack.c.bf16 %v1079_v9, %v1079_v9 }
 0x112   : > { %v2112_v16 = vpack.c.bf16 %v896_v6, %v896_v6  ;;  %v899_v18 = vadd.f32 %v2790_v4, %v898_v14  ;;  %1675 = vst.msk [vmem:[%s2810_s14] sm:$0xf] %vm1354_vm2, %v2144_v12  ;;  %v2145_v20 = vpack.c.bf16 %v1071_v15, %v1071_v15 }
 0x113   : > { %1517 = vst.msk [vmem:[%s2819_s21 + $0x8] sm:$0xf] %vm1354_vm2, %v2114_v11  ;;  %v2115_v19 = vpack.c.bf16 %v907_v13, %v907_v13  ;;  %1678 = vst.msk [vmem:[%s2810_s14 + $0xc] sm:$0xf] %vm1354_vm2, %v2147_v17 }
 0x114   : > { %1515 = vst.msk [vmem:[%s2819_s21] sm:$0xf] %vm1354_vm2, %v2112_v16  ;;  %v2113_v21 = vpack.c.bf16 %v899_v18, %v899_v18  ;;  %1676 = vst.msk [vmem:[%s2810_s14 + $0x4] sm:$0xf] %vm1354_vm2, %v2145_v20  ;;  %v2303_v22 = vpop.f32.mrb[20].mxu0 }
 0x115   : > { %1518 = vst.msk [vmem:[%s2819_s21 + $0xc] sm:$0xf] %vm1354_vm2, %v2115_v19  ;;  %v1092_v24 = vadd.f32 %v2303_v22, %v2783_v58  ;;  %v1083_v25 = vpop.f32.mrb[21].mxu0 }
 0x116   : > { %1516 = vst.msk [vmem:[%s2819_s21 + $0x4] sm:$0xf] %vm1354_vm2, %v2113_v21  ;;  %v2269_v23 = vpop.f32.mrb[20].mxu1  ;;  %v1084_v28 = vadd.f32 %v2783_v58, %v1083_v25  ;;  %v2304_v29 = vpop.f32.mrb[22].mxu0 }
 0x117   : > { %v920_v26 = vadd.f32 %v2269_v23, %v2790_v4  ;;  %v911_v27 = vpop.f32.mrb[21].mxu1  ;;  %v2150_v30 = vpack.c.bf16 %v1092_v24, %v1092_v24  ;;  %v1095_v33 = vadd.f32 %v2304_v29, %v2783_v58  ;;  %v1086_v35 = vpop.f32.mrb[23].mxu0 }
 0x118   : > { %v912_v31 = vadd.f32 %v2790_v4, %v911_v27  ;;  %v2270_v32 = vpop.f32.mrb[22].mxu1  ;;  %v2148_v37 = vpack.c.bf16 %v1084_v28, %v1084_v28  ;;  %v1087_v41 = vadd.f32 %v2783_v58, %v1086_v35 }
 0x119   : > { %v2118_v36 = vpack.c.bf16 %v920_v26, %v920_v26  ;;  %v923_v38 = vadd.f32 %v2270_v32, %v2790_v4  ;;  %v914_v40 = vpop.f32.mrb[23].mxu1  ;;  %1681 = vst.msk [vmem:[%s2810_s14 + $0x18] sm:$0xf] %vm1354_vm2, %v2150_v30  ;;  %v2151_v43 = vpack.c.bf16 %v1095_v33, %v1095_v33 }
 0x11a   : > { %v2116_v42 = vpack.c.bf16 %v912_v31, %v912_v31  ;;  %v915_v44 = vadd.f32 %v2790_v4, %v914_v40  ;;  %1679 = vst.msk [vmem:[%s2810_s14 + $0x10] sm:$0xf] %vm1354_vm2, %v2148_v37  ;;  %v2149_v47 = vpack.c.bf16 %v1087_v41, %v1087_v41 }
 0x11b   : > { %1521 = vst.msk [vmem:[%s2819_s21 + $0x18] sm:$0xf] %vm1354_vm2, %v2118_v36  ;;  %v2119_v46 = vpack.c.bf16 %v923_v38, %v923_v38  ;;  %1682 = vst.msk [vmem:[%s2810_s14 + $0x1c] sm:$0xf] %vm1354_vm2, %v2151_v43 }
 0x11c   : > { %1519 = vst.msk [vmem:[%s2819_s21 + $0x10] sm:$0xf] %vm1354_vm2, %v2116_v42  ;;  %v2117_v48 = vpack.c.bf16 %v915_v44, %v915_v44  ;;  %1680 = vst.msk [vmem:[%s2810_s14 + $0x14] sm:$0xf] %vm1354_vm2, %v2149_v47  ;;  %v2307_v49 = vpop.f32.mrb[24].mxu0 }
 0x11d   : > { %1522 = vst.msk [vmem:[%s2819_s21 + $0x1c] sm:$0xf] %vm1354_vm2, %v2119_v46  ;;  %v1108_v52 = vadd.f32 %v2307_v49, %v2783_v58  ;;  %v1099_v53 = vpop.f32.mrb[25].mxu0 }
 0x11e   : > { %1520 = vst.msk [vmem:[%s2819_s21 + $0x14] sm:$0xf] %vm1354_vm2, %v2117_v48  ;;  %v2273_v51 = vpop.f32.mrb[24].mxu1  ;;  %v1100_v56 = vadd.f32 %v2783_v58, %v1099_v53  ;;  %v2308_v57 = vpop.f32.mrb[26].mxu0 }
 0x11f   : > { %v936_v54 = vadd.f32 %v2273_v51, %v2790_v4  ;;  %v927_v55 = vpop.f32.mrb[25].mxu1  ;;  %v2154_v59 = vpack.c.bf16 %v1108_v52, %v1108_v52  ;;  %v1111_v7 = vadd.f32 %v2308_v57, %v2783_v58  ;;  %v1102_v34 = vpop.f32.mrb[27].mxu0 }
 0x120   : > { %v928_v60 = vadd.f32 %v2790_v4, %v927_v55  ;;  %v2274_v62 = vpop.f32.mrb[26].mxu1  ;;  %v2152_v45 = vpack.c.bf16 %v1100_v56, %v1100_v56  ;;  %v1103_v63 = vadd.f32 %v2783_v58, %v1102_v34 }
 0x121   : > { %v2122_v39 = vpack.c.bf16 %v936_v54, %v936_v54  ;;  %v939_v50 = vadd.f32 %v2274_v62, %v2790_v4  ;;  %v930_v61 = vpop.f32.mrb[27].mxu1  ;;  %1685 = vst.msk [vmem:[%s2810_s14 + $0x28] sm:$0xf] %vm1354_vm2, %v2154_v59  ;;  %v2155_v1 = vpack.c.bf16 %v1111_v7, %v1111_v7 }
 0x122   : > { %v2120_v0 = vpack.c.bf16 %v928_v60, %v928_v60  ;;  %v931_v2 = vadd.f32 %v2790_v4, %v930_v61  ;;  %1683 = vst.msk [vmem:[%s2810_s14 + $0x20] sm:$0xf] %vm1354_vm2, %v2152_v45  ;;  %v2153_v5 = vpack.c.bf16 %v1103_v63, %v1103_v63 }
 0x123   : > { %1525 = vst.msk [vmem:[%s2819_s21 + $0x28] sm:$0xf] %vm1354_vm2, %v2122_v39  ;;  %v2123_v3 = vpack.c.bf16 %v939_v50, %v939_v50  ;;  %1686 = vst.msk [vmem:[%s2810_s14 + $0x2c] sm:$0xf] %vm1354_vm2, %v2155_v1 }
 0x124   : > { %1523 = vst.msk [vmem:[%s2819_s21 + $0x20] sm:$0xf] %vm1354_vm2, %v2120_v0  ;;  %v2121_v6 = vpack.c.bf16 %v931_v2, %v931_v2  ;;  %1684 = vst.msk [vmem:[%s2810_s14 + $0x24] sm:$0xf] %vm1354_vm2, %v2153_v5  ;;  %v2311_v8 = vpop.f32.mrb[28].mxu0 }
 0x125   : > { %1526 = vst.msk [vmem:[%s2819_s21 + $0x2c] sm:$0xf] %vm1354_vm2, %v2123_v3  ;;  %v1124_v10 = vadd.f32 %v2311_v8, %v2783_v58  ;;  %v1115_v11 = vpop.f32.mrb[29].mxu0 }
 0x126   : > { %1524 = vst.msk [vmem:[%s2819_s21 + $0x24] sm:$0xf] %vm1354_vm2, %v2121_v6  ;;  %v2277_v9 = vpop.f32.mrb[28].mxu1  ;;  %v1116_v14 = vadd.f32 %v2783_v58, %v1115_v11  ;;  %v2312_v15 = vpop.f32.mrb[30].mxu0 }
 0x127   : > { %v952_v12 = vadd.f32 %v2277_v9, %v2790_v4  ;;  %v943_v13 = vpop.f32.mrb[29].mxu1  ;;  %v2158_v16 = vpack.c.bf16 %v1124_v10, %v1124_v10  ;;  %v1127_v19 = vadd.f32 %v2312_v15, %v2783_v58  ;;  %v1118_v20 = vpop.f32.mrb[31].mxu0 }
 0x128   : > { %v944_v17 = vadd.f32 %v2790_v4, %v943_v13  ;;  %v2278_v18 = vpop.f32.mrb[30].mxu1  ;;  %v2156_v22 = vpack.c.bf16 %v1116_v14, %v1116_v14  ;;  %v1119_v25 = vadd.f32 %v2783_v58, %v1118_v20 }
 0x129   : > { %v2126_v21 = vpack.c.bf16 %v952_v12, %v952_v12  ;;  %v955_v23 = vadd.f32 %v2278_v18, %v2790_v4  ;;  %v946_v24 = vpop.f32.mrb[31].mxu1  ;;  %1689 = vst.msk [vmem:[%s2810_s14 + $0x38] sm:$0xf] %vm1354_vm2, %v2158_v16  ;;  %v2159_v27 = vpack.c.bf16 %v1127_v19, %v1127_v19 }
 0x12a   : > { %v2124_v26 = vpack.c.bf16 %v944_v17, %v944_v17  ;;  %v947_v28 = vadd.f32 %v2790_v4, %v946_v24  ;;  %1687 = vst.msk [vmem:[%s2810_s14 + $0x30] sm:$0xf] %vm1354_vm2, %v2156_v22  ;;  %v2157_v30 = vpack.c.bf16 %v1119_v25, %v1119_v25 }
 0x12b   : > { %1529 = vst.msk [vmem:[%s2819_s21 + $0x38] sm:$0xf] %vm1354_vm2, %v2126_v21  ;;  %v2127_v29 = vpack.c.bf16 %v955_v23, %v955_v23  ;;  %1690 = vst.msk [vmem:[%s2810_s14 + $0x3c] sm:$0xf] %vm1354_vm2, %v2159_v27 }
 0x12c   : > { %1527 = vst.msk [vmem:[%s2819_s21 + $0x30] sm:$0xf] %vm1354_vm2, %v2124_v26  ;;  %v2125_v31 = vpack.c.bf16 %v947_v28, %v947_v28  ;;  %1688 = vst.msk [vmem:[%s2810_s14 + $0x34] sm:$0xf] %vm1354_vm2, %v2157_v30  ;;  %v2315_v32 = vpop.f32.mrb[32].mxu0 }
 0x12d   : > { %1530 = vst.msk [vmem:[%s2819_s21 + $0x3c] sm:$0xf] %vm1354_vm2, %v2127_v29  ;;  %v1140_v35 = vadd.f32 %v2315_v32, %v2783_v58  ;;  %v1131_v36 = vpop.f32.mrb[33].mxu0 }
 0x12e   : > { %1528 = vst.msk [vmem:[%s2819_s21 + $0x34] sm:$0xf] %vm1354_vm2, %v2125_v31  ;;  %v2281_v33 = vpop.f32.mrb[32].mxu1  ;;  %v1132_v40 = vadd.f32 %v2783_v58, %v1131_v36  ;;  %v2316_v41 = vpop.f32.mrb[34].mxu0 }
 0x12f   : > { %v968_v37 = vadd.f32 %v2281_v33, %v2790_v4  ;;  %v959_v38 = vpop.f32.mrb[33].mxu1  ;;  %v2162_v42 = vpack.c.bf16 %v1140_v35, %v1140_v35  ;;  %v1143_v46 = vadd.f32 %v2316_v41, %v2783_v58  ;;  %v1134_v47 = vpop.f32.mrb[35].mxu0 }
 0x130   : > { %v960_v43 = vadd.f32 %v2790_v4, %v959_v38  ;;  %v2282_v44 = vpop.f32.mrb[34].mxu1  ;;  %v2160_v49 = vpack.c.bf16 %v1132_v40, %v1132_v40  ;;  %v1135_v53 = vadd.f32 %v2783_v58, %v1134_v47 }
 0x131   : > { %v2130_v48 = vpack.c.bf16 %v968_v37, %v968_v37  ;;  %v971_v51 = vadd.f32 %v2282_v44, %v2790_v4  ;;  %v962_v52 = vpop.f32.mrb[35].mxu1  ;;  %1693 = vst.msk [vmem:[%s2810_s14 + $0x48] sm:$0xf] %vm1354_vm2, %v2162_v42  ;;  %v2163_v55 = vpack.c.bf16 %v1143_v46, %v1143_v46 }
 0x132   : > { %v2128_v54 = vpack.c.bf16 %v960_v43, %v960_v43  ;;  %v963_v56 = vadd.f32 %v2790_v4, %v962_v52  ;;  %1691 = vst.msk [vmem:[%s2810_s14 + $0x40] sm:$0xf] %vm1354_vm2, %v2160_v49  ;;  %v2161_v59 = vpack.c.bf16 %v1135_v53, %v1135_v53 }
 0x133   : > { %1533 = vst.msk [vmem:[%s2819_s21 + $0x48] sm:$0xf] %vm1354_vm2, %v2130_v48  ;;  %v2131_v57 = vpack.c.bf16 %v971_v51, %v971_v51  ;;  %1694 = vst.msk [vmem:[%s2810_s14 + $0x4c] sm:$0xf] %vm1354_vm2, %v2163_v55 }
 0x134   : > { %1531 = vst.msk [vmem:[%s2819_s21 + $0x40] sm:$0xf] %vm1354_vm2, %v2128_v54  ;;  %v2129_v60 = vpack.c.bf16 %v963_v56, %v963_v56  ;;  %1692 = vst.msk [vmem:[%s2810_s14 + $0x44] sm:$0xf] %vm1354_vm2, %v2161_v59  ;;  %v2319_v62 = vpop.f32.mrb[36].mxu0 }
 0x135   : > { %1534 = vst.msk [vmem:[%s2819_s21 + $0x4c] sm:$0xf] %vm1354_vm2, %v2131_v57  ;;  %v1156_v34 = vadd.f32 %v2319_v62, %v2783_v58  ;;  %v1147_v39 = vpop.f32.mrb[37].mxu0 }
 0x136   : > { %1532 = vst.msk [vmem:[%s2819_s21 + $0x44] sm:$0xf] %vm1354_vm2, %v2129_v60  ;;  %v2285_v7 = vpop.f32.mrb[36].mxu1  ;;  %v1148_v61 = vadd.f32 %v2783_v58, %v1147_v39  ;;  %v2320_v63 = vpop.f32.mrb[38].mxu0 }
 0x137   : > { %v984_v45 = vadd.f32 %v2285_v7, %v2790_v4  ;;  %v975_v50 = vpop.f32.mrb[37].mxu1  ;;  %v2166_v0 = vpack.c.bf16 %v1156_v34, %v1156_v34  ;;  %v1159_v3 = vadd.f32 %v2320_v63, %v2783_v58  ;;  %v1150_v5 = vpop.f32.mrb[39].mxu0 }
 0x138   : > { %v976_v1 = vadd.f32 %v2790_v4, %v975_v50  ;;  %v2286_v2 = vpop.f32.mrb[38].mxu1  ;;  %v2164_v8 = vpack.c.bf16 %v1148_v61, %v1148_v61  ;;  %v1151_v11 = vadd.f32 %v2783_v58, %v1150_v5 }
 0x139   : > { %v2134_v6 = vpack.c.bf16 %v984_v45, %v984_v45  ;;  %v987_v9 = vadd.f32 %v2286_v2, %v2790_v4  ;;  %v978_v10 = vpop.f32.mrb[39].mxu1  ;;  %1697 = vst.msk [vmem:[%s2810_s14 + $0x58] sm:$0xf] %vm1354_vm2, %v2166_v0  ;;  %v2167_v13 = vpack.c.bf16 %v1159_v3, %v1159_v3 }
 0x13a   : > { %v2132_v12 = vpack.c.bf16 %v976_v1, %v976_v1  ;;  %v979_v14 = vadd.f32 %v2790_v4, %v978_v10  ;;  %1695 = vst.msk [vmem:[%s2810_s14 + $0x50] sm:$0xf] %vm1354_vm2, %v2164_v8  ;;  %v2165_v16 = vpack.c.bf16 %v1151_v11, %v1151_v11 }
 0x13b   : > { %1537 = vst.msk [vmem:[%s2819_s21 + $0x58] sm:$0xf] %vm1354_vm2, %v2134_v6  ;;  %v2135_v15 = vpack.c.bf16 %v987_v9, %v987_v9  ;;  %1698 = vst.msk [vmem:[%s2810_s14 + $0x5c] sm:$0xf] %vm1354_vm2, %v2167_v13 }
 0x13c   : > { %1535 = vst.msk [vmem:[%s2819_s21 + $0x50] sm:$0xf] %vm1354_vm2, %v2132_v12  ;;  %v2133_v17 = vpack.c.bf16 %v979_v14, %v979_v14  ;;  %1696 = vst.msk [vmem:[%s2810_s14 + $0x54] sm:$0xf] %vm1354_vm2, %v2165_v16  ;;  %v2323_v18 = vpop.f32.mrb[40].mxu0 }
 0x13d   : > { %1538 = vst.msk [vmem:[%s2819_s21 + $0x5c] sm:$0xf] %vm1354_vm2, %v2135_v15  ;;  %v1172_v20 = vadd.f32 %v2323_v18, %v2783_v58  ;;  %v1163_v21 = vpop.f32.mrb[41].mxu0 }
 0x13e   : > { %1536 = vst.msk [vmem:[%s2819_s21 + $0x54] sm:$0xf] %vm1354_vm2, %v2133_v17  ;;  %v2289_v19 = vpop.f32.mrb[40].mxu1  ;;  %v1164_v24 = vadd.f32 %v2783_v58, %v1163_v21  ;;  %v2324_v25 = vpop.f32.mrb[42].mxu0 }
 0x13f   : > { %v1000_v22 = vadd.f32 %v2289_v19, %v2790_v4  ;;  %v991_v23 = vpop.f32.mrb[41].mxu1  ;;  %v2170_v26 = vpack.c.bf16 %v1172_v20, %v1172_v20  ;;  %v1175_v29 = vadd.f32 %v2324_v25, %v2783_v58  ;;  %v1166_v30 = vpop.f32.mrb[43].mxu0 }
 0x140   : > { %v992_v27 = vadd.f32 %v2790_v4, %v991_v23  ;;  %v2290_v28 = vpop.f32.mrb[42].mxu1  ;;  %v2168_v32 = vpack.c.bf16 %v1164_v24, %v1164_v24  ;;  %v1167_v36 = vadd.f32 %v2783_v58, %v1166_v30 }
 0x141   : > { %v2138_v31 = vpack.c.bf16 %v1000_v22, %v1000_v22  ;;  %v1003_v33 = vadd.f32 %v2290_v28, %v2790_v4  ;;  %v994_v35 = vpop.f32.mrb[43].mxu1  ;;  %1701 = vst.msk [vmem:[%s2810_s14 + $0x68] sm:$0xf] %vm1354_vm2, %v2170_v26  ;;  %v2171_v38 = vpack.c.bf16 %v1175_v29, %v1175_v29 }
 0x142   : > { %v2136_v37 = vpack.c.bf16 %v992_v27, %v992_v27  ;;  %v995_v40 = vadd.f32 %v2790_v4, %v994_v35  ;;  %1699 = vst.msk [vmem:[%s2810_s14 + $0x60] sm:$0xf] %vm1354_vm2, %v2168_v32  ;;  %v2169_v42 = vpack.c.bf16 %v1167_v36, %v1167_v36 }
 0x143   : > { %1541 = vst.msk [vmem:[%s2819_s21 + $0x68] sm:$0xf] %vm1354_vm2, %v2138_v31  ;;  %v2139_v41 = vpack.c.bf16 %v1003_v33, %v1003_v33  ;;  %1702 = vst.msk [vmem:[%s2810_s14 + $0x6c] sm:$0xf] %vm1354_vm2, %v2171_v38 }
 0x144   : > { %1539 = vst.msk [vmem:[%s2819_s21 + $0x60] sm:$0xf] %vm1354_vm2, %v2136_v37  ;;  %v2137_v43 = vpack.c.bf16 %v995_v40, %v995_v40  ;;  %1700 = vst.msk [vmem:[%s2810_s14 + $0x64] sm:$0xf] %vm1354_vm2, %v2169_v42  ;;  %v2327_v44 = vpop.f32.mrb[44].mxu0 }
 0x145   : > { %1542 = vst.msk [vmem:[%s2819_s21 + $0x6c] sm:$0xf] %vm1354_vm2, %v2139_v41  ;;  %v1188_v47 = vadd.f32 %v2327_v44, %v2783_v58  ;;  %v1179_v48 = vpop.f32.mrb[45].mxu0 }
 0x146   : > { %1540 = vst.msk [vmem:[%s2819_s21 + $0x64] sm:$0xf] %vm1354_vm2, %v2137_v43  ;;  %v2293_v46 = vpop.f32.mrb[44].mxu1  ;;  %v1180_v52 = vadd.f32 %v2783_v58, %v1179_v48  ;;  %v2328_v53 = vpop.f32.mrb[46].mxu0 }
 0x147   : > { %v1016_v49 = vadd.f32 %v2293_v46, %v2790_v4  ;;  %v1007_v51 = vpop.f32.mrb[45].mxu1  ;;  %v2174_v54 = vpack.c.bf16 %v1188_v47, %v1188_v47  ;;  %v1191_v57 = vadd.f32 %v2328_v53, %v2783_v58  ;;  %v1182_v59 = vpop.f32.mrb[47].mxu0 }
 0x148   : > { %v1008_v55 = vadd.f32 %v2790_v4, %v1007_v51  ;;  %v2294_v56 = vpop.f32.mrb[46].mxu1  ;;  %v2172_v62 = vpack.c.bf16 %v1180_v52, %v1180_v52  ;;  %v1183_v39 = vadd.f32 %v2783_v58, %v1182_v59 }
 0x149   : > { %v2142_v60 = vpack.c.bf16 %v1016_v49, %v1016_v49  ;;  %v1019_v7 = vadd.f32 %v2294_v56, %v2790_v4  ;;  %v1010_v34 = vpop.f32.mrb[47].mxu1  ;;  %1705 = vst.msk [vmem:[%s2810_s14 + $0x78] sm:$0xf] %vm1354_vm2, %v2174_v54  ;;  %v2175_v50 = vpack.c.bf16 %v1191_v57, %v1191_v57 }
 0x14a   : > { %v2140_v45 = vpack.c.bf16 %v1008_v55, %v1008_v55  ;;  %v1011_v61 = vadd.f32 %v2790_v4, %v1010_v34  ;;  %1703 = vst.msk [vmem:[%s2810_s14 + $0x70] sm:$0xf] %vm1354_vm2, %v2172_v62  ;;  %v2173_v0 = vpack.c.bf16 %v1183_v39, %v1183_v39 }
 0x14b   : > { %1545 = vst.msk [vmem:[%s2819_s21 + $0x78] sm:$0xf] %vm1354_vm2, %v2142_v60  ;;  %v2143_v63 = vpack.c.bf16 %v1019_v7, %v1019_v7  ;;  %1706 = vst.msk [vmem:[%s2810_s14 + $0x7c] sm:$0xf] %vm1354_vm2, %v2175_v50 }
 0x14c   : > { %1543 = vst.msk [vmem:[%s2819_s21 + $0x70] sm:$0xf] %vm1354_vm2, %v2140_v45  ;;  %v2141_v1 = vpack.c.bf16 %v1011_v61, %v1011_v61  ;;  %1704 = vst.msk [vmem:[%s2810_s14 + $0x74] sm:$0xf] %vm1354_vm2, %v2173_v0 }
 0x14d   : > { %1546 = vst.msk [vmem:[%s2819_s21 + $0x7c] sm:$0xf] %vm1354_vm2, %v2143_v63 }
 0x14e   : > { %1544 = vst.msk [vmem:[%s2819_s21 + $0x74] sm:$0xf] %vm1354_vm2, %v2141_v1 }
 0x14f PF: > { %s22_s19 = sadd.s32 1, %s2381_s19   ;;  %s3031_s17 = smov %s2377_s18 }
 0x150   : > { %p19_p5 = scmp.ge.s32.totalorder %s22_s19, 4   ;;  %s3032_s18 = smov %s3034_s20 }
 0x152   :  { %21 = sbr.rel (!%p19_p5) target bundleno = 2 (0x2), region = 116 }

// kernel: attn_block_2d.5
= control target key start
LH: loop header
LB: loop body
LE: loop exit
PB: predicated region body
PF: predicated region fallthrough
CT: control target
= control target key end

     0   :  { %s2227_s21 = smov 0   ;;  %s2229_s22 = smov 0   ;;  %s2806_s0 = inlined_call_operand.vmem [shape: bf16[2,256,4], index: 0, kind: input, shape index: {}]   ;;  %s2807_s1 = inlined_call_operand.vmem [shape: bf16[2,256,4], index: 1, kind: input, shape index: {}]   ;;  %s2808_s2 = inlined_call_operand.vmem [shape: bf16[2,256,4], index: 2, kind: input, shape index: {}]   ;;  %s2809_s3 = inlined_call_operand.vmem [shape: f32[2,4,256], index: 3, kind: input, shape index: {}]   ;;  %s2810_s4 = inlined_call_operand.vmem [shape: bf16[4,4], index: 4, kind: input, shape index: {}]   ;;  %s2811_s5 = inlined_call_operand.vmem [shape: f32[4,1], index: 5, kind: input, shape index: {}]   ;;  %s2812_s6 = inlined_call_operand.vmem [shape: f32[2,4,256], index: 6, kind: output, shape index: {}]  }
   0x1   :  { %s2231_s23 = smov 0   ;;  %s2233_s24 = smov 0  }
   0x2   :  { %s2235_s25 = smov 0   ;;  %s2237_s26 = smov 0  }
   0x3   :  { %s2239_s27 = smov 0  }
   0x4 LB: > { %s28_s28 = sadd.s32 1, %s2172_s24  ;;  %s31_s29 = sadd.s32 1, %s2176_s25  ;;  %s2184_s27 = sphi %s2239_s27, %s16_s27   ;;  %s2180_s26 = sphi %s2237_s26, %s2824_s26   ;;  %s2176_s25 = sphi %s2235_s25, %s2823_s25   ;;  %s2172_s24 = sphi %s2233_s24, %s2822_s24   ;;  %s2168_s23 = sphi %s2231_s23, %s2821_s23   ;;  %s2164_s22 = sphi %s2229_s22, %s2820_s22   ;;  %s2160_s21 = sphi %s2227_s21, %s2819_s21  }
   0x5   : > { %p29_p0 = scmp.ge.s32.totalorder %s28_s28, 2  ;;  %p1760_p1 = scmp.ge.s32.totalorder %s2184_s27, 1 }
   0x6   : > { %p289_p2 = scmp.lt.s32.totalorder %s2184_s27, 9  ;;  %s35_s30 = sadd.s32 1, %s2180_s26 }
   0x7   : > { %s2826_s28 = smov (%p29_p0, %s28_s28), 0  ;;  %s2828_s29 = smov (!%p29_p0, %s31_s29), %s2176_s25 }
   0x8   : > { %2813 = sst [smem:[#allocation5_spill]] %s2826_s28  ;;  %p290_p3 = pnand %p1760_p1, %p289_p2 }
   0x9   : > { %p33_p4 = scmp.ge.s32.totalorder %s2828_s29, 2  ;;  %s1761_s7 = sshll.u32 (!%p290_p3), %s2164_s22, 4 }
   0xa   : > { %293 = sbr.rel (%p290_p3) target bundleno = 1259 (0x4eb), region = 44  ;;  %p353_p6 = scmp.lt.s32.totalorder (!%p290_p3), %s2168_s23, 1 }
   0xb   : > { %s2830_s29 = smov (%p33_p4, %s2828_s29), 0  ;;  %s2832_s30 = smov (!%p33_p4, %s35_s30), %s2180_s26 }
   0xc   : > { %2814 = sst [smem:[#allocation6_spill]] %s2830_s29  ;;  %p37_p5 = scmp.ge.s32.totalorder %s2832_s30, 2 }
   0xd   : > { %p355_p7 = scmp.lt.s32.totalorder (!%p290_p3), %s1761_s7, 31  ;;  %s1764_s8 = sshll.u32 (!%p290_p3), %s2160_s21, 4 }
   0xe   : > { %s2834_s30 = smov (%p37_p5, %s2832_s30), 0  ;;  %p365_p8 = scmp.lt.s32.totalorder (!%p290_p3), %s1764_s8, 31 }
   0xf   : > { %2815 = sst [smem:[#allocation7_spill]] %s2834_s30  ;;  %p384_p9 = scmp.lt.s32.totalorder (!%p290_p3), %s2164_s22, 1 }
  0x10   : > { %p1774_p10 = scmp.ne.s32.totalorder (!%p290_p3), %s2160_s21, 0 }
  0x11   : > { %s2836_s23 = smov (!%p353_p6, %s2168_s23), 1  ;;  %s2838_s7 = smov (!%p355_p7, %s1761_s7), 31 }
  0x12   : > { %s1762_s9 = sshll.u32 %s2836_s23, 5  ;;  %s1770_s15 = sshll.u32 %s2836_s23, 1  ;;  %vm403_vm0 = vcmask (!%p1774_p10), 7168   ;;  %vm436_vm1 = vcmask (!%p1774_p10), 31744   ;;  %v2186_v0 = vmov (!%p1774_p10), -inf   ;;  %v2187_v1 = vmov (!%p1774_p10), 0.0  }
  0x13   : > { %s358_s10 = sadd.s32 %s1762_s9, %s2838_s7  ;;  %s2840_s8 = smov (!%p365_p8, %s1764_s8), 31  ;;  %404 = vst.msk [vmem:[#allocation2] sm:$0xff] (!%p1774_p10), %vm403_vm0, %v2186_v0  ;;  %405 = vst.msk [vmem:[#allocation2 + $0x8] sm:$0xff] (!%p1774_p10), %vm403_vm0, %v2186_v0 }
  0x14   : > { %s1763_s11 = sshll.u32 %s358_s10, 2  ;;  %s2842_s22 = smov (!%p384_p9, %s2164_s22), 1  ;;  %406 = vst.msk [vmem:[#allocation2 + $0x10] sm:$0xff] (!%p1774_p10), %vm403_vm0, %v2186_v0  ;;  %407 = vst.msk [vmem:[#allocation2 + $0x18] sm:$0xff] (!%p1774_p10), %vm403_vm0, %v2186_v0 }
  0x15   : > { %s2279_s14 = scalar_lea.vmem %s2806_s0, %s1763_s11  ;;  %s368_s16 = sadd.s32 %s1762_s9, %s2840_s8  ;;  %408 = vst.msk [vmem:[#allocation2 + $0x20] sm:$0xff] (!%p1774_p10), %vm403_vm0, %v2186_v0  ;;  %409 = vst.msk [vmem:[#allocation2 + $0x28] sm:$0xff] (!%p1774_p10), %vm403_vm0, %v2186_v0 }
  0x16   : > { %s1766_s17 = sshll.u32 %s368_s16, 2  ;;  %s387_s18 = sadd.s32 %s1770_s15, %s2842_s22  ;;  %410 = vst.msk [vmem:[#allocation2 + $0x30] sm:$0xff] (!%p1774_p10), %vm403_vm0, %v2186_v0  ;;  %411 = vst.msk [vmem:[#allocation2 + $0x38] sm:$0xff] (!%p1774_p10), %vm403_vm0, %v2186_v0 }
  0x17   : > { %s2285_s30 = scalar_lea.vmem %s2807_s1, %s1766_s17  ;;  %s2290_s10 = scalar_lea.vmem %s2808_s2, %s1766_s17  ;;  %412 = vst.msk [vmem:[#allocation2 + $0x40] sm:$0xff] (!%p1774_p10), %vm403_vm0, %v2186_v0  ;;  %413 = vst.msk [vmem:[#allocation2 + $0x48] sm:$0xff] (!%p1774_p10), %vm403_vm0, %v2186_v0 }
  0x18   : > { %s1771_s28 = sshll.u32 %s387_s18, 2  ;;  %402 = sbr.rel (%p1774_p10) target bundleno = 43 (0x2b), region = 48  ;;  %414 = vst.msk [vmem:[#allocation2 + $0x50] sm:$0xff] (!%p1774_p10), %vm403_vm0, %v2186_v0  ;;  %415 = vst.msk [vmem:[#allocation2 + $0x58] sm:$0xff] (!%p1774_p10), %vm403_vm0, %v2186_v0 }
  0x19   : > { %s2295_s23 = scalar_lea.vmem %s2809_s3, %s1771_s28  ;;  %s2300_s22 = scalar_lea.vmem %s2812_s6, %s1771_s28  ;;  %416 = vst.msk [vmem:[#allocation2 + $0x60] sm:$0xff] (!%p1774_p10), %vm403_vm0, %v2186_v0  ;;  %417 = vst.msk [vmem:[#allocation2 + $0x68] sm:$0xff] (!%p1774_p10), %vm403_vm0, %v2186_v0 }
  0x1a   : > { %418 = vst.msk [vmem:[#allocation2 + $0x70] sm:$0xff] (!%p1774_p10), %vm403_vm0, %v2186_v0  ;;  %419 = vst.msk [vmem:[#allocation2 + $0x78] sm:$0xff] (!%p1774_p10), %vm403_vm0, %v2186_v0 }
  0x1b   : > { %420 = vst.msk [vmem:[#allocation3] sm:$0xff] (!%p1774_p10), %vm403_vm0, %v2187_v1  ;;  %421 = vst.msk [vmem:[#allocation3 + $0x8] sm:$0xff] (!%p1774_p10), %vm403_vm0, %v2187_v1 }
  0x1c   : > { %422 = vst.msk [vmem:[#allocation3 + $0x10] sm:$0xff] (!%p1774_p10), %vm403_vm0, %v2187_v1  ;;  %423 = vst.msk [vmem:[#allocation3 + $0x18] sm:$0xff] (!%p1774_p10), %vm403_vm0, %v2187_v1 }
  0x1d   : > { %424 = vst.msk [vmem:[#allocation3 + $0x20] sm:$0xff] (!%p1774_p10), %vm403_vm0, %v2187_v1  ;;  %425 = vst.msk [vmem:[#allocation3 + $0x28] sm:$0xff] (!%p1774_p10), %vm403_vm0, %v2187_v1 }
  0x1e   : > { %426 = vst.msk [vmem:[#allocation3 + $0x30] sm:$0xff] (!%p1774_p10), %vm403_vm0, %v2187_v1  ;;  %427 = vst.msk [vmem:[#allocation3 + $0x38] sm:$0xff] (!%p1774_p10), %vm403_vm0, %v2187_v1 }
  0x1f   : > { %428 = vst.msk [vmem:[#allocation3 + $0x40] sm:$0xff] %vm403_vm0, %v2187_v1  ;;  %429 = vst.msk [vmem:[#allocation3 + $0x48] sm:$0xff] %vm403_vm0, %v2187_v1 }
  0x20   : > { %430 = vst.msk [vmem:[#allocation3 + $0x50] sm:$0xff] %vm403_vm0, %v2187_v1  ;;  %431 = vst.msk [vmem:[#allocation3 + $0x58] sm:$0xff] %vm403_vm0, %v2187_v1 }
  0x21   : > { %432 = vst.msk [vmem:[#allocation3 + $0x60] sm:$0xff] %vm403_vm0, %v2187_v1  ;;  %433 = vst.msk [vmem:[#allocation3 + $0x68] sm:$0xff] %vm403_vm0, %v2187_v1 }
  0x22   : > { %434 = vst.msk [vmem:[#allocation3 + $0x70] sm:$0xff] %vm403_vm0, %v2187_v1  ;;  %435 = vst.msk [vmem:[#allocation3 + $0x78] sm:$0xff] %vm403_vm0, %v2187_v1 }
  0x23   : > { %437 = vst.msk [vmem:[#allocation4] sm:$0xff] %vm436_vm1, %v2187_v1  ;;  %438 = vst.msk [vmem:[#allocation4 + $0x8] sm:$0xff] %vm436_vm1, %v2187_v1 }
  0x24   : > { %439 = vst.msk [vmem:[#allocation4 + $0x10] sm:$0xff] %vm436_vm1, %v2187_v1  ;;  %440 = vst.msk [vmem:[#allocation4 + $0x18] sm:$0xff] %vm436_vm1, %v2187_v1 }
  0x25   : > { %441 = vst.msk [vmem:[#allocation4 + $0x20] sm:$0xff] %vm436_vm1, %v2187_v1  ;;  %442 = vst.msk [vmem:[#allocation4 + $0x28] sm:$0xff] %vm436_vm1, %v2187_v1 }
  0x26   : > { %443 = vst.msk [vmem:[#allocation4 + $0x30] sm:$0xff] %vm436_vm1, %v2187_v1  ;;  %444 = vst.msk [vmem:[#allocation4 + $0x38] sm:$0xff] %vm436_vm1, %v2187_v1 }
  0x27   : > { %445 = vst.msk [vmem:[#allocation4 + $0x40] sm:$0xff] %vm436_vm1, %v2187_v1  ;;  %446 = vst.msk [vmem:[#allocation4 + $0x48] sm:$0xff] %vm436_vm1, %v2187_v1 }
  0x28   : > { %447 = vst.msk [vmem:[#allocation4 + $0x50] sm:$0xff] %vm436_vm1, %v2187_v1  ;;  %448 = vst.msk [vmem:[#allocation4 + $0x58] sm:$0xff] %vm436_vm1, %v2187_v1 }
  0x29   : > { %449 = vst.msk [vmem:[#allocation4 + $0x60] sm:$0xff] %vm436_vm1, %v2187_v1  ;;  %450 = vst.msk [vmem:[#allocation4 + $0x68] sm:$0xff] %vm436_vm1, %v2187_v1 }
  0x2a   : > { %451 = vst.msk [vmem:[#allocation4 + $0x70] sm:$0xff] %vm436_vm1, %v2187_v1  ;;  %452 = vst.msk [vmem:[#allocation4 + $0x78] sm:$0xff] %vm436_vm1, %v2187_v1 }
  0x2b PF: > { %v2008_v2 = vld [vmem:[%s2285_s30] sm:$0xff]   ;;  %vm565_vm2 = vcmask 31744   ;;  %v2009_v3 = vld [vmem:[%s2285_s30 + $0x8] sm:$0xff]   ;;  %v2010_v5 = vld [vmem:[%s2285_s30 + $0x10] sm:$0xff]   ;;  %v2188_v35 = vmov 0   ;;  %vm1031_vm3 = vcmask 7168  }
  0x2c   : > { %1936 = vmatprep.subr.msk.bf16.mxu0 %vm565_vm2, %v2008_v2  ;;  %v591_v4 = vsel %vm565_vm2, %v2008_v2, 0  ;;  %v594_v6 = vsel %vm565_vm2, %v2009_v3, 0  ;;  %v2016_v7 = vld [vmem:[%s2279_s14] sm:$0xff]   ;;  %v597_v8 = vsel %vm565_vm2, %v2010_v5, 0  ;;  %v2011_v9 = vld [vmem:[%s2285_s30 + $0x18] sm:$0xff]   ;;  %v2013_v13 = vld [vmem:[%s2285_s30 + $0x28] sm:$0xff]   ;;  %2007 = vset.pattern.permute.xlu1 %v2188_v35 }
  0x2d   : > { %1853 = vmatpush3.bf16.xpose.msra.mxu0 %v591_v4  ;;  %1868 = vmatprep.mubr.msk.bf16.mxu0 %vm565_vm2, %v2016_v7  ;;  %v600_v10 = vsel %vm565_vm2, %v2011_v9, 0  ;;  %v2012_v11 = vld [vmem:[%s2285_s30 + $0x20] sm:$0xff]   ;;  %v606_v14 = vsel %vm565_vm2, %v2013_v13, 0  ;;  %v2014_v15 = vld [vmem:[%s2285_s30 + $0x30] sm:$0xff]   ;;  %v2015_v17 = vld [vmem:[%s2285_s30 + $0x38] sm:$0xff]   ;;  %p1807_p11 = scmp.ne.s32.totalorder %s2160_s21, 1 }
  0x2e   : > { %1937 = vmatprep.subr.msk.bf16.mxu0 %vm565_vm2, %v2009_v3  ;;  %v603_v12 = vsel %vm565_vm2, %v2012_v11, 0  ;;  %v609_v16 = vsel %vm565_vm2, %v2014_v15, 0  ;;  %v612_v18 = vsel %vm565_vm2, %v2015_v17, 0  ;;  %v2017_v19 = vld [vmem:[%s2279_s14 + $0x8] sm:$0xff]   ;;  %v2018_v20 = vld [vmem:[%s2279_s14 + $0x10] sm:$0xff]   ;;  %v2019_v21 = vld [vmem:[%s2279_s14 + $0x18] sm:$0xff]   ;;  %2006 = vset.pattern.permute.xlu0 %v2188_v35 }
  0x2f   : > { %v2020_v22 = vld [vmem:[%s2279_s14 + $0x20] sm:$0xff]   ;;  %v2021_v23 = vld [vmem:[%s2279_s14 + $0x28] sm:$0xff]   ;;  %v2022_v24 = vld [vmem:[%s2279_s14 + $0x30] sm:$0xff]   ;;  %vm2191_vm4 = vmmov (!%p1807_p11), 0  }
  0x30   : > { %v2023_v25 = vld [vmem:[%s2279_s14 + $0x38] sm:$0xff]   ;;  %v2024_v43 = vld [vmem:[%s2290_s10] sm:$0xff]   ;;  %v2025_v44 = vld [vmem:[%s2290_s10 + $0x8] sm:$0xff]  }
  0x31   : > { %1884 = vmatprep.subr.bf16.mxu1 %v2024_v43  ;;  %v2441_v45 = vld [vmem:[#allocation2 + $0x10] sm:$0xff]  ;;  %v2443_v46 = vld [vmem:[#allocation2] sm:$0xff]  ;;  %v2451_v51 = vld [vmem:[#allocation2 + $0x18] sm:$0xff] }
  0x32   : > { %1885 = vmatpush3.bf16.msra.mxu1 %v2024_v43  ;;  %v2456_v52 = vld [vmem:[#allocation2 + $0x8] sm:$0xff]  ;;  %v2026_v53 = vld [vmem:[%s2290_s10 + $0x10] sm:$0xff]   ;;  %v2471_v58 = vld [vmem:[#allocation2 + $0x20] sm:$0xff] }
  0x33   : > { %1886 = vmatprep.subr.bf16.mxu1 %v2025_v44  ;;  %v2027_v59 = vld [vmem:[%s2290_s10 + $0x18] sm:$0xff]   ;;  %v2485_v1 = vld [vmem:[#allocation2 + $0x30] sm:$0xff]  ;;  %v2028_v2 = vld [vmem:[%s2290_s10 + $0x20] sm:$0xff]  }
  0x34   : > { %v2476_v60 = vld [vmem:[#allocation2 + $0x38] sm:$0xff]  ;;  %v2490_v3 = vld [vmem:[#allocation2 + $0x28] sm:$0xff] }
  0x35   : > { %1855 = vmatpush3.bf16.xpose.msra.mxu0 %v594_v6 }
  0x36   : > { %1938 = vmatprep.subr.msk.bf16.mxu0 %vm565_vm2, %v2010_v5  ;;  %1887 = vmatpush3.bf16.msra.mxu1 %v2025_v44 }
  0x37   : > { %1888 = vmatprep.subr.bf16.mxu1 %v2026_v53 }
  0x3a   : > { %1889 = vmatpush3.bf16.msra.mxu1 %v2026_v53  ;;  %v724_v53 = vld [vmem:[#allocation2 + $0x68] sm:$0xff] }
  0x3b   : > { %1890 = vmatprep.subr.bf16.mxu1 %v2027_v59 }
  0x3d   : > { %1857 = vmatpush3.bf16.xpose.msra.mxu0 %v597_v8  ;;  %v2500_v8 = vld [vmem:[#allocation2 + $0x40] sm:$0xff] }
  0x3e   : > { %1939 = vmatprep.subr.msk.bf16.mxu0 %vm565_vm2, %v2011_v9  ;;  %1891 = vmatpush3.bf16.msra.mxu1 %v2027_v59  ;;  %v2029_v9 = vld [vmem:[%s2290_s10 + $0x28] sm:$0xff]  }
  0x3f   : > { %1892 = vmatprep.subr.bf16.mxu1 %v2028_v2 }
  0x42   : > { %1893 = vmatpush3.bf16.msra.mxu1 %v2028_v2 }
  0x43   : > { %1894 = vmatprep.subr.bf16.mxu1 %v2029_v9 }
  0x45   : > { %1859 = vmatpush3.bf16.xpose.msra.mxu0 %v600_v10  ;;  %v2506_v10 = vld [vmem:[#allocation2 + $0x58] sm:$0xff] }
  0x46   : > { %1940 = vmatprep.subr.msk.bf16.mxu0 %vm565_vm2, %v2012_v11  ;;  %1895 = vmatpush3.bf16.msra.mxu1 %v2029_v9 }
  0x4d   : > { %1861 = vmatpush3.bf16.xpose.msra.mxu0 %v603_v12 }
  0x4e   : > { %1941 = vmatprep.subr.msk.bf16.mxu0 %vm565_vm2, %v2013_v13 }
  0x55   : > { %1863 = vmatpush3.bf16.xpose.msra.mxu0 %v606_v14 }
  0x56   : > { %1942 = vmatprep.subr.msk.bf16.mxu0 %vm565_vm2, %v2014_v15  ;;  %v2516_v15 = vld [vmem:[#allocation2 + $0x50] sm:$0xff] }
  0x5d   : > { %1865 = vmatpush3.bf16.xpose.msra.mxu0 %v609_v16  ;;  %v2030_v16 = vld [vmem:[%s2290_s10 + $0x30] sm:$0xff]  }
  0x5e   : > { %1943 = vmatprep.subr.msk.bf16.mxu0 %vm565_vm2, %v2015_v17  ;;  %v2522_v17 = vld [vmem:[#allocation2 + $0x48] sm:$0xff]  ;;  %1896 = vmatprep.subr.bf16.mxu1 %v2030_v16 }
  0x5f   : > { %1897 = vmatpush3.bf16.msra.mxu1 %v2030_v16 }
  0x65   : > { %1867 = vmatpush3.bf16.xpose.msra.mxu0 %v612_v18 }
  0x6c   : > { %1869 = vmatmul.mubr.msk.bf16.vlgmr.msra.gmra.mrb[0].mxu0 %vm565_vm2, %v2017_v19 }
  0x6d   : > { %1872 = vmatprep.mubr.msk.bf16.mxu0 %vm565_vm2, %v2018_v20 }
  0x74   : > { %1873 = vmatmul.mubr.msk.bf16.gmra.mrb[4].mxu0 %vm565_vm2, %v2019_v21 }
  0x75   : > { %1876 = vmatprep.mubr.msk.bf16.mxu0 %vm565_vm2, %v2020_v22 }
  0x7c   : > { %1877 = vmatmul.mubr.msk.bf16.gmra.mrb[8].mxu0 %vm565_vm2, %v2021_v23  ;;  %v2534_v23 = vld [vmem:[#allocation2 + $0x60] sm:$0xff] }
  0x7d   : > { %1880 = vmatprep.mubr.msk.bf16.mxu0 %vm565_vm2, %v2022_v24  ;;  %v2031_v24 = vld [vmem:[%s2290_s10 + $0x38] sm:$0xff]  }
  0x7e   : > { %1898 = vmatprep.subr.bf16.mxu1 %v2031_v24 }
  0x7f   : > { %1899 = vmatpush3.bf16.msra.mxu1 %v2031_v24 }
  0x84   : > { %1881 = vmatmul.mubr.msk.bf16.gmra.mrb[12].mxu0 %vm565_vm2, %v2023_v25  ;;  %v2540_v25 = vld [vmem:[#allocation2 + $0x78] sm:$0xff] }
 0x13f   : > { %v2391_v26 = vpop.f32.mrb[0].mxu0 }
 0x140   : > { %731 = vmax.xlane.f32.xlu1 %v2391_v26  ;;  %v2394_v27 = vpop.f32.mrb[1].mxu0 }
 0x141   : > { %727 = vmax.xlane.f32.xlu0 %v2394_v27  ;;  %v2397_v28 = vpop.f32.mrb[2].mxu0 }
 0x142   : > { %v2399_v29 = vpop.f32.mrb[3].mxu0 }
 0x144   : > { %733 = vmax.xlane.f32.xlu1 %v2397_v28 }
 0x145   : > { %729 = vmax.xlane.f32.xlu0 %v2399_v29 }
 0x147   : > { %v2403_v30 = vpop.f32.mrb[4].mxu0 }
 0x148   : > { %v2405_v31 = vpop.f32.mrb[5].mxu0 }
 0x149   : > { %735 = vmax.xlane.f32.xlu0 %v2405_v31  ;;  %v2408_v32 = vpop.f32.mrb[6].mxu0 }
 0x14a   : > { %741 = vmax.xlane.f32.xlu1 %v2408_v32  ;;  %v2411_v33 = vpop.f32.mrb[7].mxu0 }
 0x14d   : > { %739 = vmax.xlane.f32.xlu0 %v2403_v30 }
 0x14e   : > { %737 = vmax.xlane.f32.xlu1 %v2411_v33 }
 0x14f   : > { %v2415_v34 = vpop.f32.mrb[8].mxu0 }
 0x150   : > { %v2417_v36 = vpop.f32.mrb[9].mxu0 }
 0x151   : > { %v2419_v37 = vpop.f32.mrb[10].mxu0  ;;  %743 = vmax.xlane.f32.xlu0 %v2417_v36 }
 0x152   : > { %749 = vmax.xlane.f32.xlu1 %v2419_v37  ;;  %v2423_v38 = vpop.f32.mrb[11].mxu0 }
 0x155   : > { %747 = vmax.xlane.f32.xlu0 %v2415_v34 }
 0x156   : > { %745 = vmax.xlane.f32.xlu1 %v2423_v38 }
 0x157   : > { %v2427_v39 = vpop.f32.mrb[12].mxu0 }
 0x158   : > { %v2429_v40 = vpop.f32.mrb[13].mxu0 }
 0x159   : > { %v2431_v41 = vpop.f32.mrb[14].mxu0  ;;  %751 = vmax.xlane.f32.xlu0 %v2429_v40 }
 0x15a   : > { %757 = vmax.xlane.f32.xlu1 %v2431_v41  ;;  %v2435_v42 = vpop.f32.mrb[15].mxu0 }
 0x15d   : > { %755 = vmax.xlane.f32.xlu0 %v2427_v39 }
 0x15e   : > { %753 = vmax.xlane.f32.xlu1 %v2435_v42 }
 0x1cd   : > { %v732_v47 = vpop.xlane.xlu1 %731 }
 0x1ce   : > { %v2446_v48 = vmax.f32 %v2441_v45, %v732_v47  ;;  %v728_v49 = vpop.xlane.xlu0 %727 }
 0x1cf   : > { %v2449_v50 = vmax.f32 %v2443_v46, %v728_v49 }
 0x1d0   : > { %1363 = vst.msk [vmem:[#allocation2 + $0x10] sm:$0xff] %vm1031_vm3, %v2446_v48  ;;  %835 = vperm.xlu1 %2007, %v2446_v48  }
 0x1d1   : > { %1361 = vst.msk [vmem:[#allocation2] sm:$0xff] %vm1031_vm3, %v2449_v50  ;;  %v734_v54 = vpop.xlane.xlu1 %733  ;;  %825 = vperm.xlu0 %2006, %v2449_v50   ;;  %v775_v19 = vsub.f32 %v2443_v46, %v2449_v50  ;;  %v2553_v50 = vld [vmem:[#allocation2 + $0x70] sm:$0xff] }
 0x1d2   : > { %v2463_v55 = vmax.f32 %v2451_v51, %v734_v54  ;;  %v730_v56 = vpop.xlane.xlu0 %729 }
 0x1d3   : > { %v2466_v57 = vmax.f32 %v2456_v52, %v730_v56  ;;  %v791_v43 = vmul.f32 1.442695, %v775_v19 }
 0x1d4   : > { %1364 = vst.msk [vmem:[#allocation2 + $0x18] sm:$0xff] %vm1031_vm3, %v2463_v55  ;;  %840 = vperm.xlu1 %2007, %v2463_v55   ;;  %v778_v44 = vsub.f32 %v2451_v51, %v2463_v55 }
 0x1d5   : > { %1362 = vst.msk [vmem:[#allocation2 + $0x8] sm:$0xff] %vm1031_vm3, %v2466_v57  ;;  %v776_v54 = vsub.f32 %v2456_v52, %v2466_v57  ;;  %2032 = vpow2.f32 %v791_v43 }
 0x1d6   : > { %v736_v61 = vpop.xlane.xlu0 %735  ;;  %v797_v56 = vmul.f32 1.442695, %v778_v44 }
 0x1d7   : > { %v2479_v62 = vmax.f32 %v2471_v58, %v736_v61  ;;  %v742_v63 = vpop.xlane.xlu1 %741 }
 0x1d8   : > { %v2482_v0 = vmax.f32 %v2476_v60, %v742_v63  ;;  %830 = vperm.xlu1 %2007, %v2466_v57   ;;  %v777_v57 = vsub.f32 %v2441_v45, %v2446_v48  ;;  %2034 = vpow2.f32 %v797_v56 }
 0x1d9   : > { %1365 = vst.msk [vmem:[#allocation2 + $0x20] sm:$0xff] %vm1031_vm3, %v2479_v62  ;;  %v779_v9 = vsub.f32 %v2471_v58, %v2479_v62 }
 0x1da   : > { %1368 = vst.msk [vmem:[#allocation2 + $0x38] sm:$0xff] %vm1031_vm3, %v2482_v0  ;;  %v740_v4 = vpop.xlane.xlu0 %739 }
 0x1db   : > { %v2495_v5 = vmax.f32 %v2485_v1, %v740_v4  ;;  %v738_v6 = vpop.xlane.xlu1 %737  ;;  %v793_v4 = vmul.f32 1.442695, %v776_v54 }
 0x1dc   : > { %v2498_v7 = vmax.f32 %v2490_v3, %v738_v6 }
 0x1dd   : > { %1367 = vst.msk [vmem:[#allocation2 + $0x30] sm:$0xff] %vm1031_vm3, %v2495_v5  ;;  %855 = vperm.xlu1 %2007, %v2495_v5   ;;  %2036 = vpow2.f32 %v793_v4 }
 0x1de   : > { %1366 = vst.msk [vmem:[#allocation2 + $0x28] sm:$0xff] %vm1031_vm3, %v2498_v7  ;;  %v744_v11 = vpop.xlane.xlu0 %743  ;;  %v780_v59 = vsub.f32 %v2490_v3, %v2498_v7  ;;  %v782_v3 = vsub.f32 %v2476_v60, %v2482_v0  ;;  %v799_v60 = vmul.f32 1.442695, %v779_v9 }
 0x1df   : > { %v750_v12 = vpop.xlane.xlu1 %749  ;;  %v2511_v13 = vmax.f32 %v2500_v8, %v744_v11  ;;  %v2586_v48 = vpop.eup %2032 }
 0x1e0   : > { %v2514_v14 = vmax.f32 %v2506_v10, %v750_v12  ;;  %v801_v6 = vmul.f32 1.442695, %v780_v59  ;;  %v805_v11 = vmul.f32 1.442695, %v782_v3 }
 0x1e1   : > { %1369 = vst.msk [vmem:[#allocation2 + $0x40] sm:$0xff] %vm1031_vm3, %v2511_v13  ;;  %845 = vperm.xlu1 %2007, %v2479_v62  }
 0x1e2   : > { %1372 = vst.msk [vmem:[#allocation2 + $0x58] sm:$0xff] %vm1031_vm3, %v2514_v14  ;;  %v748_v18 = vpop.xlane.xlu0 %747  ;;  %2038 = vpow2.f32 %v801_v6  ;;  %v786_v45 = vsub.f32 %v2506_v10, %v2514_v14  ;;  %v2594_v12 = vpop.eup %2034 }
 0x1e3   : > { %v746_v20 = vpop.xlane.xlu1 %745  ;;  %v2529_v21 = vmax.f32 %v2516_v15, %v748_v18 }
 0x1e4   : > { %v2532_v22 = vmax.f32 %v2522_v17, %v746_v20  ;;  %v813_v58 = vmul.f32 1.442695, %v786_v45 }
 0x1e5   : > { %1371 = vst.msk [vmem:[#allocation2 + $0x50] sm:$0xff] %vm1031_vm3, %v2529_v21  ;;  %850 = vperm.xlu1 %2007, %v2498_v7   ;;  %v795_v7 = vmul.f32 1.442695, %v777_v57 }
 0x1e6   : > { %1370 = vst.msk [vmem:[#allocation2 + $0x48] sm:$0xff] %vm1031_vm3, %v2532_v22  ;;  %870 = vperm.xlu0 %2006, %v2532_v22   ;;  %v752_v35 = vpop.xlane.xlu0 %751  ;;  %v784_v62 = vsub.f32 %v2522_v17, %v2532_v22  ;;  %v783_v17 = vsub.f32 %v2500_v8, %v2511_v13 }
 0x1e7   : > { %v758_v46 = vpop.xlane.xlu1 %757  ;;  %v2548_v47 = vmax.f32 %v2534_v23, %v752_v35  ;;  %2040 = vpow2.f32 %v795_v7  ;;  %v2600_v16 = vpop.eup %2036 }
 0x1e8   : > { %v2551_v49 = vmax.f32 %v2540_v25, %v758_v46  ;;  %2042 = vpow2.f32 %v805_v11  ;;  %v807_v22 = vmul.f32 1.442695, %v783_v17 }
 0x1e9   : > { %1373 = vst.msk [vmem:[#allocation2 + $0x60] sm:$0xff] %vm1031_vm3, %v2548_v47  ;;  %860 = vperm.xlu1 %2007, %v2482_v0   ;;  %v781_v0 = vsub.f32 %v2485_v1, %v2495_v5  ;;  %2044 = vpow2.f32 %v799_v60  ;;  %v809_v1 = vmul.f32 1.442695, %v784_v62  ;;  %v787_v24 = vsub.f32 %v2534_v23, %v2548_v47 }
 0x1ea   : > { %v790_v51 = vsub.f32 %v2540_v25, %v2551_v49  ;;  %1376 = vst.msk [vmem:[#allocation2 + $0x78] sm:$0xff] %vm1031_vm3, %v2551_v49  ;;  %880 = vperm.xlu0 %2006, %v2514_v14   ;;  %v756_v55 = vpop.xlane.xlu0 %755  ;;  %v785_v14 = vsub.f32 %v2516_v15, %v2529_v21  ;;  %2046 = vpow2.f32 %v813_v58 }
 0x1eb   : > { %v754_v61 = vpop.xlane.xlu1 %753  ;;  %v2568_v63 = vmax.f32 %v2553_v50, %v756_v55  ;;  %v803_v10 = vmul.f32 1.442695, %v781_v0  ;;  %v815_v35 = vmul.f32 1.442695, %v787_v24 }
 0x1ec   : > { %v772_v2 = vmax.f32 %v724_v53, %v754_v61  ;;  %v2602_v18 = vpop.eup %2038  ;;  %v811_v19 = vmul.f32 1.442695, %v785_v14 }
 0x1ed   : > { %v789_v52 = vsub.f32 %v2553_v50, %v2568_v63  ;;  %1375 = vst.msk [vmem:[#allocation2 + $0x70] sm:$0xff] %vm1031_vm3, %v2568_v63  ;;  %865 = vperm.xlu1 %2007, %v2511_v13   ;;  %2048 = vpow2.f32 %v803_v10 }
 0x1ee   : > { %1374 = vst.msk [vmem:[#allocation2 + $0x68] sm:$0xff] %vm1031_vm3, %v772_v2  ;;  %890 = vperm.xlu0 %2006, %v772_v2   ;;  %v788_v5 = vsub.f32 %v724_v53, %v772_v2  ;;  %2050 = vpow2.f32 %v809_v1 }
 0x1ef   : > { %2052 = vpow2.f32 %v811_v19 }
 0x1f0   : > { %v817_v15 = vmul.f32 1.442695, %v788_v5 }
 0x1f1   : > { %875 = vperm.xlu1 %2007, %v2529_v21   ;;  %v2608_v20 = vpop.eup %2040 }
 0x1f2   : > { %900 = vperm.xlu0 %2006, %v2551_v49   ;;  %v2610_v21 = vpop.eup %2042  ;;  %2054 = vpow2.f32 %v817_v15 }
 0x1f3   : > { %v2616_v8 = vpop.eup %2044  ;;  %2056 = vpow2.f32 %v807_v22 }
 0x1f4   : > { %v2618_v13 = vpop.eup %2046  ;;  %2058 = vpow2.f32 %v815_v35 }
 0x1f5   : > { %885 = vperm.xlu1 %2007, %v2548_v47  }
 0x1f6   : > { %1066 = vperm.xlu0 %2006, %v2586_v48  }
 0x1f7   : > { %v2622_v43 = vpop.eup %2048 }
 0x1f8   : > { %v2624_v44 = vpop.eup %2050 }
 0x1f9   : > { %895 = vperm.xlu1 %2007, %v2568_v63   ;;  %v2628_v23 = vpop.eup %2052 }
 0x1fa   : > { %1081 = vperm.xlu0 %2006, %v2594_v12  }
 0x1fc   : > { %v2630_v46 = vpop.eup %2054 }
 0x1fd   : > { %1071 = vperm.xlu1 %2007, %v2600_v16   ;;  %v2634_v47 = vpop.eup %2056 }
 0x1fe   : > { %1091 = vperm.xlu0 %2006, %v2602_v18   ;;  %v2637_v53 = vpop.eup %2058 }
 0x201   : > { %1076 = vperm.xlu1 %2007, %v2608_v20  }
 0x202   : > { %1101 = vperm.xlu0 %2006, %v2610_v21  }
 0x205   : > { %1086 = vperm.xlu1 %2007, %v2616_v8  }
 0x206   : > { %1121 = vperm.xlu0 %2006, %v2618_v13  }
 0x209   : > { %1096 = vperm.xlu1 %2007, %v2622_v43  }
 0x20a   : > { %1111 = vperm.xlu0 %2006, %v2624_v44  }
 0x20d   : > { %1116 = vperm.xlu1 %2007, %v2628_v23  }
 0x20e   : > { %1131 = vperm.xlu0 %2006, %v2630_v46  }
 0x211   : > { %1106 = vperm.xlu1 %2007, %v2634_v47  }
 0x215   : > { %1126 = vperm.xlu1 %2007, %v2637_v53  }
 0x24f   : > { %v836_v54 = vpop.permute.xlu1 %835 }
 0x250   : > { %v905_v55 = vsub.f32 %v2391_v26, %v836_v54  ;;  %v826_v56 = vpop.permute.xlu0 %825 }
 0x251   : > { %v903_v59 = vsub.f32 %v2394_v27, %v826_v56 }
 0x252   : > { %v923_v61 = vmul.f32 1.442695, %v905_v55 }
 0x253   : > { %v919_v2 = vmul.f32 1.442695, %v903_v59  ;;  %v841_v57 = vpop.permute.xlu1 %840 }
 0x254   : > { %2060 = vpow2.f32 %v923_v61  ;;  %v906_v4 = vsub.f32 %v2397_v28, %v841_v57 }
 0x255   : > { %2062 = vpow2.f32 %v919_v2 }
 0x256   : > { %v925_v3 = vmul.f32 1.442695, %v906_v4 }
 0x257   : > { %v831_v6 = vpop.permute.xlu1 %830 }
 0x258   : > { %2064 = vpow2.f32 %v925_v3  ;;  %v904_v7 = vsub.f32 %v2399_v29, %v831_v6 }
 0x25a   : > { %v921_v9 = vmul.f32 1.442695, %v904_v7 }
 0x25c   : > { %2066 = vpow2.f32 %v921_v9  ;;  %v856_v11 = vpop.permute.xlu1 %855 }
 0x25d   : > { %v909_v26 = vsub.f32 %v2403_v30, %v856_v11 }
 0x25e   : > { %v2061_v45 = vpop.eup %2060 }
 0x25f   : > { %v2063_v60 = vpop.eup %2062  ;;  %v931_v27 = vmul.f32 1.442695, %v909_v26  ;;  %987 = vadd.xlane.f32.xlu0 %v2061_v45 }
 0x260   : > { %983 = vadd.xlane.f32.xlu1 %v2063_v60  ;;  %v846_v0 = vpop.permute.xlu1 %845 }
 0x261   : > { %2068 = vpow2.f32 %v931_v27  ;;  %v907_v28 = vsub.f32 %v2405_v31, %v846_v0 }
 0x262   : > { %v2065_v58 = vpop.eup %2064 }
 0x263   : > { %v927_v62 = vmul.f32 1.442695, %v907_v28  ;;  %v1161_v10 = vpack.c.bf16 %v2065_v58, %v2061_v45 }
 0x264   : > { %989 = vadd.xlane.f32.xlu1 %v2065_v58  ;;  %v851_v14 = vpop.permute.xlu1 %850 }
 0x265   : > { %2070 = vpow2.f32 %v927_v62  ;;  %v908_v29 = vsub.f32 %v2411_v33, %v851_v14  ;;  %v871_v1 = vpop.permute.xlu0 %870 }
 0x266   : > { %v2067_v5 = vpop.eup %2066  ;;  %v912_v19 = vsub.f32 %v2423_v38, %v871_v1 }
 0x267   : > { %v929_v30 = vmul.f32 1.442695, %v908_v29  ;;  %985 = vadd.xlane.f32.xlu0 %v2067_v5  ;;  %v1160_v17 = vpack.c.bf16 %v2067_v5, %v2063_v60 }
 0x268   : > { %v861_v15 = vpop.permute.xlu1 %860  ;;  %v937_v54 = vmul.f32 1.442695, %v912_v19  ;;  %v819_v19 = vmul.f32 1.442695, %v789_v52 }
 0x269   : > { %2072 = vpow2.f32 %v929_v30  ;;  %v910_v22 = vsub.f32 %v2408_v32, %v861_v15  ;;  %v881_v31 = vpop.permute.xlu0 %880  ;;  %1900 = vmatprep.mubr.bf16.mxu1 %v1160_v17  ;;  %v821_v15 = vmul.f32 1.442695, %v790_v51 }
 0x26a   : > { %1901 = vmatmul.mubr.bf16.vlgmr.msra.gmra.mrb[0].mxu1 %v1161_v10  ;;  %v914_v55 = vsub.f32 %v2419_v37, %v881_v31 }
 0x26b   : > { %v2069_v24 = vpop.eup %2068  ;;  %v933_v35 = vmul.f32 1.442695, %v910_v22 }
 0x26c   : > { %995 = vadd.xlane.f32.xlu0 %v2069_v24  ;;  %v866_v33 = vpop.permute.xlu1 %865  ;;  %v941_v2 = vmul.f32 1.442695, %v914_v55 }
 0x26d   : > { %2074 = vpow2.f32 %v933_v35  ;;  %v911_v56 = vsub.f32 %v2417_v36, %v866_v33  ;;  %v891_v59 = vpop.permute.xlu0 %890 }
 0x26e   : > { %2076 = vpow2.f32 %v937_v54  ;;  %v916_v32 = vsub.f32 %v2435_v42, %v891_v59 }
 0x26f   : > { %v2071_v61 = vpop.eup %2070  ;;  %v935_v38 = vmul.f32 1.442695, %v911_v56 }
 0x270   : > { %991 = vadd.xlane.f32.xlu0 %v2071_v61  ;;  %v876_v57 = vpop.permute.xlu1 %875  ;;  %v945_v7 = vmul.f32 1.442695, %v916_v32 }
 0x271   : > { %2078 = vpow2.f32 %v935_v38  ;;  %v913_v4 = vsub.f32 %v2415_v34, %v876_v57  ;;  %v901_v3 = vpop.permute.xlu0 %900 }
 0x272   : > { %2080 = vpow2.f32 %v941_v2  ;;  %v918_v9 = vsub.f32 %v2431_v41, %v901_v3  ;;  %v951_v2 = vld [vmem:[#allocation3] sm:$0xff] }
 0x273   : > { %v2073_v6 = vpop.eup %2072  ;;  %v939_v37 = vmul.f32 1.442695, %v913_v4  ;;  %v967_v4 = vmul.f32 %v2586_v48, %v951_v2  ;;  %v957_v48 = vld [vmem:[#allocation3 + $0x30] sm:$0xff] }
 0x274   : > { %v886_v36 = vpop.permute.xlu1 %885  ;;  %v1162_v11 = vpack.c.bf16 %v2073_v6, %v2071_v61  ;;  %v949_v60 = vmul.f32 1.442695, %v918_v9  ;;  %v953_v61 = vld [vmem:[#allocation3 + $0x10] sm:$0xff] }
 0x275   : > { %2082 = vpow2.f32 %v939_v37  ;;  %v915_v26 = vsub.f32 %v2429_v40, %v886_v36  ;;  %v969_v32 = vmul.f32 %v2608_v20, %v953_v61  ;;  %v954_v37 = vld [vmem:[#allocation3 + $0x18] sm:$0xff]  ;;  %v952_v36 = vld [vmem:[#allocation3 + $0x8] sm:$0xff] }
 0x276   : > { %1904 = vmatprep.mubr.bf16.mxu1 %v1162_v11  ;;  %2084 = vpow2.f32 %v945_v7  ;;  %v970_v9 = vmul.f32 %v2594_v12, %v954_v37 }
 0x277   : > { %v2075_v45 = vpop.eup %2074  ;;  %v943_v42 = vmul.f32 1.442695, %v915_v26 }
 0x278   : > { %997 = vadd.xlane.f32.xlu1 %v2075_v45  ;;  %v896_v27 = vpop.permute.xlu1 %895  ;;  %v1163_v34 = vpack.c.bf16 %v2075_v45, %v2069_v24  ;;  %v2077_v28 = vpop.eup %2076  ;;  %v968_v45 = vmul.f32 %v2600_v16, %v952_v36  ;;  %v958_v16 = vld [vmem:[#allocation3 + $0x38] sm:$0xff]  ;;  %v963_v36 = vld [vmem:[#allocation3 + $0x60] sm:$0xff] }
 0x279   : > { %2086 = vpow2.f32 %v943_v42  ;;  %v917_v0 = vsub.f32 %v2427_v39, %v896_v27  ;;  %v2668_v24 = vpop.permute.xlu0 %1066 }
 0x27a   : > { %1905 = vmatmul.mubr.bf16.gmra.mrb[4].mxu1 %v1163_v34  ;;  %2088 = vpow2.f32 %v949_v60  ;;  %v973_v60 = vmul.f32 %v2622_v43, %v957_v48  ;;  %v955_v34 = vld [vmem:[#allocation3 + $0x20] sm:$0xff] }
 0x27b   : > { %v2079_v58 = vpop.eup %2078  ;;  %v947_v41 = vmul.f32 1.442695, %v917_v0  ;;  %v971_v12 = vmul.f32 %v2616_v8, %v955_v34  ;;  %v1049_v34 = vld [vmem:[#allocation4 + $0x8] sm:$0xff] }
 0x27c   : > { %993 = vadd.xlane.f32.xlu1 %v2073_v6  ;;  %v1164_v62 = vpack.c.bf16 %v2077_v28, %v2079_v58  ;;  %v2081_v40 = vpop.eup %2080  ;;  %v2670_v35 = vpop.permute.xlu1 %1071 }
 0x27d   : > { %2090 = vpow2.f32 %v947_v41  ;;  %v2672_v50 = vpop.permute.xlu0 %1081  ;;  %v974_v41 = vmul.f32 %v2610_v21, %v958_v16  ;;  %v959_v21 = vld [vmem:[#allocation3 + $0x40] sm:$0xff]  ;;  %v1145_v16 = vmul.f32 %v2670_v35, %v1049_v34 }
 0x27e   : > { %1908 = vmatprep.mubr.bf16.mxu1 %v1164_v62  ;;  %2092 = vpow2.f32 %v819_v19  ;;  %v960_v19 = vld [vmem:[#allocation3 + $0x48] sm:$0xff] }
 0x27f   : > { %v2083_v10 = vpop.eup %2082  ;;  %2094 = vpow2.f32 %v821_v15  ;;  %v976_v2 = vmul.f32 %v2624_v44, %v960_v19 }
 0x280   : > { %1005 = vadd.xlane.f32.xlu1 %v2081_v40  ;;  %1003 = vadd.xlane.f32.xlu0 %v2083_v10  ;;  %v1165_v14 = vpack.c.bf16 %v2081_v40, %v2083_v10  ;;  %v2085_v29 = vpop.eup %2084  ;;  %v2674_v63 = vpop.permute.xlu1 %1076  ;;  %v956_v40 = vld [vmem:[#allocation3 + $0x28] sm:$0xff] }
 0x281   : > { %v2676_v52 = vpop.permute.xlu0 %1091  ;;  %v972_v43 = vmul.f32 %v2602_v18, %v956_v40  ;;  %v975_v18 = vmul.f32 %v2634_v47, %v959_v21  ;;  %v964_v47 = vld [vmem:[#allocation3 + $0x68] sm:$0xff] }
 0x282   : > { %1909 = vmatmul.mubr.bf16.gmra.mrb[8].mxu1 %v1165_v14 }
 0x283   : > { %v2087_v1 = vpop.eup %2086 }
 0x284   : > { %1001 = vadd.xlane.f32.xlu1 %v2077_v28  ;;  %999 = vadd.xlane.f32.xlu0 %v2079_v58  ;;  %v1166_v39 = vpack.c.bf16 %v2085_v29, %v2087_v1  ;;  %v2089_v5 = vpop.eup %2088  ;;  %v2678_v25 = vpop.permute.xlu1 %1086 }
 0x285   : > { %v2680_v49 = vpop.permute.xlu0 %1101 }
 0x286   : > { %1912 = vmatprep.mubr.bf16.mxu1 %v1166_v39 }
 0x287   : > { %v2091_v30 = vpop.eup %2090 }
 0x288   : > { %1013 = vadd.xlane.f32.xlu1 %v2089_v5  ;;  %1011 = vadd.xlane.f32.xlu0 %v2091_v30  ;;  %v1167_v17 = vpack.c.bf16 %v2089_v5, %v2091_v30  ;;  %v2662_v22 = vpop.eup %2092  ;;  %v2682_v51 = vpop.permute.xlu1 %1096 }
 0x289   : > { %v2665_v31 = vpop.eup %2094  ;;  %v2684_v54 = vpop.permute.xlu0 %1121 }
 0x28a   : > { %1913 = vmatmul.mubr.bf16.gmra.mrb[12].mxu1 %v1167_v17 }
 0x28c   : > { %1009 = vadd.xlane.f32.xlu1 %v2085_v29  ;;  %1007 = vadd.xlane.f32.xlu0 %v2087_v1  ;;  %v2686_v55 = vpop.permute.xlu1 %1116  ;;  %v961_v29 = vld [vmem:[#allocation3 + $0x50] sm:$0xff]  ;;  %v962_v1 = vld [vmem:[#allocation3 + $0x58] sm:$0xff] }
 0x28d   : > { %v2688_v33 = vpop.permute.xlu0 %1111  ;;  %v977_v8 = vmul.f32 %v2628_v23, %v961_v29  ;;  %v978_v5 = vmul.f32 %v2618_v13, %v962_v1  ;;  %v966_v23 = vld [vmem:[#allocation3 + $0x78] sm:$0xff] }
 0x28e   : > { %v982_v37 = vmul.f32 %v2665_v31, %v966_v23 }
 0x290   : > { %v2690_v56 = vpop.permute.xlu1 %1106 }
 0x291   : > { %v2692_v59 = vpop.permute.xlu0 %1131 }
 0x294   : > { %v2694_v38 = vpop.permute.xlu1 %1126 }
 0x29d   : > { %1136 = vperm.xlu1 %2007, %v2662_v22  }
 0x2a2   : > { %1141 = vperm.xlu0 %2006, %v2665_v31   ;;  %v1050_v31 = vld [vmem:[#allocation4 + $0x10] sm:$0xff] }
 0x2ec   : > { %v988_v57 = vpop.xlane.xlu0 %987 }
 0x2ed   : > { %v1017_v3 = vadd.f32 %v988_v57, %v969_v32  ;;  %v984_v6 = vpop.xlane.xlu1 %983 }
 0x2ee   : > { %v1015_v7 = vadd.f32 %v984_v6, %v967_v4  ;;  %v965_v4 = vld [vmem:[#allocation3 + $0x70] sm:$0xff] }
 0x2ef   : > { %1034 = vst.msk [vmem:[#allocation3 + $0x10] sm:$0xff] %vm1031_vm3, %v1017_v3  ;;  %v981_v6 = vmul.f32 %v2662_v22, %v965_v4 }
 0x2f0   : > { %1032 = vst.msk [vmem:[#allocation3] sm:$0xff] %vm1031_vm3, %v1015_v7 }
 0x2f1   : > { %v990_v11 = vpop.xlane.xlu1 %989 }
 0x2f2   : > { %v1018_v26 = vadd.f32 %v990_v11, %v970_v9 }
 0x2f4   : > { %1035 = vst.msk [vmem:[#allocation3 + $0x18] sm:$0xff] %vm1031_vm3, %v1018_v26  ;;  %v986_v20 = vpop.xlane.xlu0 %985  ;;  %v979_v26 = vmul.f32 %v2637_v53, %v963_v36 }
 0x2f5   : > { %v1016_v42 = vadd.f32 %v986_v20, %v968_v45  ;;  %v980_v45 = vmul.f32 %v2630_v46, %v964_v47  ;;  %v1060_v47 = vld [vmem:[#allocation4 + $0x60] sm:$0xff] }
 0x2f7   : > { %1033 = vst.msk [vmem:[#allocation3 + $0x8] sm:$0xff] %vm1031_vm3, %v1016_v42 }
 0x2f9   : > { %v996_v27 = vpop.xlane.xlu0 %995 }
 0x2fa   : > { %v1021_v0 = vadd.f32 %v996_v27, %v973_v60  ;;  %v1048_v60 = vld [vmem:[#allocation4] sm:$0xff]  ;;  %v1051_v27 = vld [vmem:[#allocation4 + $0x18] sm:$0xff] }
 0x2fb   : > { %v1147_v53 = vmul.f32 %v2672_v50, %v1051_v27  ;;  %v1055_v50 = vld [vmem:[#allocation4 + $0x38] sm:$0xff] }
 0x2fc   : > { %1038 = vst.msk [vmem:[#allocation3 + $0x30] sm:$0xff] %vm1031_vm3, %v1021_v0  ;;  %v1146_v0 = vmul.f32 %v2674_v63, %v1050_v31  ;;  %v1052_v63 = vld [vmem:[#allocation4 + $0x20] sm:$0xff] }
 0x2fd   : > { %v992_v28 = vpop.xlane.xlu0 %991  ;;  %v1148_v35 = vmul.f32 %v2678_v25, %v1052_v63  ;;  %v1059_v25 = vld [vmem:[#allocation4 + $0x58] sm:$0xff] }
 0x2fe   : > { %v1019_v58 = vadd.f32 %v992_v28, %v971_v12  ;;  %v1144_v12 = vmul.f32 %v2668_v24, %v1048_v60  ;;  %v1054_v24 = vld [vmem:[#allocation4 + $0x30] sm:$0xff] }
 0x2ff   : > { %v1150_v29 = vmul.f32 %v2682_v51, %v1054_v24  ;;  %v1056_v51 = vld [vmem:[#allocation4 + $0x40] sm:$0xff] }
 0x300   : > { %1036 = vst.msk [vmem:[#allocation3 + $0x20] sm:$0xff] %vm1031_vm3, %v1019_v58 }
 0x305   : > { %v998_v62 = vpop.xlane.xlu1 %997 }
 0x306   : > { %v1022_v10 = vadd.f32 %v998_v62, %v974_v41 }
 0x308   : > { %1039 = vst.msk [vmem:[#allocation3 + $0x38] sm:$0xff] %vm1031_vm3, %v1022_v10 }
 0x309   : > { %v994_v14 = vpop.xlane.xlu1 %993 }
 0x30a   : > { %v1020_v39 = vadd.f32 %v994_v14, %v972_v43  ;;  %v1053_v14 = vld [vmem:[#allocation4 + $0x28] sm:$0xff] }
 0x30c   : > { %1037 = vst.msk [vmem:[#allocation3 + $0x28] sm:$0xff] %vm1031_vm3, %v1020_v39  ;;  %v1151_v39 = vmul.f32 %v2680_v49, %v1055_v50  ;;  %v1057_v49 = vld [vmem:[#allocation4 + $0x48] sm:$0xff] }
 0x30d   : > { %v1004_v30 = vpop.xlane.xlu0 %1003  ;;  %v1006_v17 = vpop.xlane.xlu1 %1005 }
 0x30e   : > { %v1025_v15 = vadd.f32 %v1004_v30, %v977_v8  ;;  %v1026_v61 = vadd.f32 %v1006_v17, %v978_v5  ;;  %v1149_v30 = vmul.f32 %v2676_v52, %v1053_v14  ;;  %v1152_v52 = vmul.f32 %v2690_v56, %v1056_v51  ;;  %v1063_v56 = vld [vmem:[#allocation4 + $0x78] sm:$0xff] }
 0x310   : > { %1042 = vst.msk [vmem:[#allocation3 + $0x50] sm:$0xff] %vm1031_vm3, %v1025_v15  ;;  %1043 = vst.msk [vmem:[#allocation3 + $0x58] sm:$0xff] %vm1031_vm3, %v1026_v61  ;;  %v1058_v61 = vld [vmem:[#allocation4 + $0x50] sm:$0xff] }
 0x311   : > { %v1000_v32 = vpop.xlane.xlu0 %999  ;;  %v1002_v57 = vpop.xlane.xlu1 %1001 }
 0x312   : > { %v1023_v3 = vadd.f32 %v1000_v32, %v975_v18  ;;  %v1024_v13 = vadd.f32 %v1002_v57, %v976_v2  ;;  %v1154_v2 = vmul.f32 %v2686_v55, %v1058_v61  ;;  %v1155_v57 = vmul.f32 %v2684_v54, %v1059_v25 }
 0x314   : > { %1040 = vst.msk [vmem:[#allocation3 + $0x40] sm:$0xff] %vm1031_vm3, %v1023_v3  ;;  %1041 = vst.msk [vmem:[#allocation3 + $0x48] sm:$0xff] %vm1031_vm3, %v1024_v13  ;;  %v1153_v3 = vmul.f32 %v2688_v33, %v1057_v49 }
 0x315   : > { %v1012_v7 = vpop.xlane.xlu0 %1011  ;;  %v1014_v9 = vpop.xlane.xlu1 %1013 }
 0x316   : > { %v1029_v11 = vadd.f32 %v1012_v7, %v981_v6  ;;  %v1030_v44 = vadd.f32 %v1014_v9, %v982_v37  ;;  %v1062_v9 = vld [vmem:[#allocation4 + $0x70] sm:$0xff] }
 0x317   : > { %v1392_v63 = vld [vmem:[#allocation3 + $0x58] sm:$0xff] (!%p1807_p11)  ;;  %v1391_v14 = vld [vmem:[#allocation3 + $0x50] sm:$0xff] (!%p1807_p11) }
 0x318   : > { %1046 = vst.msk [vmem:[#allocation3 + $0x70] sm:$0xff] %vm1031_vm3, %v1029_v11  ;;  %1047 = vst.msk [vmem:[#allocation3 + $0x78] sm:$0xff] %vm1031_vm3, %v1030_v44  ;;  %v1061_v11 = vld [vmem:[#allocation4 + $0x68] sm:$0xff]  ;;  %v1156_v44 = vmul.f32 %v2694_v38, %v1060_v47  ;;  %v1383_v38 = vld [vmem:[#allocation3 + $0x10] sm:$0xff] (!%p1807_p11) }
 0x319   : > { %v1008_v20 = vpop.xlane.xlu0 %1007  ;;  %v1010_v42 = vpop.xlane.xlu1 %1009  ;;  %2098 = vrcp.f32 (!%p1807_p11), %v1383_v38 }
 0x31a   : > { %v1027_v48 = vadd.f32 %v1008_v20, %v979_v26  ;;  %v1028_v22 = vadd.f32 %v1010_v42, %v980_v45 }
 0x31c   : > { %1044 = vst.msk [vmem:[#allocation3 + $0x60] sm:$0xff] %vm1031_vm3, %v1027_v48  ;;  %1045 = vst.msk [vmem:[#allocation3 + $0x68] sm:$0xff] %vm1031_vm3, %v1028_v22  ;;  %v1157_v48 = vmul.f32 %v2692_v59, %v1061_v11  ;;  %v2189_v59 = vmov (!%p1807_p11), 0  }
 0x31d   : > { %v1137_v36 = vpop.permute.xlu1 %1136  ;;  %2097 = vset.pattern.permute.xlu1 (!%p1807_p11), %v2189_v59  ;;  %2096 = vset.pattern.permute.xlu0 (!%p1807_p11), %v2189_v59 }
 0x31e   : > { %v1158_v33 = vmul.f32 %v1137_v36, %v1062_v9 }
 0x321   : > { %v1142_v54 = vpop.permute.xlu0 %1141 }
 0x322   : > { %v1159_v45 = vmul.f32 %v1142_v54, %v1063_v56 }
 0x33d   : > { %v1902_v28 = vpop.f32.mrb[0].mxu1 }
 0x33e   : > { %v1331_v46 = vadd.f32 %v1902_v28, %v1146_v0  ;;  %v1266_v58 = vpop.f32.mrb[1].mxu1  ;;  %v1381_v0 = vld [vmem:[#allocation3] sm:$0xff] (!%p1807_p11)  ;;  %v1382_v28 = vld [vmem:[#allocation3 + $0x8] sm:$0xff] (!%p1807_p11) }
 0x33f   : > { %v1329_v41 = vadd.f32 %v1266_v58, %v1144_v12  ;;  %v1903_v62 = vpop.f32.mrb[2].mxu1  ;;  %v1384_v12 = vld [vmem:[#allocation3 + $0x18] sm:$0xff] (!%p1807_p11)  ;;  %2100 = vrcp.f32 (!%p1807_p11), %v1381_v0 }
 0x340   : > { %1347 = vst.msk [vmem:[#allocation4 + $0x10] sm:$0xff] %vm565_vm2, %v1331_v46  ;;  %v1332_v40 = vadd.f32 %v1903_v62, %v1147_v53  ;;  %v1269_v10 = vpop.f32.mrb[3].mxu1  ;;  %2102 = vrcp.f32 (!%p1807_p11), %v1384_v12  ;;  %v1386_v53 = vld [vmem:[#allocation3 + $0x28] sm:$0xff] (!%p1807_p11)  ;;  %v1385_v46 = vld [vmem:[#allocation3 + $0x20] sm:$0xff] (!%p1807_p11)  ;;  %v1388_v58 = vld [vmem:[#allocation3 + $0x38] sm:$0xff] (!%p1807_p11) }
 0x341   : > { %1345 = vst.msk [vmem:[#allocation4] sm:$0xff] %vm565_vm2, %v1329_v41  ;;  %v1330_v43 = vadd.f32 %v1269_v10, %v1145_v16  ;;  %2104 = vrcp.f32 (!%p1807_p11), %v1382_v28  ;;  %v1387_v16 = vld [vmem:[#allocation3 + $0x30] sm:$0xff] (!%p1807_p11)  ;;  %v2099_v41 = vpop.eup (!%p1807_p11), %2098 }
 0x342   : > { %1348 = vst.msk [vmem:[#allocation4 + $0x18] sm:$0xff] %vm565_vm2, %v1332_v40  ;;  %2106 = vrcp.f32 (!%p1807_p11), %v1386_v53  ;;  %1441 = vperm.xlu1 (!%p1807_p11), %2097, %v2099_v41   ;;  %v1390_v40 = vld [vmem:[#allocation3 + $0x48] sm:$0xff] (!%p1807_p11) }
 0x343   : > { %1346 = vst.msk [vmem:[#allocation4 + $0x8] sm:$0xff] %vm565_vm2, %v1330_v43  ;;  %2108 = vrcp.f32 (!%p1807_p11), %v1385_v46  ;;  %v1389_v43 = vld [vmem:[#allocation3 + $0x40] sm:$0xff] (!%p1807_p11) }
 0x344   : > { %2110 = vrcp.f32 (!%p1807_p11), %v1388_v58 }
 0x345   : > { %2112 = vrcp.f32 (!%p1807_p11), %v1387_v16 }
 0x346   : > { %2114 = vrcp.f32 (!%p1807_p11), %v1390_v40 }
 0x347   : > { %2116 = vrcp.f32 (!%p1807_p11), %v1389_v43 }
 0x348   : > { %2118 = vrcp.f32 (!%p1807_p11), %v1392_v63 }
 0x349   : > { %v2101_v62 = vpop.eup (!%p1807_p11), %2100  ;;  %2120 = vrcp.f32 (!%p1807_p11), %v1391_v14 }
 0x34a   : > { %v2103_v10 = vpop.eup (!%p1807_p11), %2102  ;;  %1431 = vperm.xlu0 (!%p1807_p11), %2096, %v2101_v62  }
 0x34b   : > { %v2105_v24 = vpop.eup (!%p1807_p11), %2104  ;;  %1446 = vperm.xlu1 (!%p1807_p11), %2097, %v2103_v10  }
 0x34c   : > { %v2107_v50 = vpop.eup (!%p1807_p11), %2106 }
 0x34d   : > { %v1906_v1 = vpop.f32.mrb[4].mxu1 }
 0x34e   : > { %v1335_v8 = vadd.f32 %v1906_v1, %v1150_v29  ;;  %v1282_v5 = vpop.f32.mrb[5].mxu1  ;;  %1436 = vperm.xlu0 (!%p1807_p11), %2096, %v2105_v24   ;;  %v2109_v29 = vpop.eup (!%p1807_p11), %2108 }
 0x34f   : > { %v1333_v17 = vadd.f32 %v1282_v5, %v1148_v35  ;;  %v1907_v21 = vpop.f32.mrb[6].mxu1  ;;  %1456 = vperm.xlu1 (!%p1807_p11), %2097, %v2107_v50   ;;  %v1394_v35 = vld [vmem:[#allocation3 + $0x68] sm:$0xff] (!%p1807_p11)  ;;  %v2111_v1 = vpop.eup (!%p1807_p11), %2110 }
 0x350   : > { %1351 = vst.msk [vmem:[#allocation4 + $0x30] sm:$0xff] %vm565_vm2, %v1335_v8  ;;  %v1336_v19 = vadd.f32 %v1907_v21, %v1151_v39  ;;  %v1285_v15 = vpop.f32.mrb[7].mxu1  ;;  %v1393_v39 = vld [vmem:[#allocation3 + $0x60] sm:$0xff] (!%p1807_p11)  ;;  %v2190_v8 = vmov (!%p1807_p11), 0.0   ;;  %v2113_v5 = vpop.eup (!%p1807_p11), %2112  ;;  %2122 = vrcp.f32 (!%p1807_p11), %v1394_v35  ;;  %v1395_v21 = vld [vmem:[#allocation3 + $0x70] sm:$0xff] (!%p1807_p11) }
 0x351   : > { %1349 = vst.msk [vmem:[#allocation4 + $0x20] sm:$0xff] %vm565_vm2, %v1333_v17  ;;  %v1334_v18 = vadd.f32 %v1285_v15, %v1149_v30  ;;  %1916 = vmatprep.subr.bf16.mxu0 (!%p1807_p11), %v2190_v8  ;;  %2124 = vrcp.f32 (!%p1807_p11), %v1393_v39  ;;  %v1396_v30 = vld [vmem:[#allocation3 + $0x78] sm:$0xff] (!%p1807_p11)  ;;  %v2115_v17 = vpop.eup (!%p1807_p11), %2114  ;;  %1932 = vmatprep.mubr.msk.bf16.mxu0 (!%p1807_p11), %vm2191_vm4, %v2190_v8 }
 0x352   : > { %1352 = vst.msk [vmem:[#allocation4 + $0x38] sm:$0xff] %vm565_vm2, %v1336_v19  ;;  %1451 = vperm.xlu0 (!%p1807_p11), %2096, %v2109_v29   ;;  %v2117_v19 = vpop.eup (!%p1807_p11), %2116  ;;  %2126 = vrcp.f32 (!%p1807_p11), %v1396_v30 }
 0x353   : > { %1350 = vst.msk [vmem:[#allocation4 + $0x28] sm:$0xff] %vm565_vm2, %v1334_v18  ;;  %1466 = vperm.xlu1 (!%p1807_p11), %2097, %v2111_v1   ;;  %2128 = vrcp.f32 (!%p1807_p11), %v1395_v21  ;;  %v2119_v15 = vpop.eup (!%p1807_p11), %2118 }
 0x354   : > { %v2121_v61 = vpop.eup (!%p1807_p11), %2120 }
 0x355   : > { %v1910_v32 = vpop.f32.mrb[8].mxu1 }
 0x356   : > { %v1339_v4 = vadd.f32 %v1910_v32, %v1154_v2  ;;  %v1298_v23 = vpop.f32.mrb[9].mxu1  ;;  %1461 = vperm.xlu0 (!%p1807_p11), %2096, %v2113_v5   ;;  %v1534_v2 = vld [vmem:[%s2811_s5] sm:$0xf] (!%p1807_p11) }
 0x357   : > { %v1337_v13 = vadd.f32 %v1298_v23, %v1152_v52  ;;  %v1911_v6 = vpop.f32.mrb[10].mxu1  ;;  %1476 = vperm.xlu1 (!%p1807_p11), %2097, %v2115_v17  }
 0x358   : > { %1355 = vst.msk [vmem:[#allocation4 + $0x50] sm:$0xff] %vm565_vm2, %v1339_v4  ;;  %v1340_v37 = vadd.f32 %v1911_v6, %v1155_v57  ;;  %v1301_v7 = vpop.f32.mrb[11].mxu1  ;;  %v1413_v57 = vld [vmem:[#allocation4] sm:$0xff] (!%p1807_p11)  ;;  %v1414_v4 = vld [vmem:[#allocation4 + $0x8] sm:$0xff] (!%p1807_p11)  ;;  %v1415_v6 = vld [vmem:[#allocation4 + $0x10] sm:$0xff] (!%p1807_p11) }
 0x359   : > { %1353 = vst.msk [vmem:[#allocation4 + $0x40] sm:$0xff] %vm565_vm2, %v1337_v13  ;;  %v1338_v55 = vadd.f32 %v1301_v7, %v1153_v3 }
 0x35a   : > { %1356 = vst.msk [vmem:[#allocation4 + $0x58] sm:$0xff] %vm565_vm2, %v1340_v37  ;;  %1471 = vperm.xlu0 (!%p1807_p11), %2096, %v2117_v19   ;;  %v2123_v18 = vpop.eup (!%p1807_p11), %2122  ;;  %v1416_v37 = vld [vmem:[#allocation4 + $0x18] sm:$0xff] (!%p1807_p11)  ;;  %v1418_v54 = vld [vmem:[#allocation4 + $0x28] sm:$0xff] (!%p1807_p11) }
 0x35b   : > { %1354 = vst.msk [vmem:[#allocation4 + $0x48] sm:$0xff] %vm565_vm2, %v1338_v55  ;;  %1486 = vperm.xlu1 (!%p1807_p11), %2097, %v2119_v15   ;;  %v2125_v51 = vpop.eup (!%p1807_p11), %2124 }
 0x35c   : > { %v2127_v25 = vpop.eup (!%p1807_p11), %2126 }
 0x35d   : > { %v1914_v26 = vpop.f32.mrb[12].mxu1  ;;  %1380 = sbr.rel (%p1807_p11) target bundleno = 1259 (0x4eb), region = 52  ;;  %v2129_v49 = vpop.eup (!%p1807_p11), %2128 }
 0x35e   : > { %v1343_v20 = vadd.f32 %v1914_v26, %v1158_v33  ;;  %v1314_v42 = vpop.f32.mrb[13].mxu1  ;;  %1481 = vperm.xlu0 (!%p1807_p11), %2096, %v2121_v61   ;;  %v1417_v33 = vld [vmem:[#allocation4 + $0x20] sm:$0xff] (!%p1807_p11) }
 0x35f   : > { %v1341_v22 = vadd.f32 %v1314_v42, %v1156_v44  ;;  %v1915_v31 = vpop.f32.mrb[14].mxu1  ;;  %1496 = vperm.xlu1 (!%p1807_p11), %2097, %v2123_v18   ;;  %v1423_v10 = vld [vmem:[#allocation4 + $0x50] sm:$0xff] (!%p1807_p11) }
 0x360   : > { %1359 = vst.msk [vmem:[#allocation4 + $0x70] sm:$0xff] %vm565_vm2, %v1343_v20  ;;  %v1344_v60 = vadd.f32 %v1915_v31, %v1159_v45  ;;  %v1317_v27 = vpop.f32.mrb[15].mxu1  ;;  %v1419_v31 = vld [vmem:[#allocation4 + $0x30] sm:$0xff] (!%p1807_p11)  ;;  %v1421_v28 = vld [vmem:[#allocation4 + $0x40] sm:$0xff] (!%p1807_p11) }
 0x361   : > { %1357 = vst.msk [vmem:[#allocation4 + $0x60] sm:$0xff] %vm565_vm2, %v1341_v22  ;;  %v1342_v34 = vadd.f32 %v1317_v27, %v1157_v48  ;;  %v1420_v48 = vld [vmem:[#allocation4 + $0x38] sm:$0xff] (!%p1807_p11) }
 0x362   : > { %1360 = vst.msk [vmem:[#allocation4 + $0x78] sm:$0xff] %vm565_vm2, %v1344_v60  ;;  %1491 = vperm.xlu0 (!%p1807_p11), %2096, %v2125_v51   ;;  %v1422_v12 = vld [vmem:[#allocation4 + $0x48] sm:$0xff] (!%p1807_p11)  ;;  %v1424_v62 = vld [vmem:[#allocation4 + $0x58] sm:$0xff] (!%p1807_p11) }
 0x363   : > { %1358 = vst.msk [vmem:[#allocation4 + $0x68] sm:$0xff] %vm565_vm2, %v1342_v34  ;;  %1506 = vperm.xlu1 (!%p1807_p11), %2097, %v2127_v25  }
 0x366   : > { %1501 = vperm.xlu0 %2096, %v2129_v49  }
 0x367   : > { %v1427_v61 = vld [vmem:[#allocation4 + $0x70] sm:$0xff] }
 0x368   : > { %v1425_v1 = vld [vmem:[#allocation4 + $0x60] sm:$0xff] }
 0x369   : > { %v1428_v19 = vld [vmem:[#allocation4 + $0x78] sm:$0xff] }
 0x36a   : > { %1537 = vperm.xlu0 %2096, %v1534_v2   ;;  %v1426_v29 = vld [vmem:[#allocation4 + $0x68] sm:$0xff] }
 0x3c1   : > { %v1442_v32 = vpop.permute.xlu1 %1441 }
 0x3c2   : > { %v1511_v36 = vmul.f32 %v1442_v32, %v1415_v6  ;;  %v1533_v32 = vld [vmem:[%s2810_s4] sm:$0x3] }
 0x3c9   : > { %v1432_v52 = vpop.permute.xlu0 %1431 }
 0x3ca   : > { %v1509_v3 = vmul.f32 %v1432_v52, %v1413_v57  ;;  %v1447_v9 = vpop.permute.xlu1 %1446 }
 0x3cb   : > { %v1512_v55 = vmul.f32 %v1447_v9, %v1416_v37 }
 0x3cd   : > { %v1437_v23 = vpop.permute.xlu0 %1436  ;;  %v1526_v56 = vpack.c.bf16 %v1512_v55, %v1511_v36 }
 0x3ce   : > { %v1510_v13 = vmul.f32 %v1437_v23, %v1414_v4  ;;  %v1457_v11 = vpop.permute.xlu1 %1456  ;;  %v1607_v23 = vld [vmem:[%s2295_s23] sm:$0xf] }
 0x3cf   : > { %v1514_v26 = vmul.f32 %v1457_v11, %v1418_v54  ;;  %v1547_v20 = vsel %vm565_vm2, %v1526_v56, 0 }
 0x3d0   : > { %v1525_v7 = vpack.c.bf16 %v1510_v13, %v1509_v3 }
 0x3d1   : > { %v1452_v44 = vpop.permute.xlu0 %1451 }
 0x3d2   : > { %v1544_v47 = vsel %vm565_vm2, %v1525_v7, 0  ;;  %v1513_v45 = vmul.f32 %v1452_v44, %v1417_v33  ;;  %v1467_v22 = vpop.permute.xlu1 %1466 }
 0x3d3   : > { %1917 = vmatpush3.bf16.xpose.msra.mxu0 %v1544_v47  ;;  %v1516_v27 = vmul.f32 %v1467_v22, %v1420_v48 }
 0x3d4   : > { %1918 = vmatprep.subr.bf16.mxu0 %v2190_v8  ;;  %v1527_v42 = vpack.c.bf16 %v1514_v26, %v1513_v45 }
 0x3d5   : > { %v1462_v60 = vpop.permute.xlu0 %1461 }
 0x3d6   : > { %v1515_v34 = vmul.f32 %v1462_v60, %v1419_v31  ;;  %v1550_v38 = vsel %vm565_vm2, %v1527_v42, 0  ;;  %v1477_v59 = vpop.permute.xlu1 %1476 }
 0x3d7   : > { %v1518_v46 = vmul.f32 %v1477_v59, %v1422_v12 }
 0x3d8   : > { %v1528_v0 = vpack.c.bf16 %v1516_v27, %v1515_v34 }
 0x3d9   : > { %v1472_v53 = vpop.permute.xlu0 %1471 }
 0x3da   : > { %v1517_v58 = vmul.f32 %v1472_v53, %v1421_v28  ;;  %v1553_v16 = vsel %vm565_vm2, %v1528_v0, 0  ;;  %v1487_v40 = vpop.permute.xlu1 %1486 }
 0x3db   : > { %1919 = vmatpush3.bf16.xpose.msra.mxu0 %v1547_v20  ;;  %v1520_v24 = vmul.f32 %v1487_v40, %v1424_v62 }
 0x3dc   : > { %1920 = vmatprep.subr.bf16.mxu0 %v2190_v8  ;;  %v1529_v41 = vpack.c.bf16 %v1518_v46, %v1517_v58 }
 0x3dd   : > { %v1482_v43 = vpop.permute.xlu0 %1481 }
 0x3de   : > { %v1519_v63 = vmul.f32 %v1482_v43, %v1423_v10  ;;  %v1556_v50 = vsel %vm565_vm2, %v1529_v41, 0  ;;  %v1497_v35 = vpop.permute.xlu1 %1496 }
 0x3df   : > { %v1522_v5 = vmul.f32 %v1497_v35, %v1426_v29 }
 0x3e0   : > { %v1530_v14 = vpack.c.bf16 %v1520_v24, %v1519_v63 }
 0x3e1   : > { %v1492_v39 = vpop.permute.xlu0 %1491 }
 0x3e2   : > { %v1521_v30 = vmul.f32 %v1492_v39, %v1425_v1  ;;  %v1559_v17 = vsel %vm565_vm2, %v1530_v14, 0  ;;  %v1507_v15 = vpop.permute.xlu1 %1506 }
 0x3e3   : > { %1921 = vmatpush3.bf16.xpose.msra.mxu0 %v1550_v38  ;;  %v1524_v51 = vmul.f32 %v1507_v15, %v1428_v19 }
 0x3e4   : > { %1922 = vmatprep.subr.bf16.mxu0 %v2190_v8  ;;  %v1531_v21 = vpack.c.bf16 %v1522_v5, %v1521_v30 }
 0x3e5   : > { %v1502_v18 = vpop.permute.xlu0 %1501 }
 0x3e6   : > { %v1523_v25 = vmul.f32 %v1502_v18, %v1427_v61  ;;  %v1562_v49 = vsel %vm565_vm2, %v1531_v21, 0 }
 0x3e8   : > { %v1532_v2 = vpack.c.bf16 %v1524_v51, %v1523_v25 }
 0x3e9   : > { %v1538_v57 = vpop.permute.xlu0 %1537 }
 0x3ea   : > { %v1565_v52 = vsel %vm565_vm2, %v1532_v2, 0 }
 0x3eb   : > { %1923 = vmatpush3.bf16.xpose.msra.mxu0 %v1553_v16 }
 0x3ec   : > { %1924 = vmatprep.subr.bf16.mxu0 %v2190_v8 }
 0x3f3   : > { %1925 = vmatpush3.bf16.xpose.msra.mxu0 %v1556_v50 }
 0x3f4   : > { %1926 = vmatprep.subr.bf16.mxu0 %v2190_v8 }
 0x3fb   : > { %1927 = vmatpush3.bf16.xpose.msra.mxu0 %v1559_v17 }
 0x3fc   : > { %1928 = vmatprep.subr.bf16.mxu0 %v2190_v8 }
 0x403   : > { %1929 = vmatpush3.bf16.xpose.msra.mxu0 %v1562_v49 }
 0x404   : > { %1930 = vmatprep.subr.bf16.mxu0 %v2190_v8 }
 0x40b   : > { %1931 = vmatpush3.bf16.xpose.msra.mxu0 %v1565_v52 }
 0x412   : > { %1933 = vmatmul.mubr.msk.bf16.vlgmr.msra.gmra.mrb[0].mxu0 %vm565_vm2, %v1533_v32 }
 0x4e5   : > { %v1601_v4 = vpop.f32.mrb[0].mxu0 }
 0x4e6   : > { %v1602_v3 = vadd.f32 %v1601_v4, %v1538_v57  ;;  %v1934_v13 = vpop.f32.mrb[1].mxu0 }
 0x4e7   : > { %v1604_v6 = vpop.f32.mrb[2].mxu0 }
 0x4e8   : > { %v1608_v37 = vadd.f32 %v1607_v23, %v1602_v3  ;;  %v1935_v7 = vpop.f32.mrb[3].mxu0 }
 0x4ea   : > { %1609 = vst [vmem:[%s2300_s22] sm:$0xf] %v1608_v37 }
 0x4eb PF: > { %s16_s27 = sadd.s32 1, %s2184_s27   ;;  %s2816_s9 = sld [smem:[#allocation5_spill]] }
 0x4ec   : > { %p13_p12 = scmp.ge.s32.totalorder %s16_s27, 10   ;;  %s2817_s14 = sld [smem:[#allocation6_spill]] }
 0x4ed   : > { %s2818_s15 = sld [smem:[#allocation7_spill]]  ;;  %s2819_s21 = smov %s2172_s24 }
 0x4ee   : > { %s2820_s22 = smov %s2176_s25  ;;  %s2821_s23 = smov %s2180_s26 }
 0x4ef   :  { %15 = sbr.rel (!%p13_p12) target bundleno = 4 (0x4), region = 91 }
 0x4f1   : > { %s2822_s24 = smov %s2816_s9 }
 0x4f2   : > { %s2823_s25 = smov %s2817_s14 }
 0x4f3   : > { %s2824_s26 = smov %s2818_s15 }

</bundles_post_ra>
